<compile_context>
chip_gen: v6e
topology: v6e:2x2x1
jax: 0.10.0
libtpu: 0.0.40
codegen_flags: <defaults>
</compile_context>

<pallas_src>
import jax
import jax.numpy as jnp
from jax.experimental import pallas as pl
from jax.experimental.pallas import tpu as pltpu

_LANES = 128  # lane width of the parameter slabs and the packed output


def _leaky_relu(v, slope=0.01):
    # PyTorch nn.LeakyReLU() default negative_slope = 0.01
    return jnp.where(v > 0, v, slope * v)


def ae_kernel(x_ref, wslab_ref, bslab_ref, out_ref):
    bt, F = x_ref.shape

    # ---- parameter slabs ----------------------------------------------------
    # bf16 weight slab rows: [ w1 (F,128) | w2p (128,128) | w5p (128,128) | w6p (128,128) ]
    w1 = wslab_ref[0:F, :]
    w2 = wslab_ref[F:F + 128, :]
    w5 = wslab_ref[F + 128:F + 256, :]
    w6 = wslab_ref[F + 256:F + 384, :]

    # f32 slab rows: 0-5 biases b1..b6 (lane zero-padded), 6-7 one-hot merge
    # rows (lane F / lane F+1), 8-15 w3^T (2 valid rows), 16-23 w4 (2 valid rows).
    b1 = bslab_ref[0:1, :]
    b2 = bslab_ref[1:2, :]
    b3_0 = bslab_ref[2:3, 0:1]
    b3_1 = bslab_ref[2:3, 1:2]
    b4 = bslab_ref[3:4, :]
    b5 = bslab_ref[4:5, :]
    b6 = bslab_ref[5:6, :]
    onehot0 = bslab_ref[6:7, :]          # 1.0 at lane F
    onehot1 = bslab_ref[7:8, :]          # 1.0 at lane F+1
    w3t0 = bslab_ref[8:9, :]
    w3t1 = bslab_ref[9:10, :]
    w4_0 = bslab_ref[16:17, :]
    w4_1 = bslab_ref[17:18, :]

    x = x_ref[...]
    if x.dtype != jnp.bfloat16:          # static dtype check; no cast if upstream is bf16
        x = x.astype(jnp.bfloat16)

    # ---- encoder ------------------------------------------------------------
    # L1: F -> 128 (MXU, bf16 operands, f32 accumulate)
    h1 = _leaky_relu(jnp.dot(x, w1, preferred_element_type=jnp.float32) + b1)
    # L2: 128 -> 32 (columns >= 32 of w2/b2 are zero, so lanes >= 32 stay exactly 0)
    h2 = _leaky_relu(
        jnp.dot(h1.astype(jnp.bfloat16), w2,
                preferred_element_type=jnp.float32) + b2)
    # L3: 32 -> 2 on the VPU/XLU: two f32 lane reductions kept as separate
    # (bt, 1) columns (no concatenate / re-extract round trip).
    xe0 = _leaky_relu(jnp.sum(h2 * w3t0, axis=-1, keepdims=True) + b3_0)
    xe1 = _leaky_relu(jnp.sum(h2 * w3t1, axis=-1, keepdims=True) + b3_1)

    # ---- decoder ------------------------------------------------------------
    # L1: 2 -> 32 on the VPU: rank-2 broadcast multiply-add (padded lanes stay 0)
    d1 = _leaky_relu(xe0 * w4_0 + xe1 * w4_1 + b4)                      # (bt, 128)
    # L2: 32 -> 128 (MXU)
    d2 = _leaky_relu(
        jnp.dot(d1.astype(jnp.bfloat16), w5,
                preferred_element_type=jnp.float32) + b5)
    # L3: 128 -> F (MXU, NO activation, matching the PyTorch module); lanes >= F are 0
    xd = jnp.dot(d2.astype(jnp.bfloat16), w6,
                 preferred_element_type=jnp.float32) + b6               # (bt, 128)

    # ---- packed output: [ x_d | x_e | zero pad ], merged in-register --------
    # xd lanes >= F are exactly zero by construction, so a single one-hot MAC
    # yields the packed block and we issue ONE unmasked 128-lane store.
    packed = xd + xe0 * onehot0 + xe1 * onehot1
    out_ref[...] = packed.astype(out_ref.dtype)


def ae_pack_params(params, in_features):
    """Packs the 12 (weight, bias) arrays into two lane-dense slabs (done once).

    Weights are stored as (fan_in, fan_out); biases as (1, fan_out) — matching
    PyTorch nn.Linear semantics (y = x @ W + b with W = torch_weight.T).
    """
    F = in_features
    assert F % 8 == 0 and F + 2 <= _LANES, (
        "packing assumes in_features % 8 == 0 and in_features + 2 <= 128")
    # TODO(synk): generalize the packing (pad x lanes / widen output slab) for
    # in_features violating the assert; not needed for the demo shapes.
    (w1, b1), (w2, b2), (w3, b3), (w4, b4), (w5, b5), (w6, b6) = params

    def pad2(a, rows, cols):
        return jnp.pad(a, ((0, rows - a.shape[0]), (0, cols - a.shape[1])))

    wslab = jnp.concatenate([
        pad2(w1, F, _LANES),        # F   -> 128
        pad2(w2, 128, _LANES),      # 128 -> 32  (zero-padded columns)
        pad2(w5, 128, _LANES),      # 32  -> 128 (zero-padded rows)
        pad2(w6, 128, _LANES),      # 128 -> F   (zero-padded columns)
    ], axis=0).astype(jnp.bfloat16)                         # (F + 384, 128)

    onehot0 = jnp.zeros((1, _LANES), jnp.float32).at[0, F].set(1.0)
    onehot1 = jnp.zeros((1, _LANES), jnp.float32).at[0, F + 1].set(1.0)
    bias_blk = jnp.concatenate([
        pad2(b1, 1, _LANES), pad2(b2, 1, _LANES), pad2(b3, 1, _LANES),
        pad2(b4, 1, _LANES), pad2(b5, 1, _LANES), pad2(b6, 1, _LANES),
        onehot0, onehot1,
    ], axis=0)                                              # (8, 128)
    w3t_blk = pad2(w3.T, 8, _LANES)                         # (8, 128), 2 valid rows
    w4_blk = pad2(w4, 8, _LANES)                            # (8, 128), 2 valid rows
    bslab = jnp.concatenate([bias_blk, w3t_blk, w4_blk],
                            axis=0).astype(jnp.float32)     # (24, 128)
    return wslab, bslab


def _num_tensorcores():
    """Best-effort TensorCore count (v7x has 2 TCs/chip, v5e/v6e have 1)."""
    try:
        kind = jax.devices()[0].device_kind.lower()
    except Exception:
        return 1
    return 2 if "v7" in kind else 1


_TILE_CANDIDATES = (1024, 512, 256, 128, 64, 32, 16, 8)   # all sublane-aligned


def _pick_batch_tile(B, num_tc=None):
    """Per-generation tile policy.

    Single-TC chips (v5e/v6e): the grid is a serial loop, so take the single
    largest tile (cap 1024 — live (bt,128) f32 activations stay << scoped VMEM
    on every generation). Dual-TC v7x: prefer an even grid-step count so both
    TensorCores get work; a grid of 1 would leave half the chip idle.
    """
    if num_tc is None:
        num_tc = _num_tensorcores()
    if num_tc <= 1:
        for bt in _TILE_CANDIDATES:
            if bt <= B and B % bt == 0:
                return bt
        return B
    for bt in _TILE_CANDIDATES:                       # even number of steps
        if bt <= B and B % bt == 0 and (B // bt) % 2 == 0:
            return bt
    for bt in _TILE_CANDIDATES:                       # any >= 2 steps
        if bt <= B and B % bt == 0 and B // bt >= 2:
            return bt
    return B   # NOTE: grid=(1,) — correct, but serializes v7x onto one TC.


def ae_forward_packed(x, wslab, bslab, *, batch_tile=None,
                      out_dtype=jnp.bfloat16, single_buffer_params=False):
    """Fused AE forward. Returns the packed (B, 128) block [ x_d | x_e | pad ].

    Preferred API when chaining: returning the packed block avoids an extra
    full-array HBM slice pass; consumers can slice lazily and fuse.
    NOTE: out_dtype defaults to bf16 (halves the writeback stream); pass
    jnp.float32 if full-precision outputs are required.
    """
    B, F = x.shape
    if batch_tile is None:
        batch_tile = _pick_batch_tile(B)
    assert B % batch_tile == 0, "batch must be divisible by batch_tile"

    # The parameter slabs are grid-invariant (index_map always (0, 0)), so they
    # are DMA'd once; optionally request single-buffering to save ~130 KB VMEM.
    param_kwargs = {}
    if single_buffer_params:
        param_kwargs = dict(pipeline_mode=pl.Buffered(1))
    in_specs = [
        pl.BlockSpec((batch_tile, F), lambda i: (i, 0)),
        pl.BlockSpec(wslab.shape, lambda i: (0, 0), **param_kwargs),
        pl.BlockSpec(bslab.shape, lambda i: (0, 0), **param_kwargs),
    ]
    out_specs = pl.BlockSpec((batch_tile, _LANES), lambda i: (i, 0))
    out_shape = jax.ShapeDtypeStruct((B, _LANES), out_dtype)

    # Accurate cost hint: the kernel is DMA-bound (MXU work is negligible), so
    # bytes_accessed is what lets XLA overlap neighbors around it.
    flops = int(B) * 2 * (F * 128 + 128 * 32 + 32 * 2 + 2 * 32 + 32 * 128 + 128 * F)
    bytes_accessed = int(
        x.size * x.dtype.itemsize
        + wslab.size * wslab.dtype.itemsize
        + bslab.size * bslab.dtype.itemsize
        + B * _LANES * jnp.dtype(out_dtype).itemsize)
    cost = pl.CostEstimate(flops=flops, transcendentals=0,
                           bytes_accessed=bytes_accessed)

    packed = pl.pallas_call(
        ae_kernel,
        out_shape=out_shape,
        grid_spec=pltpu.PrefetchScalarGridSpec(
            num_scalar_prefetch=0,
            grid=(B // batch_tile,),
            in_specs=in_specs,
            out_specs=out_specs,
        ),
        compiler_params=pltpu.CompilerParams(
            dimension_semantics=("parallel",)),
        cost_estimate=cost,
    )(x, wslab, bslab)
    return packed


def ae_forward(x, wslab, bslab, *, batch_tile=None, out_dtype=jnp.bfloat16):
    """Convenience wrapper returning (x_e, x_d); slice only inside jit so XLA
    can fuse the reads of the packed block into downstream consumers."""
    packed = ae_forward_packed(x, wslab, bslab, batch_tile=batch_tile,
                               out_dtype=out_dtype)
    F = x.shape[1]
    return packed[:, F:F + 2], packed[:, :F]


def init_ae_params(key, in_features):
    """Deterministic init mimicking nn.Linear's uniform(-1/sqrt(fan_in), ...) scale."""
    dims = [
        (in_features, 128),  # encoder L1
        (128, 32),           # encoder L2
        (32, 2),             # encoder L3
        (2, 32),             # decoder L1
        (32, 128),           # decoder L2
        (128, in_features),  # decoder L3
    ]
    params = []
    for (fan_in, fan_out) in dims:
        key, kw, kb = jax.random.split(key, 3)
        bound = 1.0 / jnp.sqrt(jnp.asarray(fan_in, jnp.float32))
        w = jax.random.uniform(kw, (fan_in, fan_out), jnp.float32, -bound, bound)
        b = jax.random.uniform(kb, (1, fan_out), jnp.float32, -bound, bound)
        params.append((w, b))
    return params


def ae_reference(x, params):
    """Plain-JAX reference with the same mixed precision as the kernel."""
    (w1, b1), (w2, b2), (w3, b3), (w4, b4), (w5, b5), (w6, b6) = params

    def mxu(h, w, b):
        return jnp.dot(h.astype(jnp.bfloat16), w.astype(jnp.bfloat16),
                       preferred_element_type=jnp.float32) + b

    h1 = _leaky_relu(mxu(x, w1, b1))
    h2 = _leaky_relu(mxu(h1, w2, b2))
    xe = _leaky_relu(h2 @ w3 + b3)          # f32, matches in-kernel VPU path
    d1 = _leaky_relu(xe @ w4 + b4)          # f32, matches in-kernel VPU path
    d2 = _leaky_relu(mxu(d1, w5, b5))
    xd = mxu(d2, w6, b6)
    return xe, xd


if __name__ == "__main__":
    in_features = 64
    batch = 256   # -> 1 step of 256 rows on v5e/v6e, 2x128 "parallel" steps on v7x

    key = jax.random.PRNGKey(0)
    key, kx = jax.random.split(key)
    x = jax.random.normal(kx, (batch, in_features), jnp.float32)

    params = init_ae_params(key, in_features)
    wslab, bslab = ae_pack_params(params, in_features)   # one-time packing

    fwd = jax.jit(ae_forward)
    xe, xd = fwd(x, wslab, bslab)
    (xe, xd) = jax.block_until_ready((xe, xd))

    xe_ref, xd_ref = ae_reference(x, params)
    assert xe.shape == (batch, 2) and xd.shape == (batch, in_features)
    xe32 = xe.astype(jnp.float32)
    xd32 = xd.astype(jnp.float32)
    assert jnp.allclose(xe32, xe_ref, atol=2e-2, rtol=2e-2), \
        float(jnp.max(jnp.abs(xe32 - xe_ref)))
    assert jnp.allclose(xd32, xd_ref, atol=2e-2, rtol=2e-2), \
        float(jnp.max(jnp.abs(xd32 - xd_ref)))

    print("KERNEL_OK")
</pallas_src>

<mosaic_0001>
module attributes {stable_mosaic.version = 11 : i64} {
  func.func @ae_kernel(%arg0: i32, %arg1: memref<256x64xf32, #tpu.memory_space<vmem>>, %arg2: memref<448x128xbf16, #tpu.memory_space<vmem>>, %arg3: memref<24x128xf32, #tpu.memory_space<vmem>>, %arg4: memref<256x128xbf16, #tpu.memory_space<vmem>>) attributes {dimension_semantics = [#tpu.dimension_semantics<parallel>], iteration_bounds = array<i64: 1>, scalar_prefetch = 0 : i64, scratch_operands = 0 : i64, tpu.core_type = #tpu.core_type<tc>, window_params = [{transform_indices = @transform_0, window_bounds = array<i64: 256, 64>}, {pipeline_mode = #tpu.pipeline_mode<synchronous>, transform_indices = @transform_1, window_bounds = array<i64: 448, 128>}, {pipeline_mode = #tpu.pipeline_mode<synchronous>, transform_indices = @transform_2, window_bounds = array<i64: 24, 128>}, {transform_indices = @transform_3, window_bounds = array<i64: 256, 128>}]} {
    %c0 = arith.constant 0 : index
    %c0_0 = arith.constant 0 : index
    %0 = vector.load %arg2[%c0, %c0_0] : memref<448x128xbf16, #tpu.memory_space<vmem>>, vector<64x128xbf16>
    %c64 = arith.constant 64 : index
    %c0_1 = arith.constant 0 : index
    %1 = vector.load %arg2[%c64, %c0_1] : memref<448x128xbf16, #tpu.memory_space<vmem>>, vector<128x128xbf16>
    %c192 = arith.constant 192 : index
    %c0_2 = arith.constant 0 : index
    %2 = vector.load %arg2[%c192, %c0_2] : memref<448x128xbf16, #tpu.memory_space<vmem>>, vector<128x128xbf16>
    %c320 = arith.constant 320 : index
    %c0_3 = arith.constant 0 : index
    %3 = vector.load %arg2[%c320, %c0_3] : memref<448x128xbf16, #tpu.memory_space<vmem>>, vector<128x128xbf16>
    %c0_4 = arith.constant 0 : index
    %c0_5 = arith.constant 0 : index
    %4 = vector.load %arg3[%c0_4, %c0_5] : memref<24x128xf32, #tpu.memory_space<vmem>>, vector<1x128xf32>
    %c1 = arith.constant 1 : index
    %c0_6 = arith.constant 0 : index
    %5 = vector.load %arg3[%c1, %c0_6] : memref<24x128xf32, #tpu.memory_space<vmem>>, vector<1x128xf32>
    %c2 = arith.constant 2 : index
    %c0_7 = arith.constant 0 : index
    %6 = vector.load %arg3[%c2, %c0_7] : memref<24x128xf32, #tpu.memory_space<vmem>>, vector<1x1xf32>
    %c2_8 = arith.constant 2 : index
    %c1_9 = arith.constant 1 : index
    %7 = vector.load %arg3[%c2_8, %c1_9] : memref<24x128xf32, #tpu.memory_space<vmem>>, vector<1x1xf32>
    %c3 = arith.constant 3 : index
    %c0_10 = arith.constant 0 : index
    %8 = vector.load %arg3[%c3, %c0_10] : memref<24x128xf32, #tpu.memory_space<vmem>>, vector<1x128xf32>
    %c4 = arith.constant 4 : index
    %c0_11 = arith.constant 0 : index
    %9 = vector.load %arg3[%c4, %c0_11] : memref<24x128xf32, #tpu.memory_space<vmem>>, vector<1x128xf32>
    %c5 = arith.constant 5 : index
    %c0_12 = arith.constant 0 : index
    %10 = vector.load %arg3[%c5, %c0_12] : memref<24x128xf32, #tpu.memory_space<vmem>>, vector<1x128xf32>
    %c6 = arith.constant 6 : index
    %c0_13 = arith.constant 0 : index
    %11 = vector.load %arg3[%c6, %c0_13] : memref<24x128xf32, #tpu.memory_space<vmem>>, vector<1x128xf32>
    %c7 = arith.constant 7 : index
    %c0_14 = arith.constant 0 : index
    %12 = vector.load %arg3[%c7, %c0_14] : memref<24x128xf32, #tpu.memory_space<vmem>>, vector<1x128xf32>
    %c8 = arith.constant 8 : index
    %c0_15 = arith.constant 0 : index
    %13 = vector.load %arg3[%c8, %c0_15] : memref<24x128xf32, #tpu.memory_space<vmem>>, vector<1x128xf32>
    %c9 = arith.constant 9 : index
    %c0_16 = arith.constant 0 : index
    %14 = vector.load %arg3[%c9, %c0_16] : memref<24x128xf32, #tpu.memory_space<vmem>>, vector<1x128xf32>
    %c16 = arith.constant 16 : index
    %c0_17 = arith.constant 0 : index
    %15 = vector.load %arg3[%c16, %c0_17] : memref<24x128xf32, #tpu.memory_space<vmem>>, vector<1x128xf32>
    %c17 = arith.constant 17 : index
    %c0_18 = arith.constant 0 : index
    %16 = vector.load %arg3[%c17, %c0_18] : memref<24x128xf32, #tpu.memory_space<vmem>>, vector<1x128xf32>
    %c0_19 = arith.constant 0 : index
    %c0_20 = arith.constant 0 : index
    %17 = vector.load %arg1[%c0_19, %c0_20] : memref<256x64xf32, #tpu.memory_space<vmem>>, vector<256x64xf32>
    %18 = arith.truncf %17 : vector<256x64xf32> to vector<256x64xbf16>
    %cst = arith.constant dense<0.000000e+00> : vector<256x128xf32>
    %19 = tpu.matmul %18, %0, %cst {dimension_numbers = #tpu.dot_dimension_numbers<[1], [0], [0], [1], [0, 0, 1, 1], [], []>} : vector<256x64xbf16>, vector<64x128xbf16>, vector<256x128xf32> -> vector<256x128xf32>
    %20 = vector.broadcast %4 : vector<1x128xf32> to vector<256x128xf32>
    %21 = arith.addf %19, %20 : vector<256x128xf32>
    %cst_21 = arith.constant 0.000000e+00 : f32
    %22 = vector.broadcast %cst_21 : f32 to vector<256x128xf32>
    %23 = arith.cmpf ogt, %21, %22 : vector<256x128xf32>
    %cst_22 = arith.constant 0.00999999977 : f32
    %24 = vector.broadcast %cst_22 : f32 to vector<256x128xf32>
    %25 = arith.mulf %24, %21 : vector<256x128xf32>
    %26 = arith.select %23, %21, %25 : vector<256x128xi1>, vector<256x128xf32>
    %27 = arith.truncf %26 : vector<256x128xf32> to vector<256x128xbf16>
    %cst_23 = arith.constant dense<0.000000e+00> : vector<256x128xf32>
    %28 = tpu.matmul %27, %1, %cst_23 {dimension_numbers = #tpu.dot_dimension_numbers<[1], [0], [0], [1], [0, 0, 1, 1], [], []>} : vector<256x128xbf16>, vector<128x128xbf16>, vector<256x128xf32> -> vector<256x128xf32>
    %29 = vector.broadcast %5 : vector<1x128xf32> to vector<256x128xf32>
    %30 = arith.addf %28, %29 : vector<256x128xf32>
    %cst_24 = arith.constant 0.000000e+00 : f32
    %31 = vector.broadcast %cst_24 : f32 to vector<256x128xf32>
    %32 = arith.cmpf ogt, %30, %31 : vector<256x128xf32>
    %cst_25 = arith.constant 0.00999999977 : f32
    %33 = vector.broadcast %cst_25 : f32 to vector<256x128xf32>
    %34 = arith.mulf %33, %30 : vector<256x128xf32>
    %35 = arith.select %32, %30, %34 : vector<256x128xi1>, vector<256x128xf32>
    %36 = vector.broadcast %13 : vector<1x128xf32> to vector<256x128xf32>
    %37 = arith.mulf %35, %36 : vector<256x128xf32>
    %cst_26 = arith.constant dense<0.000000e+00> : vector<256xf32>
    %38 = vector.multi_reduction <add>, %37, %cst_26 [1] : vector<256x128xf32> to vector<256xf32>
    %39 = vector.shape_cast %38 : vector<256xf32> to vector<256x1xf32>
    %40 = vector.broadcast %6 : vector<1x1xf32> to vector<256x1xf32>
    %41 = arith.addf %39, %40 : vector<256x1xf32>
    %cst_27 = arith.constant 0.000000e+00 : f32
    %42 = vector.broadcast %cst_27 : f32 to vector<256x1xf32>
    %43 = arith.cmpf ogt, %41, %42 : vector<256x1xf32>
    %cst_28 = arith.constant 0.00999999977 : f32
    %44 = vector.broadcast %cst_28 : f32 to vector<256x1xf32>
    %45 = arith.mulf %44, %41 : vector<256x1xf32>
    %46 = arith.select %43, %41, %45 : vector<256x1xi1>, vector<256x1xf32>
    %47 = vector.broadcast %14 : vector<1x128xf32> to vector<256x128xf32>
    %48 = arith.mulf %35, %47 : vector<256x128xf32>
    %cst_29 = arith.constant dense<0.000000e+00> : vector<256xf32>
    %49 = vector.multi_reduction <add>, %48, %cst_29 [1] : vector<256x128xf32> to vector<256xf32>
    %50 = vector.shape_cast %49 : vector<256xf32> to vector<256x1xf32>
    %51 = vector.broadcast %7 : vector<1x1xf32> to vector<256x1xf32>
    %52 = arith.addf %50, %51 : vector<256x1xf32>
    %cst_30 = arith.constant 0.000000e+00 : f32
    %53 = vector.broadcast %cst_30 : f32 to vector<256x1xf32>
    %54 = arith.cmpf ogt, %52, %53 : vector<256x1xf32>
    %cst_31 = arith.constant 0.00999999977 : f32
    %55 = vector.broadcast %cst_31 : f32 to vector<256x1xf32>
    %56 = arith.mulf %55, %52 : vector<256x1xf32>
    %57 = arith.select %54, %52, %56 : vector<256x1xi1>, vector<256x1xf32>
    %58 = vector.broadcast %46 : vector<256x1xf32> to vector<256x128xf32>
    %59 = vector.broadcast %15 : vector<1x128xf32> to vector<256x128xf32>
    %60 = arith.mulf %58, %59 : vector<256x128xf32>
    %61 = vector.broadcast %57 : vector<256x1xf32> to vector<256x128xf32>
    %62 = vector.broadcast %16 : vector<1x128xf32> to vector<256x128xf32>
    %63 = arith.mulf %61, %62 : vector<256x128xf32>
    %64 = arith.addf %60, %63 : vector<256x128xf32>
    %65 = vector.broadcast %8 : vector<1x128xf32> to vector<256x128xf32>
    %66 = arith.addf %64, %65 : vector<256x128xf32>
    %cst_32 = arith.constant 0.000000e+00 : f32
    %67 = vector.broadcast %cst_32 : f32 to vector<256x128xf32>
    %68 = arith.cmpf ogt, %66, %67 : vector<256x128xf32>
    %cst_33 = arith.constant 0.00999999977 : f32
    %69 = vector.broadcast %cst_33 : f32 to vector<256x128xf32>
    %70 = arith.mulf %69, %66 : vector<256x128xf32>
    %71 = arith.select %68, %66, %70 : vector<256x128xi1>, vector<256x128xf32>
    %72 = arith.truncf %71 : vector<256x128xf32> to vector<256x128xbf16>
    %cst_34 = arith.constant dense<0.000000e+00> : vector<256x128xf32>
    %73 = tpu.matmul %72, %2, %cst_34 {dimension_numbers = #tpu.dot_dimension_numbers<[1], [0], [0], [1], [0, 0, 1, 1], [], []>} : vector<256x128xbf16>, vector<128x128xbf16>, vector<256x128xf32> -> vector<256x128xf32>
    %74 = vector.broadcast %9 : vector<1x128xf32> to vector<256x128xf32>
    %75 = arith.addf %73, %74 : vector<256x128xf32>
    %cst_35 = arith.constant 0.000000e+00 : f32
    %76 = vector.broadcast %cst_35 : f32 to vector<256x128xf32>
    %77 = arith.cmpf ogt, %75, %76 : vector<256x128xf32>
    %cst_36 = arith.constant 0.00999999977 : f32
    %78 = vector.broadcast %cst_36 : f32 to vector<256x128xf32>
    %79 = arith.mulf %78, %75 : vector<256x128xf32>
    %80 = arith.select %77, %75, %79 : vector<256x128xi1>, vector<256x128xf32>
    %81 = arith.truncf %80 : vector<256x128xf32> to vector<256x128xbf16>
    %cst_37 = arith.constant dense<0.000000e+00> : vector<256x128xf32>
    %82 = tpu.matmul %81, %3, %cst_37 {dimension_numbers = #tpu.dot_dimension_numbers<[1], [0], [0], [1], [0, 0, 1, 1], [], []>} : vector<256x128xbf16>, vector<128x128xbf16>, vector<256x128xf32> -> vector<256x128xf32>
    %83 = vector.broadcast %10 : vector<1x128xf32> to vector<256x128xf32>
    %84 = arith.addf %82, %83 : vector<256x128xf32>
    %85 = vector.broadcast %46 : vector<256x1xf32> to vector<256x128xf32>
    %86 = vector.broadcast %11 : vector<1x128xf32> to vector<256x128xf32>
    %87 = arith.mulf %85, %86 : vector<256x128xf32>
    %88 = arith.addf %84, %87 : vector<256x128xf32>
    %89 = vector.broadcast %57 : vector<256x1xf32> to vector<256x128xf32>
    %90 = vector.broadcast %12 : vector<1x128xf32> to vector<256x128xf32>
    %91 = arith.mulf %89, %90 : vector<256x128xf32>
    %92 = arith.addf %88, %91 : vector<256x128xf32>
    %93 = arith.truncf %92 : vector<256x128xf32> to vector<256x128xbf16>
    %c0_38 = arith.constant 0 : index
    %c0_39 = arith.constant 0 : index
    %94 = vector.load %arg4[%c0_38, %c0_39] : memref<256x128xbf16, #tpu.memory_space<vmem>>, vector<256x128xbf16>
    tpu.vector_store %arg4[%c0_38, %c0_39], %93 {strides = array<i32>} : memref<256x128xbf16, #tpu.memory_space<vmem>>, vector<256x128xbf16>,
    return
  }
  func.func @transform_0(%arg0: i32) -> (i32, i32) {
    %c0_i32 = arith.constant 0 : i32
    %c0_i32_0 = arith.constant 0 : i32
    return %arg0, %c0_i32 : i32, i32
  }
  func.func @transform_1(%arg0: i32) -> (i32, i32) {
    %c0_i32 = arith.constant 0 : i32
    %c0_i32_0 = arith.constant 0 : i32
    %c0_i32_1 = arith.constant 0 : i32
    return %c0_i32, %c0_i32_0 : i32, i32
  }
  func.func @transform_2(%arg0: i32) -> (i32, i32) {
    %c0_i32 = arith.constant 0 : i32
    %c0_i32_0 = arith.constant 0 : i32
    %c0_i32_1 = arith.constant 0 : i32
    return %c0_i32, %c0_i32_0 : i32, i32
  }
  func.func @transform_3(%arg0: i32) -> (i32, i32) {
    %c0_i32 = arith.constant 0 : i32
    %c0_i32_0 = arith.constant 0 : i32
    return %arg0, %c0_i32 : i32, i32
  }
}

</mosaic_0001>

<bundles_post_ra>
// kernel: ae_forward.1
= control target key start
LH: loop header
LB: loop body
LE: loop exit
PB: predicated region body
PF: predicated region fallthrough
CT: control target
= control target key end

     0   :  { %vm159_vm0 = vcmask 523264   ;;  %s4485_s1 = inlined_call_operand.vmem [shape: bf16[448,128], index: 1, kind: input, shape index: {}]   ;;  %s4486_s0 = inlined_call_operand.vmem [shape: f32[256,64], index: 0, kind: input, shape index: {}]   ;;  %s4487_s2 = inlined_call_operand.vmem [shape: f32[24,128], index: 2, kind: input, shape index: {}]   ;;  %s4488_s3 = inlined_call_operand.vmem [shape: bf16[256,128], index: 3, kind: output, shape index: {}]  }
   0x1   :  { %v3219_v0 = vld [vmem:[%s4485_s1 + $0x18] sm:$0xff]   ;;  %v3220_v1 = vld [vmem:[%s4485_s1 + $0x10] sm:$0xff]   ;;  %v3221_v2 = vld [vmem:[%s4485_s1 + $0x8] sm:$0xff]  }
   0x2   :  { %2967 = vmatprep.subr.bf16.mxu0 %v3219_v0  ;;  %v83_v3 = vld [vmem:[%s4486_s0] sm:$0xff]  ;;  %v84_v4 = vld [vmem:[%s4486_s0 + $0x8] sm:$0xff]  ;;  %v85_v7 = vld [vmem:[%s4486_s0 + $0x10] sm:$0xff] }
   0x3   :  { %2968 = vmatpush3.bf16.msra.mxu0 %v3219_v0  ;;  %v115_v5 = vpack.c.bf16 %v84_v4, %v83_v3  ;;  %v3222_v6 = vld [vmem:[%s4485_s1] sm:$0xff]   ;;  %v86_v8 = vld [vmem:[%s4486_s0 + $0x18] sm:$0xff]  ;;  %v88_v10 = vld [vmem:[%s4486_s0 + $0x28] sm:$0xff] }
   0x4   :  { %2969 = vmatprep.subr.bf16.mxu0 %v3220_v1  ;;  %v87_v9 = vld [vmem:[%s4486_s0 + $0x20] sm:$0xff]  ;;  %v116_v11 = vpack.c.bf16 %v86_v8, %v85_v7  ;;  %v3223_v13 = vld [vmem:[%s4485_s1 + $0x58] sm:$0xff]   ;;  %v3224_v14 = vld [vmem:[%s4485_s1 + $0x50] sm:$0xff]  }
   0x5   :  { %2975 = vmatprep.mubr.msk.bf16.mxu0 %vm159_vm0, %v115_v5  ;;  %v117_v12 = vpack.c.bf16 %v88_v10, %v87_v9  ;;  %v89_v15 = vld [vmem:[%s4486_s0 + $0x30] sm:$0xff]  ;;  %v90_v16 = vld [vmem:[%s4486_s0 + $0x38] sm:$0xff]  ;;  %3007 = vmatprep.subr.bf16.mxu1 %v3223_v13  ;;  %v91_v17 = vld [vmem:[%s4486_s0 + $0x40] sm:$0xff] }
   0x6   :  { %v92_v18 = vld [vmem:[%s4486_s0 + $0x48] sm:$0xff]  ;;  %3008 = vmatpush3.bf16.msra.mxu1 %v3223_v13  ;;  %v3226_v20 = vld [vmem:[%s4485_s1 + $0x40] sm:$0xff]   ;;  %v118_v21 = vpack.c.bf16 %v90_v16, %v89_v15  ;;  %v93_v23 = vld [vmem:[%s4486_s0 + $0x50] sm:$0xff] }
   0x7   :  { %2970 = vmatpush3.bf16.msra.mxu0 %v3220_v1  ;;  %3009 = vmatprep.subr.bf16.mxu1 %v3224_v14  ;;  %v3225_v19 = vld [vmem:[%s4485_s1 + $0x48] sm:$0xff]   ;;  %v119_v22 = vpack.c.bf16 %v92_v18, %v91_v17  ;;  %v94_v24 = vld [vmem:[%s4486_s0 + $0x58] sm:$0xff]  ;;  %v95_v26 = vld [vmem:[%s4486_s0 + $0x60] sm:$0xff] }
   0x8   :  { %2971 = vmatprep.subr.bf16.mxu0 %v3221_v2  ;;  %v3227_v25 = vld [vmem:[%s4485_s1 + $0x38] sm:$0xff]   ;;  %v96_v27 = vld [vmem:[%s4486_s0 + $0x68] sm:$0xff]  ;;  %v120_v28 = vpack.c.bf16 %v94_v24, %v93_v23  ;;  %v97_v30 = vld [vmem:[%s4486_s0 + $0x70] sm:$0xff] }
   0x9   :  { %v121_v29 = vpack.c.bf16 %v96_v27, %v95_v26  ;;  %v98_v31 = vld [vmem:[%s4486_s0 + $0x78] sm:$0xff]  ;;  %v99_v32 = vld [vmem:[%s4486_s0 + $0x80] sm:$0xff]  ;;  %v100_v33 = vld [vmem:[%s4486_s0 + $0x88] sm:$0xff] }
   0xa   :  { %3010 = vmatpush3.bf16.msra.mxu1 %v3224_v14  ;;  %v122_v34 = vpack.c.bf16 %v98_v31, %v97_v30  ;;  %v123_v35 = vpack.c.bf16 %v100_v33, %v99_v32  ;;  %v101_v36 = vld [vmem:[%s4486_s0 + $0x90] sm:$0xff]  ;;  %v102_v37 = vld [vmem:[%s4486_s0 + $0x98] sm:$0xff]  ;;  %v103_v38 = vld [vmem:[%s4486_s0 + $0xa0] sm:$0xff] }
   0xb   :  { %2972 = vmatpush3.bf16.msra.mxu0 %v3221_v2  ;;  %3011 = vmatprep.subr.bf16.mxu1 %v3225_v19  ;;  %v104_v39 = vld [vmem:[%s4486_s0 + $0xa8] sm:$0xff]  ;;  %v124_v40 = vpack.c.bf16 %v102_v37, %v101_v36  ;;  %v105_v42 = vld [vmem:[%s4486_s0 + $0xb0] sm:$0xff]  ;;  %v106_v43 = vld [vmem:[%s4486_s0 + $0xb8] sm:$0xff] }
   0xc   :  { %2973 = vmatprep.subr.bf16.mxu0 %v3222_v6  ;;  %v125_v41 = vpack.c.bf16 %v104_v39, %v103_v38  ;;  %v107_v44 = vld [vmem:[%s4486_s0 + $0xc0] sm:$0xff]  ;;  %v108_v45 = vld [vmem:[%s4486_s0 + $0xc8] sm:$0xff]  ;;  %v126_v46 = vpack.c.bf16 %v106_v43, %v105_v42  ;;  %v109_v48 = vld [vmem:[%s4486_s0 + $0xd0] sm:$0xff] }
   0xd   :  { %v127_v47 = vpack.c.bf16 %v108_v45, %v107_v44  ;;  %v110_v49 = vld [vmem:[%s4486_s0 + $0xd8] sm:$0xff]  ;;  %v111_v50 = vld [vmem:[%s4486_s0 + $0xe0] sm:$0xff]  ;;  %v112_v51 = vld [vmem:[%s4486_s0 + $0xe8] sm:$0xff] }
   0xe   :  { %3012 = vmatpush3.bf16.msra.mxu1 %v3225_v19  ;;  %v128_v52 = vpack.c.bf16 %v110_v49, %v109_v48  ;;  %v129_v53 = vpack.c.bf16 %v112_v51, %v111_v50  ;;  %v113_v54 = vld [vmem:[%s4486_s0 + $0xf0] sm:$0xff]  ;;  %v114_v55 = vld [vmem:[%s4486_s0 + $0xf8] sm:$0xff]  ;;  %v3229_v58 = vld [vmem:[%s4485_s1 + $0x28] sm:$0xff]  }
   0xf   :  { %2974 = vmatpush3.bf16.msra.mxu0 %v3222_v6  ;;  %3013 = vmatprep.subr.bf16.mxu1 %v3226_v20  ;;  %v130_v56 = vpack.c.bf16 %v114_v55, %v113_v54  ;;  %v3228_v57 = vld [vmem:[%s4485_s1 + $0x30] sm:$0xff]   ;;  %v3230_v59 = vld [vmem:[%s4485_s1 + $0x20] sm:$0xff]  }
  0x10   :  { %v3421_v61 = vld [vmem:[%s4487_s2] ss:$0 sm:$0xff] }
  0x12   :  { %2976 = vmatmul.mubr.msk.bf16.vlgmr.msra.gmra.mxu0 %vm159_vm0, %v116_v11  ;;  %3014 = vmatpush3.bf16.msra.mxu1 %v3226_v20 }
  0x13   :  { %2979 = vmatprep.mubr.msk.bf16.mxu0 %vm159_vm0, %v117_v12  ;;  %3015 = vmatprep.subr.bf16.mxu1 %v3227_v25 }
  0x16   :  { %3016 = vmatpush3.bf16.msra.mxu1 %v3227_v25 }
  0x17   :  { %3017 = vmatprep.subr.bf16.mxu1 %v3228_v57 }
  0x1a   :  { %2980 = vmatmul.mubr.msk.bf16.gmra.mxu0 %vm159_vm0, %v118_v21  ;;  %3018 = vmatpush3.bf16.msra.mxu1 %v3228_v57 }
  0x1b   :  { %2983 = vmatprep.mubr.msk.bf16.mxu0 %vm159_vm0, %v119_v22  ;;  %3019 = vmatprep.subr.bf16.mxu1 %v3229_v58 }
  0x1e   :  { %3020 = vmatpush3.bf16.msra.mxu1 %v3229_v58 }
  0x1f   :  { %3021 = vmatprep.subr.bf16.mxu1 %v3230_v59 }
  0x22   :  { %2984 = vmatmul.mubr.msk.bf16.gmra.mxu0 %vm159_vm0, %v120_v28  ;;  %3022 = vmatpush3.bf16.msra.mxu1 %v3230_v59 }
  0x23   :  { %2987 = vmatprep.mubr.msk.bf16.mxu0 %vm159_vm0, %v121_v29 }
  0x2a   :  { %2988 = vmatmul.mubr.msk.bf16.gmra.mxu0 %vm159_vm0, %v122_v34 }
  0x2b   :  { %2991 = vmatprep.mubr.msk.bf16.mxu0 %vm159_vm0, %v123_v35 }
  0x32   :  { %2992 = vmatmul.mubr.msk.bf16.gmra.mxu0 %vm159_vm0, %v124_v40 }
  0x33   :  { %2995 = vmatprep.mubr.msk.bf16.mxu0 %vm159_vm0, %v125_v41 }
  0x3a   :  { %2996 = vmatmul.mubr.msk.bf16.gmra.mxu0 %vm159_vm0, %v126_v46 }
  0x3b   :  { %2999 = vmatprep.mubr.msk.bf16.mxu0 %vm159_vm0, %v127_v47 }
  0x42   :  { %3000 = vmatmul.mubr.msk.bf16.gmra.mxu0 %vm159_vm0, %v128_v52 }
  0x43   :  { %3003 = vmatprep.mubr.msk.bf16.mxu0 %vm159_vm0, %v129_v53 }
  0x4a   :  { %3004 = vmatmul.mubr.msk.bf16.gmra.mxu0 %vm159_vm0, %v130_v56 }
  0xd2   :  { %v2977_v60 = vpop.f32.mrf.mxu0 }
  0xd3   :  { %v251_v0 = vadd.f32 %v2977_v60, %v3421_v61 }
  0xd4   :  { %v242_v62 = vpop.f32.mrf.mxu0 }
  0xd5   :  { %v243_v63 = vadd.f32 %v3421_v61, %v242_v62  ;;  %v403_v7 = vmul.f32 0.01, %v251_v0  ;;  %vm371_vm3 = vcmp.gt.f32.partialorder %v251_v0, 0.0 }
  0xd6   :  { %v2978_v1 = vpop.f32.mrf.mxu0 }
  0xd7   :  { %v254_v2 = vadd.f32 %v2978_v1, %v3421_v61  ;;  %v401_v4 = vmul.f32 0.01, %v243_v63  ;;  %vm369_vm2 = vcmp.gt.f32.partialorder %v243_v63, 0.0  ;;  %v435_v19 = vsel %vm371_vm3, %v251_v0, %v403_v7 }
  0xd8   :  { %v245_v3 = vpop.f32.mrf.mxu0 }
  0xd9   :  { %vm372_vm1 = vcmp.gt.f32.partialorder %v254_v2, 0.0  ;;  %v404_v5 = vmul.f32 0.01, %v254_v2  ;;  %v246_v6 = vadd.f32 %v3421_v61, %v245_v3  ;;  %v433_v14 = vsel %vm369_vm2, %v243_v63, %v401_v4 }
  0xda   :  { %v2981_v8 = vpop.f32.mrf.mxu0 }
  0xdb   :  { %v402_v9 = vmul.f32 0.01, %v246_v6  ;;  %v267_v10 = vadd.f32 %v2981_v8, %v3421_v61  ;;  %vm370_vm4 = vcmp.gt.f32.partialorder %v246_v6, 0.0  ;;  %v436_v12 = vsel %vm372_vm1, %v254_v2, %v404_v5 }
  0xdc   :  { %v258_v11 = vpop.f32.mrf.mxu0  ;;  %v466_v21 = vpack.c.bf16 %v436_v12, %v435_v19 }
  0xdd   :  { %v259_v13 = vadd.f32 %v3421_v61, %v258_v11  ;;  %v434_v15 = vsel %vm370_vm4, %v246_v6, %v402_v9  ;;  %v407_v16 = vmul.f32 0.01, %v267_v10  ;;  %vm375_vm5 = vcmp.gt.f32.partialorder %v267_v10, 0.0 }
  0xde   :  { %v2982_v17 = vpop.f32.mrf.mxu0  ;;  %v465_v18 = vpack.c.bf16 %v434_v15, %v433_v14 }
  0xdf   :  { %v270_v20 = vadd.f32 %v2982_v17, %v3421_v61  ;;  %v405_v23 = vmul.f32 0.01, %v259_v13  ;;  %vm373_vm7 = vcmp.gt.f32.partialorder %v259_v13, 0.0  ;;  %v439_v27 = vsel %vm375_vm5, %v267_v10, %v407_v16 }
  0xe0   :  { %v261_v22 = vpop.f32.mrf.mxu0  ;;  %3023 = vmatprep.mubr.bf16.mxu1 %v465_v18 }
  0xe1   :  { %vm376_vm6 = vcmp.gt.f32.partialorder %v270_v20, 0.0  ;;  %v408_v24 = vmul.f32 0.01, %v270_v20  ;;  %v262_v25 = vadd.f32 %v3421_v61, %v261_v22  ;;  %3024 = vmatmul.mubr.bf16.vlgmr.msra.gmra.mxu1 %v466_v21  ;;  %v437_v33 = vsel %vm373_vm7, %v259_v13, %v405_v23 }
  0xe2   :  { %v2985_v26 = vpop.f32.mrf.mxu0 }
  0xe3   :  { %vm374_vm8 = vcmp.gt.f32.partialorder %v262_v25, 0.0  ;;  %v406_v28 = vmul.f32 0.01, %v262_v25  ;;  %v283_v29 = vadd.f32 %v2985_v26, %v3421_v61  ;;  %v440_v30 = vsel %vm376_vm6, %v270_v20, %v408_v24 }
  0xe4   :  { %v274_v31 = vpop.f32.mrf.mxu0  ;;  %v468_v38 = vpack.c.bf16 %v440_v30, %v439_v27 }
  0xe5   :  { %v275_v32 = vadd.f32 %v3421_v61, %v274_v31  ;;  %v438_v34 = vsel %vm374_vm8, %v262_v25, %v406_v28  ;;  %v411_v35 = vmul.f32 0.01, %v283_v29  ;;  %vm379_vm9 = vcmp.gt.f32.partialorder %v283_v29, 0.0 }
  0xe6   :  { %v2986_v36 = vpop.f32.mrf.mxu0  ;;  %v467_v37 = vpack.c.bf16 %v438_v34, %v437_v33 }
  0xe7   :  { %vm377_vm10 = vcmp.gt.f32.partialorder %v275_v32, 0.0  ;;  %v409_v39 = vmul.f32 0.01, %v275_v32  ;;  %v286_v40 = vadd.f32 %v2986_v36, %v3421_v61  ;;  %v443_v46 = vsel %vm379_vm9, %v283_v29, %v411_v35 }
  0xe8   :  { %v277_v41 = vpop.f32.mrf.mxu0  ;;  %3027 = vmatprep.mubr.bf16.mxu1 %v467_v37 }
  0xe9   :  { %vm380_vm11 = vcmp.gt.f32.partialorder %v286_v40, 0.0  ;;  %v412_v42 = vmul.f32 0.01, %v286_v40  ;;  %v278_v43 = vadd.f32 %v3421_v61, %v277_v41  ;;  %3028 = vmatmul.mubr.bf16.gmra.mxu1 %v468_v38  ;;  %v441_v45 = vsel %vm377_vm10, %v275_v32, %v409_v39 }
  0xea   :  { %v2989_v44 = vpop.f32.mrf.mxu0 }
  0xeb   :  { %vm378_vm12 = vcmp.gt.f32.partialorder %v278_v43, 0.0  ;;  %v410_v47 = vmul.f32 0.01, %v278_v43  ;;  %v299_v48 = vadd.f32 %v2989_v44, %v3421_v61  ;;  %v444_v49 = vsel %vm380_vm11, %v286_v40, %v412_v42 }
  0xec   :  { %v290_v50 = vpop.f32.mrf.mxu0  ;;  %v470_v53 = vpack.c.bf16 %v444_v49, %v443_v46 }
  0xed   :  { %v442_v51 = vsel %vm378_vm12, %v278_v43, %v410_v47  ;;  %v291_v52 = vadd.f32 %v3421_v61, %v290_v50  ;;  %v415_v54 = vmul.f32 0.01, %v299_v48  ;;  %vm383_vm13 = vcmp.gt.f32.partialorder %v299_v48, 0.0 }
  0xee   :  { %v469_v55 = vpack.c.bf16 %v442_v51, %v441_v45  ;;  %v2990_v56 = vpop.f32.mrf.mxu0 }
  0xef   :  { %vm381_vm14 = vcmp.gt.f32.partialorder %v291_v52, 0.0  ;;  %v413_v57 = vmul.f32 0.01, %v291_v52  ;;  %v302_v58 = vadd.f32 %v2990_v56, %v3421_v61  ;;  %v447_v0 = vsel %vm383_vm13, %v299_v48, %v415_v54 }
  0xf0   :  { %3031 = vmatprep.mubr.bf16.mxu1 %v469_v55  ;;  %v293_v59 = vpop.f32.mrf.mxu0 }
  0xf1   :  { %3032 = vmatmul.mubr.bf16.gmra.mxu1 %v470_v53  ;;  %vm384_vm15 = vcmp.gt.f32.partialorder %v302_v58, 0.0  ;;  %v416_v60 = vmul.f32 0.01, %v302_v58  ;;  %v294_v62 = vadd.f32 %v3421_v61, %v293_v59  ;;  %v445_v63 = vsel %vm381_vm14, %v291_v52, %v413_v57 }
  0xf2   :  { %v2993_v1 = vpop.f32.mrf.mxu0 }
  0xf3   :  { %vm382_vm0 = vcmp.gt.f32.partialorder %v294_v62, 0.0  ;;  %v414_v2 = vmul.f32 0.01, %v294_v62  ;;  %v448_v3 = vsel %vm384_vm15, %v302_v58, %v416_v60  ;;  %v315_v4 = vadd.f32 %v2993_v1, %v3421_v61 }
  0xf4   :  { %v306_v5 = vpop.f32.mrf.mxu0  ;;  %v472_v7 = vpack.c.bf16 %v448_v3, %v447_v0 }
  0xf5   :  { %v446_v6 = vsel %vm382_vm0, %v294_v62, %v414_v2  ;;  %v307_v8 = vadd.f32 %v3421_v61, %v306_v5  ;;  %v419_v10 = vmul.f32 0.01, %v315_v4  ;;  %vm387_vm1 = vcmp.gt.f32.partialorder %v315_v4, 0.0 }
  0xf6   :  { %v471_v9 = vpack.c.bf16 %v446_v6, %v445_v63  ;;  %v2994_v11 = vpop.f32.mrf.mxu0 }
  0xf7   :  { %vm385_vm2 = vcmp.gt.f32.partialorder %v307_v8, 0.0  ;;  %v417_v12 = vmul.f32 0.01, %v307_v8  ;;  %v318_v13 = vadd.f32 %v2994_v11, %v3421_v61  ;;  %v451_v18 = vsel %vm387_vm1, %v315_v4, %v419_v10 }
  0xf8   :  { %3035 = vmatprep.mubr.bf16.mxu1 %v471_v9  ;;  %v309_v14 = vpop.f32.mrf.mxu0 }
  0xf9   :  { %3036 = vmatmul.mubr.bf16.gmra.mxu1 %v472_v7  ;;  %vm388_vm3 = vcmp.gt.f32.partialorder %v318_v13, 0.0  ;;  %v420_v15 = vmul.f32 0.01, %v318_v13  ;;  %v310_v16 = vadd.f32 %v3421_v61, %v309_v14  ;;  %v449_v17 = vsel %vm385_vm2, %v307_v8, %v417_v12 }
  0xfa   :  { %v2997_v19 = vpop.f32.mrf.mxu0 }
  0xfb   :  { %vm386_vm4 = vcmp.gt.f32.partialorder %v310_v16, 0.0  ;;  %v418_v20 = vmul.f32 0.01, %v310_v16  ;;  %v452_v21 = vsel %vm388_vm3, %v318_v13, %v420_v15  ;;  %v331_v22 = vadd.f32 %v2997_v19, %v3421_v61  ;;  %v3458_v15 = vld [vmem:[%s4487_s2 + $0x1] ss:$0 sm:$0xff] }
  0xfc   :  { %v322_v23 = vpop.f32.mrf.mxu0  ;;  %v474_v25 = vpack.c.bf16 %v452_v21, %v451_v18 }
  0xfd   :  { %v450_v24 = vsel %vm386_vm4, %v310_v16, %v418_v20  ;;  %v323_v26 = vadd.f32 %v3421_v61, %v322_v23  ;;  %v423_v28 = vmul.f32 0.01, %v331_v22  ;;  %vm391_vm5 = vcmp.gt.f32.partialorder %v331_v22, 0.0  ;;  %v3465_v20 = vld [vmem:[%s4487_s2 + $0x8] ss:$0 sm:$0xff] }
  0xfe   :  { %v473_v27 = vpack.c.bf16 %v450_v24, %v449_v17  ;;  %v2998_v29 = vpop.f32.mrf.mxu0 }
  0xff   :  { %vm389_vm6 = vcmp.gt.f32.partialorder %v323_v26, 0.0  ;;  %v421_v30 = vmul.f32 0.01, %v323_v26  ;;  %v334_v31 = vadd.f32 %v2998_v29, %v3421_v61  ;;  %v455_v36 = vsel %vm391_vm5, %v331_v22, %v423_v28  ;;  %v3473_v29 = vld [vmem:[%s4487_s2 + $0x9] ss:$0 sm:$0xff] }
 0x100   :  { %3039 = vmatprep.mubr.bf16.mxu1 %v473_v27  ;;  %v325_v32 = vpop.f32.mrf.mxu0 }
 0x101   :  { %3040 = vmatmul.mubr.bf16.gmra.mxu1 %v474_v25  ;;  %vm392_vm7 = vcmp.gt.f32.partialorder %v334_v31, 0.0  ;;  %v424_v33 = vmul.f32 0.01, %v334_v31  ;;  %v326_v34 = vadd.f32 %v3421_v61, %v325_v32  ;;  %v453_v35 = vsel %vm389_vm6, %v323_v26, %v421_v30 }
 0x102   :  { %v3001_v37 = vpop.f32.mrf.mxu0 }
 0x103   :  { %vm390_vm8 = vcmp.gt.f32.partialorder %v326_v34, 0.0  ;;  %v422_v38 = vmul.f32 0.01, %v326_v34  ;;  %v456_v39 = vsel %vm392_vm7, %v334_v31, %v424_v33  ;;  %v347_v40 = vadd.f32 %v3001_v37, %v3421_v61 }
 0x104   :  { %v338_v41 = vpop.f32.mrf.mxu0  ;;  %v476_v43 = vpack.c.bf16 %v456_v39, %v455_v36 }
 0x105   :  { %v454_v42 = vsel %vm390_vm8, %v326_v34, %v422_v38  ;;  %v339_v44 = vadd.f32 %v3421_v61, %v338_v41  ;;  %v427_v46 = vmul.f32 0.01, %v347_v40  ;;  %vm395_vm9 = vcmp.gt.f32.partialorder %v347_v40, 0.0 }
 0x106   :  { %v475_v45 = vpack.c.bf16 %v454_v42, %v453_v35  ;;  %v3002_v47 = vpop.f32.mrf.mxu0 }
 0x107   :  { %vm393_vm10 = vcmp.gt.f32.partialorder %v339_v44, 0.0  ;;  %v425_v48 = vmul.f32 0.01, %v339_v44  ;;  %v350_v49 = vadd.f32 %v3002_v47, %v3421_v61  ;;  %v459_v54 = vsel %vm395_vm9, %v347_v40, %v427_v46 }
 0x108   :  { %3043 = vmatprep.mubr.bf16.mxu1 %v475_v45  ;;  %v341_v50 = vpop.f32.mrf.mxu0 }
 0x109   :  { %3044 = vmatmul.mubr.bf16.gmra.mxu1 %v476_v43  ;;  %vm396_vm11 = vcmp.gt.f32.partialorder %v350_v49, 0.0  ;;  %v428_v51 = vmul.f32 0.01, %v350_v49  ;;  %v342_v52 = vadd.f32 %v3421_v61, %v341_v50  ;;  %v457_v53 = vsel %vm393_vm10, %v339_v44, %v425_v48 }
 0x10a   :  { %v3005_v55 = vpop.f32.mrf.mxu0 }
 0x10b   :  { %vm394_vm12 = vcmp.gt.f32.partialorder %v342_v52, 0.0  ;;  %v426_v56 = vmul.f32 0.01, %v342_v52  ;;  %v460_v57 = vsel %vm396_vm11, %v350_v49, %v428_v51  ;;  %v363_v58 = vadd.f32 %v3005_v55, %v3421_v61 }
 0x10c   :  { %v354_v59 = vpop.f32.mrf.mxu0  ;;  %v478_v62 = vpack.c.bf16 %v460_v57, %v459_v54 }
 0x10d   :  { %v458_v60 = vsel %vm394_vm12, %v342_v52, %v426_v56  ;;  %v355_v63 = vadd.f32 %v3421_v61, %v354_v59  ;;  %v431_v1 = vmul.f32 0.01, %v363_v58  ;;  %vm399_vm13 = vcmp.gt.f32.partialorder %v363_v58, 0.0 }
 0x10e   :  { %v477_v0 = vpack.c.bf16 %v458_v60, %v457_v53  ;;  %v3006_v2 = vpop.f32.mrf.mxu0 }
 0x10f   :  { %v429_v3 = vmul.f32 0.01, %v355_v63  ;;  %v366_v4 = vadd.f32 %v3006_v2, %v3421_v61  ;;  %vm397_vm14 = vcmp.gt.f32.partialorder %v355_v63, 0.0  ;;  %v463_v8 = vsel %vm399_vm13, %v363_v58, %v431_v1 }
 0x110   :  { %3047 = vmatprep.mubr.bf16.mxu1 %v477_v0  ;;  %v357_v5 = vpop.f32.mrf.mxu0 }
 0x111   :  { %3048 = vmatmul.mubr.bf16.gmra.mxu1 %v478_v62  ;;  %vm400_vm15 = vcmp.gt.f32.partialorder %v366_v4, 0.0  ;;  %v432_v6 = vmul.f32 0.01, %v366_v4  ;;  %v358_v7 = vadd.f32 %v3421_v61, %v357_v5  ;;  %v461_v10 = vsel %vm397_vm14, %v355_v63, %v429_v3 }
 0x112   :  { %v3248_v62 = vmov 0  }
 0x113   :  { %vm398_vm0 = vcmp.gt.f32.partialorder %v358_v7, 0.0  ;;  %v430_v9 = vmul.f32 0.01, %v358_v7  ;;  %v464_v11 = vsel %vm400_vm15, %v366_v4, %v432_v6  ;;  %3169 = vset.pattern.permute.xlu1 %v3248_v62  ;;  %3171 = vset.pattern.permute.xlu0 %v3248_v62 }
 0x114   :  { %v480_v13 = vpack.c.bf16 %v464_v11, %v463_v8 }
 0x115   :  { %v462_v12 = vsel %vm398_vm0, %v358_v7, %v430_v9 }
 0x116   :  { %v479_v14 = vpack.c.bf16 %v462_v12, %v461_v10 }
 0x118   :  { %3051 = vmatprep.mubr.bf16.mxu1 %v479_v14 }
 0x119   :  { %3052 = vmatmul.mubr.bf16.gmra.mxu1 %v480_v13 }
 0x1a1   :  { %v3025_v16 = vpop.f32.mrf.mxu1 }
 0x1a2   :  { %v576_v17 = vadd.f32 %v3025_v16, %v3458_v15 }
 0x1a3   :  { %v567_v18 = vpop.f32.mrf.mxu1 }
 0x1a4   :  { %v728_v61 = vmul.f32 0.01, %v576_v17  ;;  %v568_v19 = vadd.f32 %v3458_v15, %v567_v18  ;;  %vm696_vm1 = vcmp.gt.f32.partialorder %v576_v17, 0.0 }
 0x1a5   :  { %v3026_v21 = vpop.f32.mrf.mxu1 }
 0x1a6   :  { %v726_v22 = vmul.f32 0.01, %v568_v19  ;;  %v579_v23 = vadd.f32 %v3026_v21, %v3458_v15  ;;  %v760_v24 = vsel %vm696_vm1, %v576_v17, %v728_v61  ;;  %vm694_vm2 = vcmp.gt.f32.partialorder %v568_v19, 0.0 }
 0x1a7   :  { %v570_v25 = vpop.f32.mrf.mxu1  ;;  %v796_v26 = vmul.f32 %v3465_v20, %v760_v24  ;;  %v1028_v35 = vmul.f32 %v3473_v29, %v760_v24 }
 0x1a8   :  { %v729_v27 = vmul.f32 0.01, %v579_v23  ;;  %v571_v28 = vadd.f32 %v3458_v15, %v570_v25  ;;  %v758_v30 = vsel %vm694_vm2, %v568_v19, %v726_v22  ;;  %vm697_vm3 = vcmp.gt.f32.partialorder %v579_v23, 0.0 }
 0x1a9   :  { %830 = vadd.xlane.f32.xlu0 %v796_v26  ;;  %v3029_v31 = vpop.f32.mrf.mxu1  ;;  %v1026_v32 = vmul.f32 %v3473_v29, %v758_v30  ;;  %v794_v42 = vmul.f32 %v3465_v20, %v758_v30 }
 0x1aa   :  { %v761_v33 = vsel %vm697_vm3, %v579_v23, %v729_v27  ;;  %v727_v36 = vmul.f32 0.01, %v571_v28  ;;  %v592_v37 = vadd.f32 %v3029_v31, %v3458_v15  ;;  %vm695_vm4 = vcmp.gt.f32.partialorder %v571_v28, 0.0 }
 0x1ab   :  { %v583_v34 = vpop.f32.mrf.mxu1  ;;  %1058 = vadd.xlane.f32.xlu1 %v1026_v32  ;;  %v797_v39 = vmul.f32 %v3465_v20, %v761_v33  ;;  %v1029_v46 = vmul.f32 %v3473_v29, %v761_v33 }
 0x1ac   :  { %v732_v43 = vmul.f32 0.01, %v592_v37  ;;  %v759_v44 = vsel %vm695_vm4, %v571_v28, %v727_v36  ;;  %vm700_vm5 = vcmp.gt.f32.partialorder %v592_v37, 0.0  ;;  %v584_v50 = vadd.f32 %v3458_v15, %v583_v34 }
 0x1ad   :  { %1062 = vadd.xlane.f32.xlu0 %v1028_v35  ;;  %v3030_v38 = vpop.f32.mrf.mxu1  ;;  %v795_v49 = vmul.f32 %v3465_v20, %v759_v44  ;;  %v1027_v53 = vmul.f32 %v3473_v29, %v759_v44 }
 0x1ae   :  { %v595_v40 = vadd.f32 %v3030_v38, %v3458_v15  ;;  %v764_v51 = vsel %vm700_vm5, %v592_v37, %v732_v43  ;;  %v730_v58 = vmul.f32 0.01, %v584_v50  ;;  %vm698_vm7 = vcmp.gt.f32.partialorder %v584_v50, 0.0 }
 0x1af   :  { %v586_v41 = vpop.f32.mrf.mxu1  ;;  %832 = vadd.xlane.f32.xlu1 %v797_v39  ;;  %v800_v57 = vmul.f32 %v3465_v20, %v764_v51  ;;  %v1032_v2 = vmul.f32 %v3473_v29, %v764_v51 }
 0x1b0   :  { %v733_v47 = vmul.f32 0.01, %v595_v40  ;;  %vm701_vm6 = vcmp.gt.f32.partialorder %v595_v40, 0.0  ;;  %v587_v54 = vadd.f32 %v3458_v15, %v586_v41  ;;  %v762_v7 = vsel %vm698_vm7, %v584_v50, %v730_v58 }
 0x1b1   :  { %v3033_v45 = vpop.f32.mrf.mxu1  ;;  %826 = vadd.xlane.f32.xlu0 %v794_v42  ;;  %v798_v11 = vmul.f32 %v3465_v20, %v762_v7  ;;  %v1030_v19 = vmul.f32 %v3473_v29, %v762_v7 }
 0x1b2   :  { %v765_v55 = vsel %vm701_vm6, %v595_v40, %v733_v47  ;;  %v608_v59 = vadd.f32 %v3033_v45, %v3458_v15  ;;  %v731_v1 = vmul.f32 0.01, %v587_v54  ;;  %vm699_vm8 = vcmp.gt.f32.partialorder %v587_v54, 0.0 }
 0x1b3   :  { %v599_v48 = vpop.f32.mrf.mxu1  ;;  %1064 = vadd.xlane.f32.xlu1 %v1029_v46  ;;  %v801_v63 = vmul.f32 %v3465_v20, %v765_v55  ;;  %v1033_v8 = vmul.f32 %v3473_v29, %v765_v55 }
 0x1b4   :  { %v600_v60 = vadd.f32 %v3458_v15, %v599_v48  ;;  %v736_v4 = vmul.f32 0.01, %v608_v59  ;;  %vm704_vm9 = vcmp.gt.f32.partialorder %v608_v59, 0.0  ;;  %v763_v10 = vsel %vm699_vm8, %v587_v54, %v731_v1 }
 0x1b5   :  { %v3034_v52 = vpop.f32.mrf.mxu1  ;;  %828 = vadd.xlane.f32.xlu0 %v795_v49  ;;  %v799_v18 = vmul.f32 %v3465_v20, %v763_v10  ;;  %v1031_v22 = vmul.f32 %v3473_v29, %v763_v10 }
 0x1b6   :  { %v734_v5 = vmul.f32 0.01, %v600_v60  ;;  %v611_v6 = vadd.f32 %v3034_v52, %v3458_v15  ;;  %vm702_vm10 = vcmp.gt.f32.partialorder %v600_v60, 0.0  ;;  %v768_v14 = vsel %vm704_vm9, %v608_v59, %v736_v4 }
 0x1b7   :  { %v602_v56 = vpop.f32.mrf.mxu1  ;;  %1060 = vadd.xlane.f32.xlu1 %v1027_v53  ;;  %v804_v23 = vmul.f32 %v3465_v20, %v768_v14  ;;  %v1036_v24 = vmul.f32 %v3473_v29, %v768_v14 }
 0x1b8   :  { %v737_v13 = vmul.f32 0.01, %v611_v6  ;;  %v766_v16 = vsel %vm702_vm10, %v600_v60, %v734_v5  ;;  %v603_v17 = vadd.f32 %v3458_v15, %v602_v56  ;;  %vm705_vm11 = vcmp.gt.f32.partialorder %v611_v6, 0.0 }
 0x1b9   :  { %838 = vadd.xlane.f32.xlu0 %v800_v57  ;;  %v3037_v0 = vpop.f32.mrf.mxu1  ;;  %v3510_v26 = vmul.f32 %v3465_v20, %v766_v16  ;;  %v3517_v34 = vmul.f32 %v3473_v29, %v766_v16 }
 0x1ba   :  { %v769_v27 = vsel %vm705_vm11, %v611_v6, %v737_v13  ;;  %v735_v31 = vmul.f32 0.01, %v603_v17  ;;  %v3514_v32 = vadd.f32 %v3037_v0, %v3458_v15  ;;  %vm703_vm13 = vcmp.gt.f32.partialorder %v603_v17, 0.0 }
 0x1bb   :  { %840 = vadd.xlane.f32.xlu1 %v801_v63  ;;  %v3493_v3 = vpop.f32.mrf.mxu1  ;;  %v805_v38 = vmul.f32 %v3465_v20, %v769_v27  ;;  %v1037_v39 = vmul.f32 %v3473_v29, %v769_v27 }
 0x1bc   :  { %v740_v46 = vmul.f32 0.01, %v3514_v32  ;;  %v767_v47 = vsel %vm703_vm13, %v603_v17, %v735_v31  ;;  %v3540_v54 = vadd.f32 %v3458_v15, %v3493_v3  ;;  %vm708_vm1 = vcmp.gt.f32.partialorder %v3514_v32, 0.0 }
 0x1bd   :  { %1070 = vadd.xlane.f32.xlu0 %v1032_v2  ;;  %v3497_v9 = vpop.f32.mrf.mxu1  ;;  %v803_v0 = vmul.f32 %v3465_v20, %v767_v47 }
 0x1be   :  { %v627_v63 = vadd.f32 %v3497_v9, %v3458_v15  ;;  %v3561_v7 = vmul.f32 0.01, %v3540_v54  ;;  %vm706_vm8 = vcmp.gt.f32.partialorder %v3540_v54, 0.0 }
 0x1bf   :  { %1072 = vadd.xlane.f32.xlu1 %v1033_v8  ;;  %v3500_v12 = vpop.f32.mrf.mxu1  ;;  %v1035_v8 = vmul.f32 %v3473_v29, %v767_v47 }
 0x1c0   :  { %v741_v17 = vmul.f32 0.01, %v627_v63  ;;  %vm709_vm5 = vcmp.gt.f32.partialorder %v627_v63, 0.0 }
 0x1c1   :  { %834 = vadd.xlane.f32.xlu0 %v798_v11  ;;  %v3041_v61 = vpop.f32.mrf.mxu1 }
 0x1c2   :  { %v640_v21 = vadd.f32 %v3041_v61, %v3458_v15 }
 0x1c3   :  { %836 = vadd.xlane.f32.xlu1 %v799_v18  ;;  %v631_v25 = vpop.f32.mrf.mxu1 }
 0x1c4   :  { %v744_v28 = vmul.f32 0.01, %v640_v21  ;;  %v632_v30 = vadd.f32 %v3458_v15, %v631_v25  ;;  %vm712_vm12 = vcmp.gt.f32.partialorder %v640_v21, 0.0  ;;  %v772_v25 = vsel %vm708_vm1, %v3514_v32, %v740_v46 }
 0x1c5   :  { %1066 = vadd.xlane.f32.xlu0 %v1030_v19  ;;  %v3042_v33 = vpop.f32.mrf.mxu1 }
 0x1c6   :  { %v742_v35 = vmul.f32 0.01, %v632_v30  ;;  %v643_v36 = vadd.f32 %v3042_v33, %v3458_v15  ;;  %v776_v37 = vsel %vm712_vm12, %v640_v21, %v744_v28  ;;  %vm710_vm14 = vcmp.gt.f32.partialorder %v632_v30, 0.0 }
 0x1c7   :  { %1068 = vadd.xlane.f32.xlu1 %v1031_v22  ;;  %v634_v40 = vpop.f32.mrf.mxu1  ;;  %v3523_v41 = vmul.f32 %v3465_v20, %v776_v37  ;;  %v3526_v42 = vmul.f32 %v3473_v29, %v776_v37 }
 0x1c8   :  { %v745_v43 = vmul.f32 0.01, %v643_v36  ;;  %v635_v44 = vadd.f32 %v3458_v15, %v634_v40  ;;  %vm713_vm15 = vcmp.gt.f32.partialorder %v643_v36, 0.0  ;;  %v774_v45 = vsel %vm710_vm14, %v632_v30, %v742_v35 }
 0x1c9   :  { %846 = vadd.xlane.f32.xlu0 %v804_v23  ;;  %v3045_v48 = vpop.f32.mrf.mxu1  ;;  %v3532_v49 = vmul.f32 %v3465_v20, %v774_v45  ;;  %v3535_v50 = vmul.f32 %v3473_v29, %v774_v45 }
 0x1ca   :  { %v743_v51 = vmul.f32 0.01, %v635_v44  ;;  %v656_v52 = vadd.f32 %v3045_v48, %v3458_v15  ;;  %v777_v53 = vsel %vm713_vm15, %v643_v36, %v745_v43  ;;  %vm711_vm0 = vcmp.gt.f32.partialorder %v635_v44, 0.0 }
 0x1cb   :  { %848 = vadd.xlane.f32.xlu1 %v805_v38  ;;  %v647_v55 = vpop.f32.mrf.mxu1  ;;  %v3544_v56 = vmul.f32 %v3465_v20, %v777_v53  ;;  %v3547_v57 = vmul.f32 %v3473_v29, %v777_v53 }
 0x1cc   :  { %v748_v58 = vmul.f32 0.01, %v656_v52  ;;  %v648_v59 = vadd.f32 %v3458_v15, %v647_v55  ;;  %v775_v60 = vsel %vm711_vm0, %v635_v44, %v743_v51  ;;  %vm716_vm2 = vcmp.gt.f32.partialorder %v656_v52, 0.0 }
 0x1cd   :  { %1078 = vadd.xlane.f32.xlu0 %v1036_v24  ;;  %v3046_v1 = vpop.f32.mrf.mxu1  ;;  %v3554_v2 = vmul.f32 %v3465_v20, %v775_v60  ;;  %v3557_v3 = vmul.f32 %v3473_v29, %v775_v60  ;;  %v619_v24 = vadd.f32 %v3458_v15, %v3500_v12  ;;  %v773_v12 = vsel %vm709_vm5, %v627_v63, %v741_v17 }
 0x1ce   :  { %v746_v4 = vmul.f32 0.01, %v648_v59  ;;  %v659_v5 = vadd.f32 %v3046_v1, %v3458_v15  ;;  %v780_v6 = vsel %vm716_vm2, %v656_v52, %v748_v58  ;;  %vm714_vm3 = vcmp.gt.f32.partialorder %v648_v59, 0.0 }
 0x1cf   :  { %1080 = vadd.xlane.f32.xlu1 %v1037_v39  ;;  %v650_v9 = vpop.f32.mrf.mxu1  ;;  %v3565_v10 = vmul.f32 %v3465_v20, %v780_v6  ;;  %v3568_v11 = vmul.f32 %v3473_v29, %v780_v6  ;;  %v739_v40 = vmul.f32 0.01, %v619_v24  ;;  %v809_v51 = vmul.f32 %v3465_v20, %v773_v12 }
 0x1d0   :  { %v749_v13 = vmul.f32 0.01, %v659_v5  ;;  %v651_v14 = vadd.f32 %v3458_v15, %v650_v9  ;;  %vm717_vm4 = vcmp.gt.f32.partialorder %v659_v5, 0.0  ;;  %v778_v16 = vsel %vm714_vm3, %v648_v59, %v746_v4 }
 0x1d1   :  { %842 = vadd.xlane.f32.xlu0 %v3510_v26  ;;  %v3049_v18 = vpop.f32.mrf.mxu1  ;;  %v3573_v61 = vmul.f32 %v3465_v20, %v778_v16  ;;  %v3576_v19 = vmul.f32 %v3473_v29, %v778_v16  ;;  %vm707_vm11 = vcmp.gt.f32.partialorder %v619_v24, 0.0  ;;  %v1040_v63 = vmul.f32 %v3473_v29, %v772_v25 }
 0x1d2   :  { %v747_v21 = vmul.f32 0.01, %v651_v14  ;;  %v672_v22 = vadd.f32 %v3049_v18, %v3458_v15  ;;  %v781_v23 = vsel %vm717_vm4, %v659_v5, %v749_v13  ;;  %vm715_vm6 = vcmp.gt.f32.partialorder %v651_v14, 0.0 }
 0x1d3   :  { %844 = vadd.xlane.f32.xlu1 %v803_v0  ;;  %v663_v26 = vpop.f32.mrf.mxu1  ;;  %v3585_v27 = vmul.f32 %v3465_v20, %v781_v23  ;;  %v3588_v28 = vmul.f32 %v3473_v29, %v781_v23  ;;  %v770_v0 = vsel %vm706_vm8, %v3540_v54, %v3561_v7  ;;  %v1041_v13 = vmul.f32 %v3473_v29, %v773_v12 }
 0x1d4   :  { %v752_v30 = vmul.f32 0.01, %v672_v22  ;;  %v664_v31 = vadd.f32 %v3458_v15, %v663_v26  ;;  %v779_v33 = vsel %vm715_vm6, %v651_v14, %v747_v21  ;;  %vm720_vm7 = vcmp.gt.f32.partialorder %v672_v22, 0.0 }
 0x1d5   :  { %1074 = vadd.xlane.f32.xlu0 %v3517_v34  ;;  %v3050_v35 = vpop.f32.mrf.mxu1  ;;  %v3595_v32 = vmul.f32 %v3465_v20, %v779_v33  ;;  %v3598_v36 = vmul.f32 %v3473_v29, %v779_v33  ;;  %v808_v34 = vmul.f32 %v3465_v20, %v772_v25  ;;  %v771_v14 = vsel %vm707_vm11, %v619_v24, %v739_v40 }
 0x1d6   :  { %v750_v37 = vmul.f32 0.01, %v664_v31  ;;  %v675_v38 = vadd.f32 %v3050_v35, %v3458_v15  ;;  %v784_v39 = vsel %vm720_vm7, %v672_v22, %v752_v30  ;;  %vm718_vm9 = vcmp.gt.f32.partialorder %v664_v31, 0.0 }
 0x1d7   :  { %1076 = vadd.xlane.f32.xlu1 %v1035_v8  ;;  %v666_v43 = vpop.f32.mrf.mxu1  ;;  %v3603_v44 = vmul.f32 %v3465_v20, %v784_v39  ;;  %v3606_v45 = vmul.f32 %v3473_v29, %v784_v39  ;;  %v806_v22 = vmul.f32 %v3465_v20, %v770_v0  ;;  %v807_v33 = vmul.f32 %v3465_v20, %v771_v14 }
 0x1d8   :  { %v753_v46 = vmul.f32 0.01, %v675_v38  ;;  %v667_v47 = vadd.f32 %v3458_v15, %v666_v43  ;;  %vm721_vm10 = vcmp.gt.f32.partialorder %v675_v38, 0.0  ;;  %v782_v48 = vsel %vm718_vm9, %v664_v31, %v750_v37 }
 0x1d9   :  { %854 = vadd.xlane.f32.xlu0 %v808_v34  ;;  %v3053_v52 = vpop.f32.mrf.mxu1  ;;  %v3611_v53 = vmul.f32 %v3465_v20, %v782_v48  ;;  %v3614_v55 = vmul.f32 %v3473_v29, %v782_v48  ;;  %v1038_v39 = vmul.f32 %v3473_v29, %v770_v0  ;;  %v1039_v43 = vmul.f32 %v3473_v29, %v771_v14 }
 0x1da   :  { %v751_v58 = vmul.f32 0.01, %v667_v47  ;;  %v688_v59 = vadd.f32 %v3053_v52, %v3458_v15  ;;  %v785_v60 = vsel %vm721_vm10, %v675_v38, %v753_v46  ;;  %vm719_vm12 = vcmp.gt.f32.partialorder %v667_v47, 0.0  ;;  %v3232_v52 = vld [vmem:[%s4485_s1 + $0x90] sm:$0xff]  }
 0x1db   :  { %856 = vadd.xlane.f32.xlu1 %v809_v51  ;;  %v679_v1 = vpop.f32.mrf.mxu1  ;;  %v821_v4 = vmul.f32 %v3465_v20, %v785_v60  ;;  %v1053_v5 = vmul.f32 %v3473_v29, %v785_v60 }
 0x1dc   :  { %v756_v6 = vmul.f32 0.01, %v688_v59  ;;  %v680_v8 = vadd.f32 %v3458_v15, %v679_v1  ;;  %v783_v9 = vsel %vm719_vm12, %v667_v47, %v751_v58  ;;  %vm724_vm13 = vcmp.gt.f32.partialorder %v688_v59, 0.0 }
 0x1dd   :  { %1086 = vadd.xlane.f32.xlu0 %v1040_v63  ;;  %v3054_v16 = vpop.f32.mrf.mxu1  ;;  %v819_v17 = vmul.f32 %v3465_v20, %v783_v9  ;;  %v1051_v54 = vmul.f32 %v3473_v29, %v783_v9  ;;  %v3233_v63 = vld [vmem:[%s4485_s1 + $0x88] sm:$0xff]   ;;  %v3234_v9 = vld [vmem:[%s4485_s1 + $0x80] sm:$0xff]  }
 0x1de   :  { %v754_v7 = vmul.f32 0.01, %v680_v8  ;;  %v691_v18 = vadd.f32 %v3054_v16, %v3458_v15  ;;  %v788_v21 = vsel %vm724_vm13, %v688_v59, %v756_v6  ;;  %vm722_vm14 = vcmp.gt.f32.partialorder %v680_v8, 0.0 }
 0x1df   :  { %1088 = vadd.xlane.f32.xlu1 %v1041_v13  ;;  %v682_v23 = vpop.f32.mrf.mxu1  ;;  %v824_v25 = vmul.f32 %v3465_v20, %v788_v21  ;;  %v1056_v26 = vmul.f32 %v3473_v29, %v788_v21 }
 0x1e0   :  { %v757_v30 = vmul.f32 0.01, %v691_v18  ;;  %v683_v24 = vadd.f32 %v3458_v15, %v682_v23  ;;  %vm725_vm15 = vcmp.gt.f32.partialorder %v691_v18, 0.0  ;;  %v786_v31 = vsel %vm722_vm14, %v680_v8, %v754_v7 }
 0x1e1   :  { %850 = vadd.xlane.f32.xlu0 %v806_v22  ;;  %v822_v12 = vmul.f32 %v3465_v20, %v786_v31  ;;  %v1054_v35 = vmul.f32 %v3473_v29, %v786_v31 }
 0x1e2   :  { %v755_v37 = vmul.f32 0.01, %v683_v24  ;;  %v789_v38 = vsel %vm725_vm15, %v691_v18, %v757_v30  ;;  %vm723_vm0 = vcmp.gt.f32.partialorder %v683_v24, 0.0  ;;  %v3235_v18 = vld [vmem:[%s4485_s1 + $0x78] sm:$0xff]  }
 0x1e3   :  { %852 = vadd.xlane.f32.xlu1 %v807_v33  ;;  %v825_v40 = vmul.f32 %v3465_v20, %v789_v38  ;;  %v1057_v34 = vmul.f32 %v3473_v29, %v789_v38 }
 0x1e4   :  { %v787_v15 = vsel %vm723_vm0, %v683_v24, %v755_v37  ;;  %v3236_v24 = vld [vmem:[%s4485_s1 + $0x70] sm:$0xff]  }
 0x1e5   :  { %1082 = vadd.xlane.f32.xlu0 %v1038_v39  ;;  %v823_v46 = vmul.f32 %v3465_v20, %v787_v15  ;;  %v1055_v47 = vmul.f32 %v3473_v29, %v787_v15  ;;  %v3666_v20 = vld [vmem:[%s4487_s2 + $0x2] ss:$0 sm:$0xff] }
 0x1e7   :  { %1084 = vadd.xlane.f32.xlu1 %v1039_v43 }
 0x1e9   :  { %862 = vadd.xlane.f32.xlu0 %v3523_v41 }
 0x1eb   :  { %864 = vadd.xlane.f32.xlu1 %v3544_v56 }
 0x1ed   :  { %1094 = vadd.xlane.f32.xlu0 %v3526_v42 }
 0x1ef   :  { %1096 = vadd.xlane.f32.xlu1 %v3547_v57 }
 0x1f1   :  { %858 = vadd.xlane.f32.xlu0 %v3532_v49 }
 0x1f3   :  { %860 = vadd.xlane.f32.xlu1 %v3554_v2 }
 0x1f5   :  { %1090 = vadd.xlane.f32.xlu0 %v3535_v50 }
 0x1f7   :  { %1092 = vadd.xlane.f32.xlu1 %v3557_v3 }
 0x1f9   :  { %870 = vadd.xlane.f32.xlu0 %v3565_v10 }
 0x1fb   :  { %872 = vadd.xlane.f32.xlu1 %v3585_v27  ;;  %v3231_v27 = vld [vmem:[%s4485_s1 + $0x98] sm:$0xff]  }
 0x1fc   :  { %3055 = vmatprep.subr.bf16.mxu0 %v3231_v27 }
 0x1fd   :  { %1102 = vadd.xlane.f32.xlu0 %v3568_v11  ;;  %3056 = vmatpush3.bf16.msra.mxu0 %v3231_v27 }
 0x1fe   :  { %3057 = vmatprep.subr.bf16.mxu0 %v3232_v52 }
 0x1ff   :  { %1104 = vadd.xlane.f32.xlu1 %v3588_v28  ;;  %v3249_v28 = vmov 1  }
 0x201   :  { %866 = vadd.xlane.f32.xlu0 %v3573_v61  ;;  %3058 = vmatpush3.bf16.msra.mxu0 %v3232_v52 }
 0x202   :  { %3059 = vmatprep.subr.bf16.mxu0 %v3233_v63 }
 0x203   :  { %868 = vadd.xlane.f32.xlu1 %v3595_v32 }
 0x205   :  { %1098 = vadd.xlane.f32.xlu0 %v3576_v19  ;;  %3060 = vmatpush3.bf16.msra.mxu0 %v3233_v63 }
 0x206   :  { %3061 = vmatprep.subr.bf16.mxu0 %v3234_v9 }
 0x207   :  { %1100 = vadd.xlane.f32.xlu1 %v3598_v36 }
 0x209   :  { %878 = vadd.xlane.f32.xlu0 %v3603_v44  ;;  %3062 = vmatpush3.bf16.msra.mxu0 %v3234_v9 }
 0x20a   :  { %3063 = vmatprep.subr.bf16.mxu0 %v3235_v18 }
 0x20b   :  { %880 = vadd.xlane.f32.xlu1 %v821_v4 }
 0x20d   :  { %1110 = vadd.xlane.f32.xlu0 %v3606_v45  ;;  %3064 = vmatpush3.bf16.msra.mxu0 %v3235_v18 }
 0x20e   :  { %3065 = vmatprep.subr.bf16.mxu0 %v3236_v24 }
 0x20f   :  { %1112 = vadd.xlane.f32.xlu1 %v1053_v5 }
 0x211   :  { %874 = vadd.xlane.f32.xlu0 %v3611_v53  ;;  %3066 = vmatpush3.bf16.msra.mxu0 %v3236_v24 }
 0x213   :  { %876 = vadd.xlane.f32.xlu1 %v819_v17 }
 0x215   :  { %1106 = vadd.xlane.f32.xlu0 %v3614_v55 }
 0x217   :  { %1108 = vadd.xlane.f32.xlu1 %v1051_v54 }
 0x219   :  { %886 = vadd.xlane.f32.xlu0 %v824_v25 }
 0x21b   :  { %888 = vadd.xlane.f32.xlu1 %v825_v40  ;;  %v3237_v40 = vld [vmem:[%s4485_s1 + $0x68] sm:$0xff]  }
 0x21c   :  { %3067 = vmatprep.subr.bf16.mxu0 %v3237_v40 }
 0x21d   :  { %1118 = vadd.xlane.f32.xlu0 %v1056_v26  ;;  %3068 = vmatpush3.bf16.msra.mxu0 %v3237_v40 }
 0x21f   :  { %1120 = vadd.xlane.f32.xlu1 %v1057_v34 }
 0x221   :  { %882 = vadd.xlane.f32.xlu0 %v822_v12 }
 0x223   :  { %884 = vadd.xlane.f32.xlu1 %v823_v46 }
 0x225   :  { %1114 = vadd.xlane.f32.xlu0 %v1054_v35 }
 0x227   :  { %1116 = vadd.xlane.f32.xlu1 %v1055_v47 }
 0x232   :  { %v831_v29 = vpop.xlane.xlu0 %830 }
 0x233   :  { %v896_v41 = vadd.f32 %v3666_v20, %v831_v29 }
 0x234   :  { %v1059_v42 = vpop.xlane.xlu1 %1058 }
 0x235   :  { %vm928_vm1 = vcmp.gt.f32.partialorder %v896_v41, 0.0  ;;  %v960_v49 = vmul.f32 0.01, %v896_v41  ;;  %v1122_v2 = vadd.f32 %v3666_v20, %v1059_v42  ;;  %v3238_v42 = vld [vmem:[%s4485_s1 + $0x60] sm:$0xff]  }
 0x236   :  { %v1063_v50 = vpop.xlane.xlu0 %1062  ;;  %3069 = vmatprep.subr.bf16.mxu0 %v3238_v42 }
 0x237   :  { %v1124_v56 = vadd.f32 %v3666_v20, %v1063_v50  ;;  %v992_v57 = vsel %vm928_vm1, %v896_v41, %v960_v49  ;;  %v1186_v36 = vmul.f32 0.01, %v1122_v2  ;;  %vm1154_vm4 = vcmp.gt.f32.partialorder %v1122_v2, 0.0  ;;  %3070 = vmatpush3.bf16.msra.mxu0 %v3238_v42 }
 0x238   :  { %1262 = vperm.xlu1 %3169, %v992_v57   ;;  %v833_v3 = vpop.xlane.xlu1 %832 }
 0x239   :  { %vm1156_vm2 = vcmp.gt.f32.partialorder %v1124_v56, 0.0  ;;  %v1188_v10 = vmul.f32 0.01, %v1124_v56  ;;  %v897_v44 = vadd.f32 %v3666_v20, %v833_v3  ;;  %v1218_v55 = vsel %vm1154_vm4, %v1122_v2, %v1186_v36 }
 0x23a   :  { %v827_v11 = vpop.xlane.xlu0 %826 }
 0x23b   :  { %v894_v61 = vadd.f32 %v3666_v20, %v827_v11  ;;  %v1220_v19 = vsel %vm1156_vm2, %v1124_v56, %v1188_v10  ;;  %v961_v58 = vmul.f32 0.01, %v897_v44  ;;  %vm929_vm5 = vcmp.gt.f32.partialorder %v897_v44, 0.0 }
 0x23c   :  { %3170 = vset.pattern.permute.xlu1 %v3249_v28  ;;  %v1065_v32 = vpop.xlane.xlu1 %1064 }
 0x23d   :  { %1458 = vperm.xlu1 %3170, %v1220_v19   ;;  %vm926_vm3 = vcmp.gt.f32.partialorder %v894_v61, 0.0  ;;  %v958_v45 = vmul.f32 0.01, %v894_v61  ;;  %v1125_v59 = vadd.f32 %v3666_v20, %v1065_v32  ;;  %v993_v1 = vsel %vm929_vm5, %v897_v44, %v961_v58 }
 0x23e   :  { %v829_v48 = vpop.xlane.xlu0 %828 }
 0x23f   :  { %v990_v51 = vsel %vm926_vm3, %v894_v61, %v958_v45  ;;  %v1189_v5 = vmul.f32 0.01, %v1125_v59  ;;  %v895_v6 = vadd.f32 %v3666_v20, %v829_v48  ;;  %vm1157_vm6 = vcmp.gt.f32.partialorder %v1125_v59, 0.0 }
 0x240   :  { %v1061_v53 = vpop.xlane.xlu1 %1060  ;;  %1252 = vperm.xlu0 %3171, %v990_v51  }
 0x241   :  { %1448 = vperm.xlu1 %3170, %v1218_v55   ;;  %v1221_v17 = vsel %vm1157_vm6, %v1125_v59, %v1189_v5  ;;  %v959_v7 = vmul.f32 0.01, %v895_v6  ;;  %v1123_v21 = vadd.f32 %v3666_v20, %v1061_v53  ;;  %vm927_vm8 = vcmp.gt.f32.partialorder %v895_v6, 0.0 }
 0x242   :  { %v839_v60 = vpop.xlane.xlu0 %838 }
 0x243   :  { %v991_v26 = vsel %vm927_vm8, %v895_v6, %v959_v7  ;;  %v1187_v33 = vmul.f32 0.01, %v1123_v21  ;;  %v900_v12 = vadd.f32 %v3666_v20, %v839_v60  ;;  %vm1155_vm10 = vcmp.gt.f32.partialorder %v1123_v21, 0.0 }
 0x244   :  { %v3684_v0 = vpop.xlane.xlu1 %840  ;;  %3177 = vset.pattern.permute.xlu0 %v3249_v28 }
 0x245   :  { %3172 = vset.pattern.permute.xlu1 %v3248_v62  ;;  %v1219_v15 = vsel %vm1155_vm10, %v1123_v21, %v1187_v33  ;;  %v964_v47 = vmul.f32 0.01, %v900_v12  ;;  %vm932_vm12 = vcmp.gt.f32.partialorder %v900_v12, 0.0  ;;  %v901_v44 = vadd.f32 %v3666_v20, %v3684_v0 }
 0x246   :  { %1267 = vperm.xlu1 %3172, %v993_v1   ;;  %v1071_v4 = vpop.xlane.xlu0 %1070 }
 0x247   :  { %v1128_v8 = vadd.f32 %v3666_v20, %v1071_v4  ;;  %v996_v57 = vsel %vm932_vm12, %v900_v12, %v964_v47  ;;  %v965_v58 = vmul.f32 0.01, %v901_v44  ;;  %vm933_vm2 = vcmp.gt.f32.partialorder %v901_v44, 0.0 }
 0x248   :  { %v3693_v13 = vpop.xlane.xlu1 %1072 }
 0x249   :  { %v1192_v14 = vmul.f32 0.01, %v1128_v8  ;;  %vm1160_vm7 = vcmp.gt.f32.partialorder %v1128_v8, 0.0  ;;  %v1129_v59 = vadd.f32 %v3666_v20, %v3693_v13  ;;  %v997_v4 = vsel %vm933_vm2, %v901_v44, %v965_v58 }
 0x24a   :  { %3173 = vset.pattern.permute.xlu1 %v3249_v28  ;;  %v835_v16 = vpop.xlane.xlu0 %834 }
 0x24b   :  { %1463 = vperm.xlu1 %3173, %v1221_v17   ;;  %v1224_v54 = vsel %vm1160_vm7, %v1128_v8, %v1192_v14  ;;  %v898_v43 = vadd.f32 %v3666_v20, %v835_v16  ;;  %v1193_v6 = vmul.f32 0.01, %v1129_v59  ;;  %vm1161_vm4 = vcmp.gt.f32.partialorder %v1129_v59, 0.0 }
 0x24c   :  { %v837_v22 = vpop.xlane.xlu1 %836  ;;  %1478 = vperm.xlu0 %3177, %v1224_v54  }
 0x24d   :  { %v899_v23 = vadd.f32 %v3666_v20, %v837_v22  ;;  %v962_v50 = vmul.f32 0.01, %v898_v43  ;;  %vm930_vm14 = vcmp.gt.f32.partialorder %v898_v43, 0.0  ;;  %v1225_v54 = vsel %vm1161_vm4, %v1129_v59, %v1193_v6 }
 0x24e   :  { %v1067_v25 = vpop.xlane.xlu0 %1066 }
 0x24f   :  { %3174 = vset.pattern.permute.xlu1 %v3248_v62  ;;  %vm931_vm9 = vcmp.gt.f32.partialorder %v899_v23, 0.0  ;;  %v963_v30 = vmul.f32 0.01, %v899_v23  ;;  %v1126_v2 = vadd.f32 %v3666_v20, %v1067_v25  ;;  %v994_v27 = vsel %vm930_vm14, %v898_v43, %v962_v50 }
 0x250   :  { %v1069_v31 = vpop.xlane.xlu1 %1068  ;;  %1257 = vperm.xlu1 %3174, %v991_v26   ;;  %3181 = vset.pattern.permute.xlu0 %v3248_v62 }
 0x251   :  { %v1127_v35 = vadd.f32 %v3666_v20, %v1069_v31  ;;  %v995_v37 = vsel %vm931_vm9, %v899_v23, %v963_v30  ;;  %v1190_v32 = vmul.f32 0.01, %v1126_v2  ;;  %vm1158_vm0 = vcmp.gt.f32.partialorder %v1126_v2, 0.0 }
 0x252   :  { %1277 = vperm.xlu0 %3181, %v995_v37   ;;  %v3708_v38 = vpop.xlane.xlu0 %846 }
 0x253   :  { %vm1159_vm11 = vcmp.gt.f32.partialorder %v1127_v35, 0.0  ;;  %v1191_v39 = vmul.f32 0.01, %v1127_v35  ;;  %v1222_v53 = vsel %vm1158_vm0, %v1126_v2, %v1190_v32  ;;  %v904_v8 = vadd.f32 %v3666_v20, %v3708_v38 }
 0x254   :  { %v3713_v34 = vpop.xlane.xlu1 %848  ;;  %3175 = vset.pattern.permute.xlu1 %v3249_v28 }
 0x255   :  { %1453 = vperm.xlu1 %3175, %v1219_v15   ;;  %v1223_v46 = vsel %vm1159_vm11, %v1127_v35, %v1191_v39  ;;  %v968_v7 = vmul.f32 0.01, %v904_v8  ;;  %vm936_vm6 = vcmp.gt.f32.partialorder %v904_v8, 0.0  ;;  %v905_v33 = vadd.f32 %v3666_v20, %v3713_v34 }
 0x256   :  { %3182 = vset.pattern.permute.xlu0 %v3249_v28  ;;  %v1079_v29 = vpop.xlane.xlu0 %1078 }
 0x257   :  { %v1132_v41 = vadd.f32 %v3666_v20, %v1079_v29  ;;  %1473 = vperm.xlu0 %3182, %v1223_v46   ;;  %v1000_v30 = vsel %vm936_vm6, %v904_v8, %v968_v7  ;;  %v969_v15 = vmul.f32 0.01, %v905_v33  ;;  %vm937_vm9 = vcmp.gt.f32.partialorder %v905_v33, 0.0 }
 0x258   :  { %v3722_v49 = vpop.xlane.xlu1 %1080 }
 0x259   :  { %v1196_v56 = vmul.f32 0.01, %v1132_v41  ;;  %3176 = vset.pattern.permute.xlu1 %v3248_v62  ;;  %vm1164_vm13 = vcmp.gt.f32.partialorder %v1132_v41, 0.0  ;;  %v1133_v34 = vadd.f32 %v3666_v20, %v3722_v49 }
 0x25a   :  { %1282 = vperm.xlu1 %3176, %v996_v57   ;;  %v843_v3 = vpop.xlane.xlu0 %842 }
 0x25b   :  { %v902_v10 = vadd.f32 %v3666_v20, %v843_v3  ;;  %v1228_v11 = vsel %vm1164_vm13, %v1132_v41, %v1196_v56  ;;  %v1001_v41 = vsel %vm937_vm9, %v905_v33, %v969_v15  ;;  %v1197_v56 = vmul.f32 0.01, %v1133_v34 }
 0x25c   :  { %v3727_v61 = vpop.xlane.xlu1 %844  ;;  %1498 = vperm.xlu0 %3182, %v1228_v11   ;;  %vm1165_vm11 = vcmp.gt.f32.partialorder %v1133_v34, 0.0 }
 0x25d   :  { %v966_v19 = vmul.f32 0.01, %v902_v10  ;;  %vm934_vm15 = vcmp.gt.f32.partialorder %v902_v10, 0.0  ;;  %v903_v49 = vadd.f32 %v3666_v20, %v3727_v61  ;;  %v1229_v11 = vsel %vm1165_vm11, %v1133_v34, %v1197_v56 }
 0x25e   :  { %1272 = vperm.xlu1 %3176, %v994_v27   ;;  %v1075_v36 = vpop.xlane.xlu0 %1074 }
 0x25f   :  { %v998_v45 = vsel %vm934_vm15, %v902_v10, %v966_v19  ;;  %v1130_v21 = vadd.f32 %v3666_v20, %v1075_v36  ;;  %v967_v61 = vmul.f32 0.01, %v903_v49  ;;  %vm935_vm13 = vcmp.gt.f32.partialorder %v903_v49, 0.0 }
 0x260   :  { %v1077_v48 = vpop.xlane.xlu1 %1076  ;;  %3184 = vset.pattern.permute.xlu0 %v3248_v62 }
 0x261   :  { %v1131_v51 = vadd.f32 %v3666_v20, %v1077_v48  ;;  %1292 = vperm.xlu0 %3184, %v998_v45   ;;  %v1194_v24 = vmul.f32 0.01, %v1130_v21  ;;  %vm1162_vm8 = vcmp.gt.f32.partialorder %v1130_v21, 0.0  ;;  %v999_v48 = vsel %vm935_vm13, %v903_v49, %v967_v61 }
 0x262   :  { %3178 = vset.pattern.permute.xlu1 %v3249_v28  ;;  %v3734_v52 = vpop.xlane.xlu0 %854 }
 0x263   :  { %1468 = vperm.xlu1 %3178, %v1222_v53   ;;  %vm1163_vm1 = vcmp.gt.f32.partialorder %v1131_v51, 0.0  ;;  %v1195_v55 = vmul.f32 0.01, %v1131_v51  ;;  %v1226_v39 = vsel %vm1162_vm8, %v1130_v21, %v1194_v24  ;;  %v908_v19 = vadd.f32 %v3666_v20, %v3734_v52 }
 0x264   :  { %v3738_v60 = vpop.xlane.xlu1 %856 }
 0x265   :  { %3189 = vset.pattern.permute.xlu0 %v3249_v28  ;;  %v1227_v63 = vsel %vm1163_vm1, %v1131_v51, %v1195_v55  ;;  %v972_v45 = vmul.f32 0.01, %v908_v19  ;;  %vm940_vm15 = vcmp.gt.f32.partialorder %v908_v19, 0.0 }
 0x266   :  { %1493 = vperm.xlu0 %3189, %v1227_v63   ;;  %v1087_v0 = vpop.xlane.xlu0 %1086 }
 0x267   :  { %v1136_v1 = vadd.f32 %v3666_v20, %v1087_v0  ;;  %3179 = vset.pattern.permute.xlu1 %v3248_v62  ;;  %v1004_v63 = vsel %vm940_vm15, %v908_v19, %v972_v45 }
 0x268   :  { %v3743_v5 = vpop.xlane.xlu1 %1088  ;;  %1287 = vperm.xlu1 %3179, %v997_v4   ;;  %v909_v4 = vadd.f32 %v3666_v20, %v3738_v60 }
 0x269   :  { %v1200_v9 = vmul.f32 0.01, %v1136_v1  ;;  %vm1168_vm3 = vcmp.gt.f32.partialorder %v1136_v1, 0.0  ;;  %v1137_v60 = vadd.f32 %v3666_v20, %v3743_v5 }
 0x26a   :  { %v851_v13 = vpop.xlane.xlu0 %850 }
 0x26b   :  { %v906_v14 = vadd.f32 %v3666_v20, %v851_v13  ;;  %v1232_v16 = vsel %vm1168_vm3, %v1136_v1, %v1200_v9  ;;  %vm941_vm3 = vcmp.gt.f32.partialorder %v909_v4, 0.0 }
 0x26c   :  { %v3748_v17 = vpop.xlane.xlu1 %852  ;;  %3180 = vset.pattern.permute.xlu1 %v3249_v28  ;;  %1518 = vperm.xlu0 %3189, %v1232_v16  }
 0x26d   :  { %v970_v18 = vmul.f32 0.01, %v906_v14  ;;  %1483 = vperm.xlu1 %3180, %v1225_v54   ;;  %vm938_vm5 = vcmp.gt.f32.partialorder %v906_v14, 0.0  ;;  %v973_v54 = vmul.f32 0.01, %v909_v4  ;;  %v907_v5 = vadd.f32 %v3666_v20, %v3748_v17 }
 0x26e   :  { %v3752_v22 = vpop.xlane.xlu0 %1082 }
 0x26f   :  { %v1002_v23 = vsel %vm938_vm5, %v906_v14, %v970_v18  ;;  %v1134_v52 = vadd.f32 %v3666_v20, %v3752_v22  ;;  %vm1169_vm5 = vcmp.gt.f32.partialorder %v1137_v60, 0.0 }
 0x270   :  { %v1085_v25 = vpop.xlane.xlu1 %1084  ;;  %3190 = vset.pattern.permute.xlu0 %v3248_v62 }
 0x271   :  { %v1135_v26 = vadd.f32 %v3666_v20, %v1085_v25  ;;  %3183 = vset.pattern.permute.xlu1 %v3248_v62  ;;  %1312 = vperm.xlu0 %3190, %v1002_v23   ;;  %v1198_v0 = vmul.f32 0.01, %v1134_v52  ;;  %vm1166_vm1 = vcmp.gt.f32.partialorder %v1134_v52, 0.0  ;;  %v1005_v23 = vsel %vm941_vm3, %v909_v4, %v973_v54 }
 0x272   :  { %1302 = vperm.xlu1 %3183, %v1000_v30   ;;  %v3757_v31 = vpop.xlane.xlu0 %862 }
 0x273   :  { %vm1167_vm7 = vcmp.gt.f32.partialorder %v1135_v26, 0.0  ;;  %v1199_v12 = vmul.f32 0.01, %v1135_v26  ;;  %v1230_v16 = vsel %vm1166_vm1, %v1134_v52, %v1198_v0 }
 0x274   :  { %v3761_v35 = vpop.xlane.xlu1 %864 }
 0x275   :  { %3195 = vset.pattern.permute.xlu0 %v3249_v28  ;;  %v1231_v37 = vsel %vm1167_vm7, %v1135_v26, %v1199_v12  ;;  %v1201_v26 = vmul.f32 0.01, %v1137_v60  ;;  %vm939_vm7 = vcmp.gt.f32.partialorder %v907_v5, 0.0 }
 0x276   :  { %3185 = vset.pattern.permute.xlu1 %v3249_v28  ;;  %1513 = vperm.xlu0 %3195, %v1231_v37   ;;  %v1095_v38 = vpop.xlane.xlu0 %1094 }
 0x277   :  { %v1140_v40 = vadd.f32 %v3666_v20, %v1095_v38  ;;  %1488 = vperm.xlu1 %3185, %v1226_v39   ;;  %v1233_v38 = vsel %vm1169_vm5, %v1137_v60, %v1201_v26  ;;  %v971_v39 = vmul.f32 0.01, %v907_v5 }
 0x278   :  { %v3768_v43 = vpop.xlane.xlu1 %1096 }
 0x279   :  { %v1204_v46 = vmul.f32 0.01, %v1140_v40  ;;  %vm1172_vm10 = vcmp.gt.f32.partialorder %v1140_v40, 0.0  ;;  %v1141_v52 = vadd.f32 %v3666_v20, %v3768_v43 }
 0x27a   :  { %v859_v47 = vpop.xlane.xlu0 %858 }
 0x27b   :  { %v910_v29 = vadd.f32 %v3666_v20, %v859_v47  ;;  %3186 = vset.pattern.permute.xlu1 %v3248_v62  ;;  %v1236_v42 = vsel %vm1172_vm10, %v1140_v40, %v1204_v46  ;;  %v912_v40 = vadd.f32 %v3666_v20, %v3757_v31 }
 0x27c   :  { %v3772_v50 = vpop.xlane.xlu1 %860  ;;  %1307 = vperm.xlu1 %3186, %v1001_v41   ;;  %1538 = vperm.xlu0 %3195, %v1236_v42   ;;  %v1003_v42 = vsel %vm939_vm7, %v907_v5, %v971_v39 }
 0x27d   :  { %v974_v57 = vmul.f32 0.01, %v910_v29  ;;  %vm942_vm12 = vcmp.gt.f32.partialorder %v910_v29, 0.0  ;;  %vm944_vm9 = vcmp.gt.f32.partialorder %v912_v40, 0.0 }
 0x27e   :  { %v3776_v2 = vpop.xlane.xlu0 %1090 }
 0x27f   :  { %v1006_v3 = vsel %vm942_vm12, %v910_v29, %v974_v57  ;;  %v976_v29 = vmul.f32 0.01, %v912_v40  ;;  %v1138_v31 = vadd.f32 %v3666_v20, %v3776_v2 }
 0x280   :  { %v1093_v10 = vpop.xlane.xlu1 %1092  ;;  %3187 = vset.pattern.permute.xlu1 %v3249_v28  ;;  %3196 = vset.pattern.permute.xlu0 %v3248_v62 }
 0x281   :  { %v1139_v27 = vadd.f32 %v3666_v20, %v1093_v10  ;;  %1503 = vperm.xlu1 %3187, %v1229_v11   ;;  %1332 = vperm.xlu0 %3196, %v1006_v3   ;;  %v1008_v10 = vsel %vm944_vm9, %v912_v40, %v976_v29  ;;  %v1202_v11 = vmul.f32 0.01, %v1138_v31  ;;  %vm1170_vm10 = vcmp.gt.f32.partialorder %v1138_v31, 0.0 }
 0x282   :  { %v3783_v32 = vpop.xlane.xlu0 %870 }
 0x283   :  { %vm1171_vm14 = vcmp.gt.f32.partialorder %v1139_v27, 0.0  ;;  %v1203_v36 = vmul.f32 0.01, %v1139_v27 }
 0x284   :  { %v3785_v44 = vpop.xlane.xlu1 %872 }
 0x285   :  { %3188 = vset.pattern.permute.xlu1 %v3248_v62  ;;  %3201 = vset.pattern.permute.xlu0 %v3249_v28  ;;  %v1235_v51 = vsel %vm1171_vm14, %v1139_v27, %v1203_v36  ;;  %v913_v27 = vadd.f32 %v3666_v20, %v3761_v35  ;;  %vm1173_vm14 = vcmp.gt.f32.partialorder %v1141_v52, 0.0 }
 0x286   :  { %1297 = vperm.xlu1 %3188, %v999_v48   ;;  %1533 = vperm.xlu0 %3201, %v1235_v51   ;;  %v1103_v53 = vpop.xlane.xlu0 %1102  ;;  %v1234_v48 = vsel %vm1170_vm10, %v1138_v31, %v1202_v11 }
 0x287   :  { %v1144_v55 = vadd.f32 %v3666_v20, %v1103_v53  ;;  %v977_v51 = vmul.f32 0.01, %v913_v27  ;;  %vm945_vm12 = vcmp.gt.f32.partialorder %v913_v27, 0.0 }
 0x288   :  { %v3792_v58 = vpop.xlane.xlu1 %1104 }
 0x289   :  { %v1208_v59 = vmul.f32 0.01, %v1144_v55  ;;  %vm1176_vm0 = vcmp.gt.f32.partialorder %v1144_v55, 0.0  ;;  %v1145_v40 = vadd.f32 %v3666_v20, %v3792_v58  ;;  %v3883_v58 = vld [vmem:[%s4487_s2 + $0x11] ss:$0 sm:$0xff] }
 0x28a   :  { %1322 = vperm.xlu1 %3188, %v1004_v63   ;;  %v867_v1 = vpop.xlane.xlu0 %866  ;;  %v1205_v63 = vmul.f32 0.01, %v1141_v52 }
 0x28b   :  { %v914_v6 = vadd.f32 %v3666_v20, %v867_v1  ;;  %v1240_v8 = vsel %vm1176_vm0, %v1144_v55, %v1208_v59  ;;  %v1009_v59 = vsel %vm945_vm12, %v913_v27, %v977_v51  ;;  %v911_v1 = vadd.f32 %v3666_v20, %v3772_v50 }
 0x28c   :  { %v3797_v9 = vpop.xlane.xlu1 %868  ;;  %1558 = vperm.xlu0 %3201, %v1240_v8   ;;  %v1237_v8 = vsel %vm1173_vm14, %v1141_v52, %v1205_v63  ;;  %vm1177_vm5 = vcmp.gt.f32.partialorder %v1145_v40, 0.0  ;;  %v3917_v63 = vld [vmem:[%s4487_s2 + $0x3] ss:$0 sm:$0xff] }
 0x28d   :  { %v978_v13 = vmul.f32 0.01, %v914_v6  ;;  %vm946_vm2 = vcmp.gt.f32.partialorder %v914_v6, 0.0  ;;  %vm943_vm15 = vcmp.gt.f32.partialorder %v911_v1, 0.0 }
 0x28e   :  { %3191 = vset.pattern.permute.xlu1 %v3249_v28  ;;  %v3800_v14 = vpop.xlane.xlu0 %1098 }
 0x28f   :  { %1508 = vperm.xlu1 %3191, %v1230_v16   ;;  %v1010_v7 = vsel %vm946_vm2, %v914_v6, %v978_v13  ;;  %v975_v13 = vmul.f32 0.01, %v911_v1  ;;  %v916_v16 = vadd.f32 %v3666_v20, %v3783_v32  ;;  %v1142_v32 = vadd.f32 %v3666_v20, %v3800_v14 }
 0x290   :  { %v1101_v18 = vpop.xlane.xlu1 %1100  ;;  %3202 = vset.pattern.permute.xlu0 %v3248_v62 }
 0x291   :  { %v1143_v21 = vadd.f32 %v3666_v20, %v1101_v18  ;;  %1352 = vperm.xlu0 %3202, %v1010_v7   ;;  %v980_v18 = vmul.f32 0.01, %v916_v16  ;;  %vm948_vm1 = vcmp.gt.f32.partialorder %v916_v16, 0.0  ;;  %vm1174_vm3 = vcmp.gt.f32.partialorder %v1142_v32, 0.0 }
 0x292   :  { %v3806_v22 = vpop.xlane.xlu0 %878 }
 0x293   :  { %3192 = vset.pattern.permute.xlu1 %v3248_v62  ;;  %vm1175_vm4 = vcmp.gt.f32.partialorder %v1143_v21, 0.0  ;;  %v1207_v25 = vmul.f32 0.01, %v1143_v21  ;;  %v1012_v5 = vsel %vm948_vm1, %v916_v16, %v980_v18 }
 0x294   :  { %v3809_v30 = vpop.xlane.xlu1 %880  ;;  %1327 = vperm.xlu1 %3192, %v1005_v23   ;;  %v1007_v23 = vsel %vm943_vm15, %v911_v1, %v975_v13 }
 0x295   :  { %3207 = vset.pattern.permute.xlu0 %v3249_v28  ;;  %v1239_v24 = vsel %vm1175_vm4, %v1143_v21, %v1207_v25  ;;  %v921_v13 = vadd.f32 %v3666_v20, %v3809_v30 }
 0x296   :  { %1553 = vperm.xlu0 %3207, %v1239_v24   ;;  %v1111_v33 = vpop.xlane.xlu0 %1110 }
 0x297   :  { %v1148_v12 = vadd.f32 %v3666_v20, %v1111_v33  ;;  %v1206_v33 = vmul.f32 0.01, %v1142_v32 }
 0x298   :  { %v3815_v37 = vpop.xlane.xlu1 %1112  ;;  %3193 = vset.pattern.permute.xlu1 %v3249_v28 }
 0x299   :  { %v1212_v15 = vmul.f32 0.01, %v1148_v12  ;;  %1523 = vperm.xlu1 %3193, %v1233_v38   ;;  %vm1180_vm6 = vcmp.gt.f32.partialorder %v1148_v12, 0.0  ;;  %v1238_v39 = vsel %vm1174_vm3, %v1142_v32, %v1206_v33  ;;  %v985_v32 = vmul.f32 0.01, %v921_v13 }
 0x29a   :  { %v875_v17 = vpop.xlane.xlu0 %874 }
 0x29b   :  { %v918_v34 = vadd.f32 %v3666_v20, %v875_v17  ;;  %v1244_v46 = vsel %vm1180_vm6, %v1148_v12, %v1212_v15  ;;  %v917_v12 = vadd.f32 %v3666_v20, %v3785_v44  ;;  %v1209_v44 = vmul.f32 0.01, %v1145_v40 }
 0x29c   :  { %v3821_v47 = vpop.xlane.xlu1 %876  ;;  %1578 = vperm.xlu0 %3207, %v1244_v46   ;;  %v915_v46 = vadd.f32 %v3666_v20, %v3797_v9 }
 0x29d   :  { %vm950_vm8 = vcmp.gt.f32.partialorder %v918_v34, 0.0  ;;  %v982_v41 = vmul.f32 0.01, %v918_v34  ;;  %3194 = vset.pattern.permute.xlu1 %v3248_v62  ;;  %v981_v14 = vmul.f32 0.01, %v917_v12  ;;  %vm949_vm4 = vcmp.gt.f32.partialorder %v917_v12, 0.0 }
 0x29e   :  { %1317 = vperm.xlu1 %3194, %v1003_v42   ;;  %v3826_v56 = vpop.xlane.xlu0 %1106  ;;  %v3888_v42 = vld [vmem:[%s4487_s2 + $0x10] ss:$0 sm:$0xff]  ;;  %v1241_v9 = vsel %vm1177_vm5, %v1145_v40, %v1209_v44  ;;  %vm947_vm6 = vcmp.gt.f32.partialorder %v915_v46, 0.0 }
 0x29f   :  { %v1014_v49 = vsel %vm950_vm8, %v918_v34, %v982_v41  ;;  %v1013_v34 = vsel %vm949_vm4, %v917_v12, %v981_v14  ;;  %v1149_v12 = vadd.f32 %v3666_v20, %v3815_v37  ;;  %v919_v37 = vadd.f32 %v3666_v20, %v3821_v47 }
 0x2a0   :  { %v1109_v57 = vpop.xlane.xlu1 %1108  ;;  %3208 = vset.pattern.permute.xlu0 %v3248_v62 }
 0x2a1   :  { %v1147_v3 = vadd.f32 %v3666_v20, %v1109_v57  ;;  %1372 = vperm.xlu0 %3208, %v1014_v49   ;;  %v979_v49 = vmul.f32 0.01, %v915_v46  ;;  %v920_v57 = vadd.f32 %v3666_v20, %v3806_v22  ;;  %vm1181_vm14 = vcmp.gt.f32.partialorder %v1149_v12, 0.0 }
 0x2a2   :  { %1342 = vperm.xlu1 %3194, %v1008_v10   ;;  %v3830_v19 = vpop.xlane.xlu0 %886  ;;  %vm951_vm15 = vcmp.gt.f32.partialorder %v919_v37, 0.0 }
 0x2a3   :  { %vm1179_vm11 = vcmp.gt.f32.partialorder %v1147_v3, 0.0  ;;  %v1211_v2 = vmul.f32 0.01, %v1147_v3  ;;  %v1011_v52 = vsel %vm947_vm6, %v915_v46, %v979_v49  ;;  %vm952_vm7 = vcmp.gt.f32.partialorder %v920_v57, 0.0 }
 0x2a4   :  { %v3834_v61 = vpop.xlane.xlu1 %888  ;;  %v924_v47 = vadd.f32 %v3666_v20, %v3830_v19 }
 0x2a5   :  { %3213 = vset.pattern.permute.xlu0 %v3249_v28  ;;  %v1243_v36 = vsel %vm1179_vm11, %v1147_v3, %v1211_v2 }
 0x2a6   :  { %3197 = vset.pattern.permute.xlu1 %v3249_v28  ;;  %1573 = vperm.xlu0 %3213, %v1243_v36   ;;  %v1119_v45 = vpop.xlane.xlu0 %1118 }
 0x2a7   :  { %1528 = vperm.xlu1 %3197, %v1234_v48   ;;  %v1152_v54 = vadd.f32 %v3666_v20, %v1119_v45  ;;  %v984_v48 = vmul.f32 0.01, %v920_v57 }
 0x2a8   :  { %v3840_v53 = vpop.xlane.xlu1 %1120 }
 0x2a9   :  { %v1216_v21 = vmul.f32 0.01, %v1152_v54  ;;  %vm1184_vm2 = vcmp.gt.f32.partialorder %v1152_v54, 0.0 }
 0x2aa   :  { %v883_v35 = vpop.xlane.xlu0 %882  ;;  %3214 = vset.pattern.permute.xlu0 %v3248_v62 }
 0x2ab   :  { %v922_v55 = vadd.f32 %v3666_v20, %v883_v35  ;;  %3198 = vset.pattern.permute.xlu1 %v3248_v62  ;;  %v1248_v24 = vsel %vm1184_vm2, %v1152_v54, %v1216_v21  ;;  %v1146_v35 = vadd.f32 %v3666_v20, %v3826_v56  ;;  %vm956_vm2 = vcmp.gt.f32.partialorder %v924_v47, 0.0 }
 0x2ac   :  { %v3845_v0 = vpop.xlane.xlu1 %884  ;;  %1347 = vperm.xlu1 %3198, %v1009_v59  }
 0x2ad   :  { %vm954_vm13 = vcmp.gt.f32.partialorder %v922_v55, 0.0  ;;  %v986_v43 = vmul.f32 0.01, %v922_v55  ;;  %v1210_v16 = vmul.f32 0.01, %v1146_v35  ;;  %vm1178_vm8 = vcmp.gt.f32.partialorder %v1146_v35, 0.0 }
 0x2ae   :  { %v3871_v17 = vpop.xlane.xlu0 %1114 }
 0x2af   :  { %v1018_v4 = vsel %vm954_vm13, %v922_v55, %v986_v43  ;;  %v1242_v30 = vsel %vm1178_vm8, %v1146_v35, %v1210_v16  ;;  %vm953_vm13 = vcmp.gt.f32.partialorder %v921_v13, 0.0 }
 0x2b0   :  { %v1117_v6 = vpop.xlane.xlu1 %1116  ;;  %3199 = vset.pattern.permute.xlu1 %v3249_v28  ;;  %1392 = vperm.xlu0 %3214, %v1018_v4  }
 0x2b1   :  { %v1151_v7 = vadd.f32 %v3666_v20, %v1117_v6  ;;  %1543 = vperm.xlu1 %3199, %v1237_v8   ;;  %v1016_v8 = vsel %vm952_vm7, %v920_v57, %v984_v48  ;;  %v1017_v57 = vsel %vm953_vm13, %v921_v13, %v985_v32  ;;  %v1150_v13 = vadd.f32 %v3666_v20, %v3871_v17 }
 0x2b2   :  { %v925_v17 = vadd.f32 %v3666_v20, %v3834_v61 }
 0x2b3   :  { %vm1183_vm0 = vcmp.gt.f32.partialorder %v1151_v7, 0.0  ;;  %v1215_v50 = vmul.f32 0.01, %v1151_v7  ;;  %vm1182_vm3 = vcmp.gt.f32.partialorder %v1150_v13, 0.0 }
 0x2b4   :  { %v3854_v60 = vpop.permute.xlu1 %1262  ;;  %3217 = vset.pattern.permute.xlu0 %v3249_v28  ;;  %vm957_vm6 = vcmp.gt.f32.partialorder %v925_v17, 0.0 }
 0x2b5   :  { %3200 = vset.pattern.permute.xlu1 %v3248_v62  ;;  %v1247_v25 = vsel %vm1183_vm0, %v1151_v7, %v1215_v50  ;;  %v1416_v22 = vmul.f32 %v3888_v42, %v3854_v60 }
 0x2b6   :  { %1337 = vperm.xlu1 %3200, %v1007_v23   ;;  %1593 = vperm.xlu0 %3217, %v1247_v25  }
 0x2b8   :  { %v3860_v26 = vpop.permute.xlu1 %1458 }
 0x2b9   :  { %v1612_v11 = vmul.f32 %v3883_v58, %v3860_v26 }
 0x2ba   :  { %1362 = vperm.xlu1 %3200, %v1012_v5   ;;  %1598 = vperm.xlu0 %3217, %v1248_v24  }
 0x2bb   :  { %v3876_v29 = vpop.permute.xlu0 %1252  ;;  %v1644_v55 = vadd.f32 %v1612_v11, %v1416_v22 }
 0x2bc   :  { %v3864_v38 = vpop.permute.xlu1 %1448  ;;  %v1414_v3 = vmul.f32 %v3888_v42, %v3876_v29 }
 0x2bd   :  { %v1610_v10 = vmul.f32 %v3883_v58, %v3864_v38  ;;  %v1680_v54 = vadd.f32 %v3917_v63, %v1644_v55 }
 0x2be   :  { %3203 = vset.pattern.permute.xlu1 %v3249_v28 }
 0x2bf   :  { %1548 = vperm.xlu1 %3203, %v1238_v39   ;;  %v1642_v51 = vadd.f32 %v1610_v10, %v1414_v3  ;;  %v1744_v5 = vmul.f32 0.01, %v1680_v54  ;;  %vm1712_vm11 = vcmp.gt.f32.partialorder %v1680_v54, 0.0  ;;  %v1213_v3 = vmul.f32 0.01, %v1149_v12 }
 0x2c1   :  { %v3869_v15 = vpop.permute.xlu1 %1267  ;;  %v1678_v4 = vadd.f32 %v3917_v63, %v1642_v51  ;;  %v1776_v46 = vsel %vm1712_vm11, %v1680_v54, %v1744_v5  ;;  %v1245_v48 = vsel %vm1181_vm14, %v1149_v12, %v1213_v3 }
 0x2c2   :  { %v1417_v27 = vmul.f32 %v3888_v42, %v3869_v15 }
 0x2c3   :  { %3204 = vset.pattern.permute.xlu1 %v3248_v62  ;;  %v1742_v25 = vmul.f32 0.01, %v1678_v4  ;;  %vm1710_vm10 = vcmp.gt.f32.partialorder %v1678_v4, 0.0 }
 0x2c4   :  { %1367 = vperm.xlu1 %3204, %v1013_v34  }
 0x2c5   :  { %v1774_v34 = vsel %vm1710_vm10, %v1678_v4, %v1742_v25 }
 0x2c6   :  { %v3878_v41 = vpop.permute.xlu1 %1463 }
 0x2c7   :  { %v1613_v31 = vmul.f32 %v3883_v58, %v3878_v41  ;;  %v3903_v2 = vpop.permute.xlu0 %1478 }
 0x2c8   :  { %3205 = vset.pattern.permute.xlu1 %v3249_v28  ;;  %v1616_v35 = vmul.f32 %v3883_v58, %v3903_v2 }
 0x2c9   :  { %1563 = vperm.xlu1 %3205, %v1241_v9   ;;  %v1645_v45 = vadd.f32 %v1613_v31, %v1417_v27 }
 0x2cb   :  { %v3905_v36 = vpop.permute.xlu1 %1257  ;;  %v1681_v1 = vadd.f32 %v3917_v63, %v1645_v45  ;;  %v983_v45 = vmul.f32 0.01, %v919_v37 }
 0x2cc   :  { %v1415_v6 = vmul.f32 %v3888_v42, %v3905_v36 }
 0x2cd   :  { %3206 = vset.pattern.permute.xlu1 %v3248_v62  ;;  %v3912_v59 = vpop.permute.xlu0 %1277  ;;  %v1745_v50 = vmul.f32 0.01, %v1681_v1  ;;  %vm1713_vm9 = vcmp.gt.f32.partialorder %v1681_v1, 0.0 }
 0x2ce   :  { %1357 = vperm.xlu1 %3206, %v1011_v52   ;;  %v1419_v14 = vmul.f32 %v3888_v42, %v3912_v59 }
 0x2cf   :  { %v1777_v39 = vsel %vm1713_vm9, %v1681_v1, %v1745_v50 }
 0x2d0   :  { %v3920_v43 = vpop.permute.xlu1 %1453  ;;  %v1807_v9 = vpack.c.bf16 %v1777_v39, %v1776_v46 }
 0x2d1   :  { %v1611_v56 = vmul.f32 %v3883_v58, %v3920_v43 }
 0x2d2   :  { %1382 = vperm.xlu1 %3206, %v1016_v8   ;;  %v3930_v18 = vpop.permute.xlu0 %1473 }
 0x2d3   :  { %v1643_v7 = vadd.f32 %v1611_v56, %v1415_v6  ;;  %v1615_v24 = vmul.f32 %v3883_v58, %v3930_v18  ;;  %v1015_v6 = vsel %vm951_vm15, %v919_v37, %v983_v45  ;;  %v988_v56 = vmul.f32 0.01, %v924_v47 }
 0x2d5   :  { %v1679_v21 = vadd.f32 %v3917_v63, %v1643_v7  ;;  %v3933_v23 = vpop.permute.xlu1 %1282  ;;  %v1647_v49 = vadd.f32 %v1615_v24, %v1419_v14  ;;  %v1020_v5 = vsel %vm956_vm2, %v924_v47, %v988_v56 }
 0x2d6   :  { %3209 = vset.pattern.permute.xlu1 %v3249_v28  ;;  %v1420_v51 = vmul.f32 %v3888_v42, %v3933_v23 }
 0x2d7   :  { %1568 = vperm.xlu1 %3209, %v1242_v30   ;;  %vm1711_vm12 = vcmp.gt.f32.partialorder %v1679_v21, 0.0  ;;  %v1743_v33 = vmul.f32 0.01, %v1679_v21  ;;  %v1683_v11 = vadd.f32 %v3917_v63, %v1647_v49  ;;  %v1214_v30 = vmul.f32 0.01, %v1150_v13  ;;  %v3986_v3 = vpop.permute.xlu0 %1498 }
 0x2d8   :  { %v1648_v8 = vadd.f32 %v1616_v35, %v1420_v51 }
 0x2d9   :  { %v3942_v40 = vpop.permute.xlu1 %1272  ;;  %v1775_v44 = vsel %vm1711_vm12, %v1679_v21, %v1743_v33  ;;  %v1747_v4 = vmul.f32 0.01, %v1683_v11  ;;  %vm1715_vm0 = vcmp.gt.f32.partialorder %v1683_v11, 0.0  ;;  %v1246_v14 = vsel %vm1182_vm3, %v1150_v13, %v1214_v30 }
 0x2da   :  { %v1806_v31 = vpack.c.bf16 %v1775_v44, %v1774_v34  ;;  %v1418_v27 = vmul.f32 %v3888_v42, %v3942_v40  ;;  %v1684_v21 = vadd.f32 %v3917_v63, %v1648_v8  ;;  %v989_v34 = vmul.f32 0.01, %v925_v17  ;;  %v3247_v44 = vld [vmem:[%s4487_s2 + $0x2] ss:$0 sm:$0xff] }
 0x2db   :  { %3210 = vset.pattern.permute.xlu1 %v3248_v62  ;;  %v1779_v54 = vsel %vm1715_vm0, %v1683_v11, %v1747_v4  ;;  %v923_v46 = vadd.f32 %v3247_v44, %v3845_v0  ;;  %v1153_v11 = vadd.f32 %v3247_v44, %v3840_v53 }
 0x2dc   :  { %1387 = vperm.xlu1 %3210, %v1017_v57   ;;  %3071 = vmatprep.mubr.bf16.mxu0 %v1806_v31  ;;  %v1748_v39 = vmul.f32 0.01, %v1684_v21  ;;  %vm1716_vm4 = vcmp.gt.f32.partialorder %v1684_v21, 0.0  ;;  %v1021_v37 = vsel %vm957_vm6, %v925_v17, %v989_v34  ;;  %v3992_v45 = vpop.permute.xlu0 %1292 }
 0x2dd   :  { %3072 = vmatmul.mubr.bf16.vlgmr.msra.gmra.mxu0 %v1807_v9  ;;  %v987_v57 = vmul.f32 0.01, %v923_v46  ;;  %vm955_vm7 = vcmp.gt.f32.partialorder %v923_v46, 0.0  ;;  %vm1185_vm8 = vcmp.gt.f32.partialorder %v1153_v11, 0.0  ;;  %v1422_v51 = vmul.f32 %v3888_v42, %v3992_v45 }
 0x2de   :  { %v3947_v10 = vpop.permute.xlu1 %1468  ;;  %v1780_v61 = vsel %vm1716_vm4, %v1684_v21, %v1748_v39  ;;  %v3241_v39 = vld [vmem:[%s4485_s1 + $0xc8] sm:$0xff]  }
 0x2df   :  { %v1614_v22 = vmul.f32 %v3883_v58, %v3947_v10 }
 0x2e0   :  { %3211 = vset.pattern.permute.xlu1 %v3249_v28 }
 0x2e1   :  { %v1646_v52 = vadd.f32 %v1614_v22, %v1418_v27  ;;  %1583 = vperm.xlu1 %3211, %v1245_v48   ;;  %v1019_v27 = vsel %vm955_vm7, %v923_v46, %v987_v57  ;;  %v1217_v22 = vmul.f32 0.01, %v1153_v11  ;;  %v4009_v4 = vpop.permute.xlu0 %1493 }
 0x2e3   :  { %v1682_v55 = vadd.f32 %v3917_v63, %v1646_v52  ;;  %v3962_v1 = vpop.permute.xlu1 %1287  ;;  %v1249_v53 = vsel %vm1185_vm8, %v1153_v11, %v1217_v22  ;;  %v3243_v22 = vld [vmem:[%s4485_s1 + $0xb8] sm:$0xff]  }
 0x2e4   :  { %v1421_v25 = vmul.f32 %v3888_v42, %v3962_v1 }
 0x2e5   :  { %3212 = vset.pattern.permute.xlu1 %v3248_v62  ;;  %vm1714_vm1 = vcmp.gt.f32.partialorder %v1682_v55, 0.0  ;;  %v1746_v19 = vmul.f32 0.01, %v1682_v55 }
 0x2e6   :  { %1377 = vperm.xlu1 %3212, %v1015_v6  }
 0x2e7   :  { %v1778_v16 = vsel %vm1714_vm1, %v1682_v55, %v1746_v19  ;;  %v1620_v55 = vmul.f32 %v3883_v58, %v3986_v3  ;;  %v1619_v19 = vmul.f32 %v3883_v58, %v4009_v4  ;;  %v4034_v46 = vpop.permute.xlu0 %1518 }
 0x2e8   :  { %v3967_v7 = vpop.permute.xlu1 %1483  ;;  %v1808_v50 = vpack.c.bf16 %v1779_v54, %v1778_v16 }
 0x2e9   :  { %v1617_v32 = vmul.f32 %v3883_v58, %v3967_v7 }
 0x2ea   :  { %1402 = vperm.xlu1 %3212, %v1020_v5   ;;  %3075 = vmatprep.mubr.bf16.mxu0 %v1808_v50 }
 0x2eb   :  { %v1649_v24 = vadd.f32 %v1617_v32, %v1421_v25  ;;  %v3239_v25 = vld [vmem:[%s4485_s1 + $0xd8] sm:$0xff]   ;;  %v3240_v32 = vld [vmem:[%s4485_s1 + $0xd0] sm:$0xff]  }
 0x2ec   :  { %3103 = vmatprep.subr.bf16.mxu0 %v3239_v25  ;;  %3151 = vmatprep.subr.bf16.mxu1 %v3239_v25 }
 0x2ed   :  { %v1685_v33 = vadd.f32 %v3917_v63, %v1649_v24  ;;  %v3977_v12 = vpop.permute.xlu1 %1302  ;;  %3104 = vmatpush3.bf16.msra.mxu0 %v3239_v25  ;;  %3159 = vmatpush3.bf16.msra.mxu1 %v3239_v25 }
 0x2ee   :  { %3215 = vset.pattern.permute.xlu1 %v3249_v28  ;;  %3105 = vmatprep.subr.bf16.mxu0 %v3240_v32 }
 0x2ef   :  { %1588 = vperm.xlu1 %3215, %v1246_v14   ;;  %vm1717_vm5 = vcmp.gt.f32.partialorder %v1685_v33, 0.0  ;;  %v1749_v20 = vmul.f32 0.01, %v1685_v33  ;;  %3152 = vmatprep.subr.bf16.mxu1 %v3240_v32 }
 0x2f1   :  { %v1781_v31 = vsel %vm1717_vm5, %v1685_v33, %v1749_v20  ;;  %3106 = vmatpush3.bf16.msra.mxu0 %v3240_v32  ;;  %3160 = vmatpush3.bf16.msra.mxu1 %v3240_v32 }
 0x2f2   :  { %v3984_v9 = vpop.permute.xlu1 %1488  ;;  %v1809_v49 = vpack.c.bf16 %v1781_v31, %v1780_v61  ;;  %3107 = vmatprep.subr.bf16.mxu0 %v3241_v39  ;;  %3153 = vmatprep.subr.bf16.mxu1 %v3241_v39 }
 0x2f3   :  { %3216 = vset.pattern.permute.xlu1 %v3248_v62  ;;  %v1618_v48 = vmul.f32 %v3883_v58, %v3984_v9  ;;  %v1424_v62 = vmul.f32 %v3888_v42, %v3977_v12 }
 0x2f4   :  { %1407 = vperm.xlu1 %3216, %v1021_v37   ;;  %3076 = vmatmul.mubr.bf16.gmra.mxu0 %v1809_v49  ;;  %v3242_v37 = vld [vmem:[%s4485_s1 + $0xc0] sm:$0xff]  }
 0x2f5   :  { %v1650_v6 = vadd.f32 %v1618_v48, %v1422_v51  ;;  %v1652_v8 = vadd.f32 %v1620_v55, %v1424_v62  ;;  %3108 = vmatpush3.bf16.msra.mxu0 %v3241_v39  ;;  %3161 = vmatpush3.bf16.msra.mxu1 %v3241_v39 }
 0x2f6   :  { %3109 = vmatprep.subr.bf16.mxu0 %v3242_v37  ;;  %3154 = vmatprep.subr.bf16.mxu1 %v3242_v37 }
 0x2f7   :  { %v3990_v0 = vpop.permute.xlu1 %1307  ;;  %v1686_v54 = vadd.f32 %v3917_v63, %v1650_v6  ;;  %v1688_v50 = vadd.f32 %v3917_v63, %v1652_v8 }
 0x2f8   :  { %1397 = vperm.xlu1 %3216, %v1019_v27   ;;  %v1425_v52 = vmul.f32 %v3888_v42, %v3990_v0  ;;  %v4041_v27 = vpop.permute.xlu0 %1312 }
 0x2f9   :  { %v1750_v24 = vmul.f32 0.01, %v1686_v54  ;;  %vm1718_vm10 = vcmp.gt.f32.partialorder %v1686_v54, 0.0  ;;  %v1752_v33 = vmul.f32 0.01, %v1688_v50  ;;  %vm1720_vm12 = vcmp.gt.f32.partialorder %v1688_v50, 0.0  ;;  %3110 = vmatpush3.bf16.msra.mxu0 %v3242_v37  ;;  %3162 = vmatpush3.bf16.msra.mxu1 %v3242_v37 }
 0x2fa   :  { %3111 = vmatprep.subr.bf16.mxu0 %v3243_v22  ;;  %3155 = vmatprep.subr.bf16.mxu1 %v3243_v22 }
 0x2fb   :  { %v1782_v20 = vsel %vm1718_vm10, %v1686_v54, %v1750_v24  ;;  %v1784_v49 = vsel %vm1720_vm12, %v1688_v50, %v1752_v33 }
 0x2fc   :  { %v3998_v47 = vpop.permute.xlu1 %1503  ;;  %3218 = vset.pattern.permute.xlu1 %v3249_v28 }
 0x2fd   :  { %v1621_v35 = vmul.f32 %v3883_v58, %v3998_v47  ;;  %1603 = vperm.xlu1 %3218, %v1249_v53   ;;  %v1426_v53 = vmul.f32 %v3888_v42, %v4041_v27  ;;  %3112 = vmatpush3.bf16.msra.mxu0 %v3243_v22 }
 0x2fe   :  { %3163 = vmatpush3.bf16.msra.mxu1 %v3243_v22 }
 0x2ff   :  { %v1653_v56 = vadd.f32 %v1621_v35, %v1425_v52  ;;  %v1624_v52 = vmul.f32 %v3883_v58, %v4034_v46 }
 0x301   :  { %v4011_v28 = vpop.permute.xlu1 %1297  ;;  %v1689_v13 = vadd.f32 %v3917_v63, %v1653_v56  ;;  %v4060_v56 = vpop.permute.xlu0 %1513 }
 0x302   :  { %v1423_v16 = vmul.f32 %v3888_v42, %v4011_v28  ;;  %v1623_v54 = vmul.f32 %v3883_v58, %v4060_v56 }
 0x303   :  { %v1753_v17 = vmul.f32 0.01, %v1689_v13  ;;  %vm1721_vm9 = vcmp.gt.f32.partialorder %v1689_v13, 0.0 }
 0x304   :  { %v1651_v21 = vadd.f32 %v1619_v19, %v1423_v16 }
 0x305   :  { %v4026_v5 = vpop.permute.xlu1 %1322  ;;  %v1785_v44 = vsel %vm1721_vm9, %v1689_v13, %v1753_v17 }
 0x306   :  { %v1687_v30 = vadd.f32 %v3917_v63, %v1651_v21  ;;  %v1811_v57 = vpack.c.bf16 %v1785_v44, %v1784_v49  ;;  %v1428_v62 = vmul.f32 %v3888_v42, %v4026_v5 }
 0x308   :  { %vm1719_vm11 = vcmp.gt.f32.partialorder %v1687_v30, 0.0  ;;  %v1751_v14 = vmul.f32 0.01, %v1687_v30  ;;  %v1656_v8 = vadd.f32 %v1624_v52, %v1428_v62  ;;  %v3246_v52 = vld [vmem:[%s4485_s1 + $0xa0] sm:$0xff]  }
 0x30a   :  { %v4032_v34 = vpop.permute.xlu1 %1508  ;;  %v1783_v61 = vsel %vm1719_vm11, %v1687_v30, %v1751_v14  ;;  %v1692_v25 = vadd.f32 %v3917_v63, %v1656_v8  ;;  %v3244_v14 = vld [vmem:[%s4485_s1 + $0xb0] sm:$0xff]  }
 0x30b   :  { %v1810_v31 = vpack.c.bf16 %v1783_v61, %v1782_v20  ;;  %v1622_v48 = vmul.f32 %v3883_v58, %v4032_v34  ;;  %3113 = vmatprep.subr.bf16.mxu0 %v3244_v14  ;;  %3156 = vmatprep.subr.bf16.mxu1 %v3244_v14 }
 0x30c   :  { %v1756_v39 = vmul.f32 0.01, %v1692_v25  ;;  %vm1724_vm0 = vcmp.gt.f32.partialorder %v1692_v25, 0.0  ;;  %3114 = vmatpush3.bf16.msra.mxu0 %v3244_v14  ;;  %3164 = vmatpush3.bf16.msra.mxu1 %v3244_v14 }
 0x30d   :  { %3079 = vmatprep.mubr.bf16.mxu0 %v1810_v31  ;;  %v1654_v6 = vadd.f32 %v1622_v48, %v1426_v53  ;;  %v3245_v48 = vld [vmem:[%s4485_s1 + $0xa8] sm:$0xff]  }
 0x30e   :  { %3080 = vmatmul.mubr.bf16.gmra.mxu0 %v1811_v57  ;;  %v4079_v57 = vpop.permute.xlu0 %1538  ;;  %v1788_v22 = vsel %vm1724_vm0, %v1692_v25, %v1756_v39  ;;  %3115 = vmatprep.subr.bf16.mxu0 %v3245_v48 }
 0x30f   :  { %v4039_v11 = vpop.permute.xlu1 %1327  ;;  %v1690_v50 = vadd.f32 %v3917_v63, %v1654_v6  ;;  %3157 = vmatprep.subr.bf16.mxu1 %v3245_v48 }
 0x310   :  { %v1429_v35 = vmul.f32 %v3888_v42, %v4039_v11  ;;  %3116 = vmatpush3.bf16.msra.mxu0 %v3245_v48  ;;  %3165 = vmatpush3.bf16.msra.mxu1 %v3245_v48 }
 0x311   :  { %v1754_v33 = vmul.f32 0.01, %v1690_v50  ;;  %vm1722_vm14 = vcmp.gt.f32.partialorder %v1690_v50, 0.0  ;;  %3117 = vmatprep.subr.bf16.mxu0 %v3246_v52  ;;  %3158 = vmatprep.subr.bf16.mxu1 %v3246_v52 }
 0x313   :  { %v1786_v31 = vsel %vm1722_vm14, %v1690_v50, %v1754_v33 }
 0x314   :  { %v4052_v51 = vpop.permute.xlu1 %1523  ;;  %3118 = vmatpush3.bf16.msra.mxu0 %v3246_v52  ;;  %3166 = vmatpush3.bf16.msra.mxu1 %v3246_v52 }
 0x315   :  { %v1625_v55 = vmul.f32 %v3883_v58, %v4052_v51 }
 0x317   :  { %v1657_v19 = vadd.f32 %v1625_v55, %v1429_v35  ;;  %v4089_v35 = vpop.permute.xlu0 %1332 }
 0x318   :  { %v1430_v8 = vmul.f32 %v3888_v42, %v4089_v35 }
 0x319   :  { %v1693_v13 = vadd.f32 %v3917_v63, %v1657_v19  ;;  %v4063_v16 = vpop.permute.xlu1 %1317 }
 0x31a   :  { %v1427_v21 = vmul.f32 %v3888_v42, %v4063_v16 }
 0x31b   :  { %v1757_v17 = vmul.f32 0.01, %v1693_v13  ;;  %vm1725_vm13 = vcmp.gt.f32.partialorder %v1693_v13, 0.0  ;;  %v4105_v25 = vpop.permute.xlu0 %1533 }
 0x31c   :  { %v1655_v32 = vadd.f32 %v1623_v54, %v1427_v21  ;;  %v1627_v39 = vmul.f32 %v3883_v58, %v4105_v25 }
 0x31d   :  { %v4071_v30 = vpop.permute.xlu1 %1342  ;;  %v1789_v20 = vsel %vm1725_vm13, %v1693_v13, %v1757_v17  ;;  %v1628_v13 = vmul.f32 %v3883_v58, %v4079_v57 }
 0x31e   :  { %v1691_v24 = vadd.f32 %v3917_v63, %v1655_v32  ;;  %v1813_v62 = vpack.c.bf16 %v1789_v20, %v1788_v22  ;;  %v1432_v6 = vmul.f32 %v3888_v42, %v4071_v30 }
 0x320   :  { %vm1723_vm15 = vcmp.gt.f32.partialorder %v1691_v24, 0.0  ;;  %v1755_v44 = vmul.f32 0.01, %v1691_v24  ;;  %v1660_v32 = vadd.f32 %v1628_v13, %v1432_v6 }
 0x322   :  { %v4077_v61 = vpop.permute.xlu1 %1528  ;;  %v1787_v49 = vsel %vm1723_vm15, %v1691_v24, %v1755_v44  ;;  %v1696_v20 = vadd.f32 %v3917_v63, %v1660_v32 }
 0x323   :  { %v1812_v37 = vpack.c.bf16 %v1787_v49, %v1786_v31  ;;  %v1626_v55 = vmul.f32 %v3883_v58, %v4077_v61 }
 0x324   :  { %vm1728_vm4 = vcmp.gt.f32.partialorder %v1696_v20, 0.0 }
 0x325   :  { %3083 = vmatprep.mubr.bf16.mxu0 %v1812_v37  ;;  %v1658_v21 = vadd.f32 %v1626_v55, %v1430_v8 }
 0x326   :  { %3084 = vmatmul.mubr.bf16.gmra.mxu0 %v1813_v62  ;;  %v1760_v62 = vmul.f32 0.01, %v1696_v20 }
 0x327   :  { %v4084_v53 = vpop.permute.xlu1 %1347  ;;  %v1694_v14 = vadd.f32 %v3917_v63, %v1658_v21 }
 0x328   :  { %v1433_v54 = vmul.f32 %v3888_v42, %v4084_v53  ;;  %v1792_v21 = vsel %vm1728_vm4, %v1696_v20, %v1760_v62 }
 0x329   :  { %v1758_v48 = vmul.f32 0.01, %v1694_v14  ;;  %vm1726_vm2 = vcmp.gt.f32.partialorder %v1694_v14, 0.0 }
 0x32b   :  { %v1790_v8 = vsel %vm1726_vm2, %v1694_v14, %v1758_v48 }
 0x32c   :  { %v4097_v19 = vpop.permute.xlu1 %1543 }
 0x32d   :  { %v1629_v50 = vmul.f32 %v3883_v58, %v4097_v19 }
 0x32f   :  { %v1661_v17 = vadd.f32 %v1629_v50, %v1433_v54  ;;  %v4121_v54 = vpop.permute.xlu0 %1558 }
 0x330   :  { %4514 = vst [vmem:[#allocation4_spill] sm:$0xff] %v4121_v54  ;;  %v1632_v20 = vmul.f32 %v3883_v58, %v4121_v54 }
 0x331   :  { %v1697_v24 = vadd.f32 %v3917_v63, %v1661_v17  ;;  %v4108_v33 = vpop.permute.xlu1 %1337 }
 0x332   :  { %v1431_v44 = vmul.f32 %v3888_v42, %v4108_v33 }
 0x333   :  { %v1761_v37 = vmul.f32 0.01, %v1697_v24  ;;  %vm1729_vm1 = vcmp.gt.f32.partialorder %v1697_v24, 0.0 }
 0x334   :  { %v1659_v31 = vadd.f32 %v1627_v39, %v1431_v44  ;;  %v4125_v39 = vpop.permute.xlu0 %1352 }
 0x335   :  { %v4116_v49 = vpop.permute.xlu1 %1362  ;;  %v1793_v55 = vsel %vm1729_vm1, %v1697_v24, %v1761_v37  ;;  %4516 = vst [vmem:[#allocation6_spill] sm:$0xff] %v4125_v39  ;;  %v1434_v14 = vmul.f32 %v3888_v42, %v4125_v39 }
 0x336   :  { %4512 = vst [vmem:[#allocation2_spill] sm:$0xff] %v4116_v49  ;;  %v1695_v22 = vadd.f32 %v3917_v63, %v1659_v31  ;;  %v1815_v32 = vpack.c.bf16 %v1793_v55, %v1792_v21  ;;  %v1436_v24 = vmul.f32 %v3888_v42, %v4116_v49 }
 0x338   :  { %vm1727_vm3 = vcmp.gt.f32.partialorder %v1695_v22, 0.0  ;;  %v1759_v52 = vmul.f32 0.01, %v1695_v22  ;;  %v4141_v62 = vpop.permute.xlu0 %1553 }
 0x339   :  { %4518 = vst [vmem:[#allocation8_spill] sm:$0xff] %v4141_v62 }
 0x33a   :  { %v4119_v6 = vpop.permute.xlu1 %1548  ;;  %v1791_v13 = vsel %vm1727_vm3, %v1695_v22, %v1759_v52  ;;  %v1664_v52 = vadd.f32 %v1632_v20, %v1436_v24 }
 0x33b   :  { %4513 = vst [vmem:[#allocation3_spill] sm:$0xff] %v4119_v6  ;;  %v1814_v50 = vpack.c.bf16 %v1791_v13, %v1790_v8  ;;  %v1630_v44 = vmul.f32 %v3883_v58, %v4119_v6 }
 0x33c   :  { %v4157_v6 = vpop.permute.xlu0 %1578 }
 0x33d   :  { %3087 = vmatprep.mubr.bf16.mxu0 %v1814_v50  ;;  %v1662_v48 = vadd.f32 %v1630_v44, %v1434_v14  ;;  %v1631_v50 = vmul.f32 %v3883_v58, %v4141_v62  ;;  %4522 = vst [vmem:[#allocation12_spill] sm:$0xff] %v4157_v6 }
 0x33e   :  { %3088 = vmatmul.mubr.bf16.gmra.mxu0 %v1815_v32 }
 0x33f   :  { %v4123_v17 = vpop.permute.xlu1 %1367  ;;  %v1698_v21 = vadd.f32 %v3917_v63, %v1662_v48 }
 0x340   :  { %4515 = vst [vmem:[#allocation5_spill] sm:$0xff] %v4123_v17  ;;  %v1437_v37 = vmul.f32 %v3888_v42, %v4123_v17  ;;  %v1700_v17 = vadd.f32 %v3917_v63, %v1664_v52  ;;  %v4161_v39 = vpop.permute.xlu0 %1372 }
 0x341   :  { %v1762_v20 = vmul.f32 0.01, %v1698_v21  ;;  %vm1730_vm6 = vcmp.gt.f32.partialorder %v1698_v21, 0.0  ;;  %4524 = vst [vmem:[#allocation14_spill] sm:$0xff] %v4161_v39 }
 0x342   :  { %vm1732_vm8 = vcmp.gt.f32.partialorder %v1700_v17, 0.0 }
 0x343   :  { %v1794_v62 = vsel %vm1730_vm6, %v1698_v21, %v1762_v20  ;;  %v1438_v21 = vmul.f32 %v3888_v42, %v4161_v39 }
 0x344   :  { %v4133_v31 = vpop.permute.xlu1 %1563  ;;  %v4177_v20 = vpop.permute.xlu0 %1573 }
 0x345   :  { %4517 = vst [vmem:[#allocation7_spill] sm:$0xff] %v4133_v31  ;;  %v1633_v22 = vmul.f32 %v3883_v58, %v4133_v31  ;;  %4526 = vst [vmem:[#allocation16_spill] sm:$0xff] %v4177_v20 }
 0x347   :  { %v1665_v55 = vadd.f32 %v1633_v22, %v1437_v37  ;;  %v1764_v37 = vmul.f32 0.01, %v1700_v17 }
 0x349   :  { %v1701_v8 = vadd.f32 %v3917_v63, %v1665_v55  ;;  %v4144_v13 = vpop.permute.xlu1 %1357 }
 0x34a   :  { %4519 = vst [vmem:[#allocation9_spill] sm:$0xff] %v4144_v13  ;;  %v1435_v32 = vmul.f32 %v3888_v42, %v4144_v13 }
 0x34b   :  { %v1765_v14 = vmul.f32 0.01, %v1701_v8  ;;  %vm1733_vm5 = vcmp.gt.f32.partialorder %v1701_v8, 0.0 }
 0x34c   :  { %v1663_v31 = vadd.f32 %v1631_v50, %v1435_v32  ;;  %v1796_v50 = vsel %vm1732_vm8, %v1700_v17, %v1764_v37  ;;  %v1636_v17 = vmul.f32 %v3883_v58, %v4157_v6 }
 0x34d   :  { %v4152_v44 = vpop.permute.xlu1 %1382  ;;  %v1797_v55 = vsel %vm1733_vm5, %v1701_v8, %v1765_v14 }
 0x34e   :  { %4520 = vst [vmem:[#allocation10_spill] sm:$0xff] %v4152_v44  ;;  %v1699_v24 = vadd.f32 %v3917_v63, %v1663_v31  ;;  %v1817_v32 = vpack.c.bf16 %v1797_v55, %v1796_v50  ;;  %v1440_v8 = vmul.f32 %v3888_v42, %v4152_v44  ;;  %v1635_v50 = vmul.f32 %v3883_v58, %v4177_v20 }
 0x350   :  { %vm1731_vm7 = vcmp.gt.f32.partialorder %v1699_v24, 0.0  ;;  %v1763_v22 = vmul.f32 0.01, %v1699_v24  ;;  %v1668_v37 = vadd.f32 %v1636_v17, %v1440_v8  ;;  %v4190_v8 = vpop.permute.xlu0 %1392 }
 0x351   :  { %4528 = vst [vmem:[#allocation18_spill] sm:$0xff] %v4190_v8  ;;  %v1442_v44 = vmul.f32 %v3888_v42, %v4190_v8 }
 0x352   :  { %v4155_v48 = vpop.permute.xlu1 %1568  ;;  %v1795_v13 = vsel %vm1731_vm7, %v1699_v24, %v1763_v22 }
 0x353   :  { %4521 = vst [vmem:[#allocation11_spill] sm:$0xff] %v4155_v48  ;;  %v1816_v52 = vpack.c.bf16 %v1795_v13, %v1794_v62  ;;  %v1634_v54 = vmul.f32 %v3883_v58, %v4155_v48  ;;  %v1704_v48 = vadd.f32 %v3917_v63, %v1668_v37 }
 0x354   :  { %v4193_v20 = vpop.permute.xlu0 %1593 }
 0x355   :  { %3091 = vmatprep.mubr.bf16.mxu0 %v1816_v52  ;;  %v1666_v24 = vadd.f32 %v1634_v54, %v1438_v21  ;;  %vm1736_vm12 = vcmp.gt.f32.partialorder %v1704_v48, 0.0  ;;  %4529 = vst [vmem:[#allocation19_spill] sm:$0xff] %v4193_v20 }
 0x356   :  { %3092 = vmatmul.mubr.bf16.gmra.mxu0 %v1817_v32 }
 0x357   :  { %v4159_v31 = vpop.permute.xlu1 %1387  ;;  %v1702_v32 = vadd.f32 %v3917_v63, %v1666_v24 }
 0x358   :  { %4523 = vst [vmem:[#allocation13_spill] sm:$0xff] %v4159_v31  ;;  %v1441_v62 = vmul.f32 %v3888_v42, %v4159_v31 }
 0x359   :  { %vm1734_vm10 = vcmp.gt.f32.partialorder %v1702_v32, 0.0 }
 0x35c   :  { %v4169_v14 = vpop.permute.xlu1 %1583 }
 0x35d   :  { %4525 = vst [vmem:[#allocation15_spill] sm:$0xff] %v4169_v14  ;;  %v1637_v13 = vmul.f32 %v3883_v58, %v4169_v14 }
 0x35f   :  { %v1669_v22 = vadd.f32 %v1637_v13, %v1441_v62  ;;  %v1766_v62 = vmul.f32 0.01, %v1702_v32  ;;  %v1768_v13 = vmul.f32 0.01, %v1704_v48 }
 0x361   :  { %v1705_v55 = vadd.f32 %v3917_v63, %v1669_v22  ;;  %v4180_v52 = vpop.permute.xlu1 %1377  ;;  %v1800_v39 = vsel %vm1736_vm12, %v1704_v48, %v1768_v13 }
 0x362   :  { %4527 = vst [vmem:[#allocation17_spill] sm:$0xff] %v4180_v52  ;;  %v1439_v31 = vmul.f32 %v3888_v42, %v4180_v52 }
 0x363   :  { %v1769_v21 = vmul.f32 0.01, %v1705_v55  ;;  %vm1737_vm9 = vcmp.gt.f32.partialorder %v1705_v55, 0.0 }
 0x364   :  { %v1667_v14 = vadd.f32 %v1635_v50, %v1439_v31  ;;  %v1798_v31 = vsel %vm1734_vm10, %v1702_v32, %v1766_v62 }
 0x365   :  { %v4188_v54 = vpop.permute.xlu1 %1402  ;;  %v1801_v24 = vsel %vm1737_vm9, %v1705_v55, %v1769_v21  ;;  %v4203_v55 = vpop.permute.xlu0 %1598 }
 0x366   :  { %v1703_v17 = vadd.f32 %v3917_v63, %v1667_v14  ;;  %v1819_v14 = vpack.c.bf16 %v1801_v24, %v1800_v39  ;;  %4532 = vst [vmem:[#allocation22_spill] sm:$0xff] %v4203_v55  ;;  %v1444_v32 = vmul.f32 %v3888_v42, %v4188_v54  ;;  %v1640_v48 = vmul.f32 %v3883_v58, %v4203_v55 }
 0x367   :  { %v1639_v39 = vmul.f32 %v3883_v58, %v4193_v20 }
 0x368   :  { %vm1735_vm11 = vcmp.gt.f32.partialorder %v1703_v17, 0.0  ;;  %v1767_v22 = vmul.f32 0.01, %v1703_v17 }
 0x36a   :  { %v4195_v52 = vpop.permute.xlu1 %1588  ;;  %v1799_v37 = vsel %vm1735_vm11, %v1703_v17, %v1767_v22  ;;  %v1672_v22 = vadd.f32 %v1640_v48, %v1444_v32 }
 0x36b   :  { %4530 = vst [vmem:[#allocation20_spill] sm:$0xff] %v4195_v52  ;;  %v1818_v50 = vpack.c.bf16 %v1799_v37, %v1798_v31  ;;  %v1638_v6 = vmul.f32 %v3883_v58, %v4195_v52 }
 0x36c   :  { %v1708_v37 = vadd.f32 %v3917_v63, %v1672_v22 }
 0x36d   :  { %3095 = vmatprep.mubr.bf16.mxu0 %v1818_v50  ;;  %v1670_v21 = vadd.f32 %v1638_v6, %v1442_v44 }
 0x36e   :  { %3096 = vmatmul.mubr.bf16.gmra.mxu0 %v1819_v14  ;;  %vm1740_vm15 = vcmp.gt.f32.partialorder %v1708_v37, 0.0 }
 0x36f   :  { %v4201_v49 = vpop.permute.xlu1 %1407  ;;  %v1706_v62 = vadd.f32 %v3917_v63, %v1670_v21 }
 0x370   :  { %4531 = vst [vmem:[#allocation21_spill] sm:$0xff] %v4201_v49  ;;  %v1445_v50 = vmul.f32 %v3888_v42, %v4201_v49 }
 0x371   :  { %v1770_v31 = vmul.f32 0.01, %v1706_v62  ;;  %vm1738_vm13 = vcmp.gt.f32.partialorder %v1706_v62, 0.0 }
 0x373   :  { %v4209_v17 = vpop.permute.xlu1 %1397 }
 0x374   :  { %4533 = vst [vmem:[#allocation23_spill] sm:$0xff] %v4209_v17  ;;  %v1443_v13 = vmul.f32 %v3888_v42, %v4209_v17  ;;  %v1802_v17 = vsel %vm1738_vm13, %v1706_v62, %v1770_v31 }
 0x376   :  { %v1671_v24 = vadd.f32 %v1639_v39, %v1443_v13  ;;  %v1772_v13 = vmul.f32 0.01, %v1708_v37 }
 0x378   :  { %v1707_v6 = vadd.f32 %v3917_v63, %v1671_v24  ;;  %v4217_v44 = vpop.permute.xlu1 %1603  ;;  %v1804_v22 = vsel %vm1740_vm15, %v1708_v37, %v1772_v13 }
 0x379   :  { %4534 = vst [vmem:[#allocation24_spill] sm:$0xff] %v4217_v44  ;;  %v1641_v14 = vmul.f32 %v3883_v58, %v4217_v44  ;;  %v4228_v58 = vld [vmem:[%s4487_s2 + $0x4] ss:$0 sm:$0xff] }
 0x37a   :  { %vm1739_vm14 = vcmp.gt.f32.partialorder %v1707_v6, 0.0  ;;  %v1771_v21 = vmul.f32 0.01, %v1707_v6 }
 0x37b   :  { %v1673_v20 = vadd.f32 %v1641_v14, %v1445_v50 }
 0x37c   :  { %v1803_v32 = vsel %vm1739_vm14, %v1707_v6, %v1771_v21 }
 0x37d   :  { %v1709_v48 = vadd.f32 %v3917_v63, %v1673_v20  ;;  %v1820_v39 = vpack.c.bf16 %v1803_v32, %v1802_v17 }
 0x37f   :  { %v1773_v24 = vmul.f32 0.01, %v1709_v48  ;;  %3099 = vmatprep.mubr.bf16.mxu0 %v1820_v39  ;;  %vm1741_vm0 = vcmp.gt.f32.partialorder %v1709_v48, 0.0 }
 0x381   :  { %v1805_v52 = vsel %vm1741_vm0, %v1709_v48, %v1773_v24 }
 0x382   :  { %v1821_v42 = vpack.c.bf16 %v1805_v52, %v1804_v22 }
 0x384   :  { %3100 = vmatmul.mubr.bf16.gmra.mxu0 %v1821_v42 }
 0x39d   :  { %v3073_v49 = vpop.f32.mrf.mxu0 }
 0x39e   :  { %v1917_v63 = vadd.f32 %v3073_v49, %v4228_v58 }
 0x39f   :  { %v1908_v62 = vpop.f32.mrf.mxu0 }
 0x3a0   :  { %v1909_v6 = vadd.f32 %v4228_v58, %v1908_v62  ;;  %v2069_v14 = vmul.f32 0.01, %v1917_v63  ;;  %vm2037_vm3 = vcmp.gt.f32.partialorder %v1917_v63, 0.0 }
 0x3a1   :  { %v3074_v20 = vpop.f32.mrf.mxu0 }
 0x3a2   :  { %v1920_v17 = vadd.f32 %v3074_v20, %v4228_v58  ;;  %v2067_v50 = vmul.f32 0.01, %v1909_v6  ;;  %vm2035_vm2 = vcmp.gt.f32.partialorder %v1909_v6, 0.0  ;;  %v2101_v13 = vsel %vm2037_vm3, %v1917_v63, %v2069_v14 }
 0x3a3   :  { %v1911_v31 = vpop.f32.mrf.mxu0 }
 0x3a4   :  { %vm2038_vm1 = vcmp.gt.f32.partialorder %v1920_v17, 0.0  ;;  %v2070_v37 = vmul.f32 0.01, %v1920_v17  ;;  %v1912_v52 = vadd.f32 %v4228_v58, %v1911_v31  ;;  %v2099_v48 = vsel %vm2035_vm2, %v1909_v6, %v2067_v50 }
 0x3a6   :  { %vm2036_vm4 = vcmp.gt.f32.partialorder %v1912_v52, 0.0  ;;  %v2068_v21 = vmul.f32 0.01, %v1912_v52  ;;  %v2102_v32 = vsel %vm2038_vm1, %v1920_v17, %v2070_v37 }
 0x3a7   :  { %v2132_v49 = vpack.c.bf16 %v2102_v32, %v2101_v13 }
 0x3a8   :  { %v2100_v39 = vsel %vm2036_vm4, %v1912_v52, %v2068_v21 }
 0x3a9   :  { %v2131_v24 = vpack.c.bf16 %v2100_v39, %v2099_v48 }
 0x3ab   :  { %3119 = vmatprep.mubr.bf16.mxu0 %v2131_v24 }
 0x3ac   :  { %3120 = vmatmul.mubr.bf16.vlgmr.msra.gmra.mxu0 %v2132_v49 }
 0x3b4   :  { %v3077_v22 = vpop.f32.mrf.mxu0 }
 0x3b5   :  { %v1933_v20 = vadd.f32 %v3077_v22, %v4228_v58 }
 0x3b6   :  { %v1924_v42 = vpop.f32.mrf.mxu0 }
 0x3b7   :  { %v1925_v62 = vadd.f32 %v4228_v58, %v1924_v42  ;;  %v2073_v63 = vmul.f32 0.01, %v1933_v20  ;;  %vm2041_vm7 = vcmp.gt.f32.partialorder %v1933_v20, 0.0 }
 0x3b8   :  { %v3078_v31 = vpop.f32.mrf.mxu0 }
 0x3b9   :  { %v1936_v44 = vadd.f32 %v3078_v31, %v4228_v58  ;;  %v2071_v8 = vmul.f32 0.01, %v1925_v62  ;;  %vm2039_vm6 = vcmp.gt.f32.partialorder %v1925_v62, 0.0  ;;  %v2105_v21 = vsel %vm2041_vm7, %v1933_v20, %v2073_v63 }
 0x3ba   :  { %v1927_v55 = vpop.f32.mrf.mxu0 }
 0x3bb   :  { %vm2042_vm5 = vcmp.gt.f32.partialorder %v1936_v44, 0.0  ;;  %v2074_v17 = vmul.f32 0.01, %v1936_v44  ;;  %v1928_v6 = vadd.f32 %v4228_v58, %v1927_v55  ;;  %v2103_v52 = vsel %vm2039_vm6, %v1925_v62, %v2071_v8 }
 0x3bd   :  { %vm2040_vm8 = vcmp.gt.f32.partialorder %v1928_v6, 0.0  ;;  %v2072_v50 = vmul.f32 0.01, %v1928_v6  ;;  %v2106_v37 = vsel %vm2042_vm5, %v1936_v44, %v2074_v17 }
 0x3be   :  { %v2134_v48 = vpack.c.bf16 %v2106_v37, %v2105_v21 }
 0x3bf   :  { %v2104_v14 = vsel %vm2040_vm8, %v1928_v6, %v2072_v50 }
 0x3c0   :  { %v2133_v32 = vpack.c.bf16 %v2104_v14, %v2103_v52 }
 0x3c2   :  { %3123 = vmatprep.mubr.bf16.mxu1 %v2133_v32 }
 0x3c3   :  { %3124 = vmatmul.mubr.bf16.vlgmr.msra.gmra.mxu1 %v2134_v48 }
 0x3ce   :  { %v3081_v39 = vpop.f32.mrf.mxu0 }
 0x3cf   :  { %v1949_v49 = vadd.f32 %v3081_v39, %v4228_v58 }
 0x3d0   :  { %v1940_v13 = vpop.f32.mrf.mxu0 }
 0x3d1   :  { %v1941_v24 = vadd.f32 %v4228_v58, %v1940_v13  ;;  %v2077_v62 = vmul.f32 0.01, %v1949_v49  ;;  %vm2045_vm11 = vcmp.gt.f32.partialorder %v1949_v49, 0.0 }
 0x3d2   :  { %v3082_v55 = vpop.f32.mrf.mxu0 }
 0x3d3   :  { %v1952_v22 = vadd.f32 %v3082_v55, %v4228_v58  ;;  %v2075_v31 = vmul.f32 0.01, %v1941_v24  ;;  %vm2043_vm10 = vcmp.gt.f32.partialorder %v1941_v24, 0.0  ;;  %v2109_v37 = vsel %vm2045_vm11, %v1949_v49, %v2077_v62 }
 0x3d4   :  { %v1943_v42 = vpop.f32.mrf.mxu0 }
 0x3d5   :  { %vm2046_vm9 = vcmp.gt.f32.partialorder %v1952_v22, 0.0  ;;  %v2078_v44 = vmul.f32 0.01, %v1952_v22  ;;  %v1944_v8 = vadd.f32 %v4228_v58, %v1943_v42  ;;  %v2107_v6 = vsel %vm2043_vm10, %v1941_v24, %v2075_v31 }
 0x3d7   :  { %vm2044_vm12 = vcmp.gt.f32.partialorder %v1944_v8, 0.0  ;;  %v2076_v20 = vmul.f32 0.01, %v1944_v8  ;;  %v2110_v17 = vsel %vm2046_vm9, %v1952_v22, %v2078_v44 }
 0x3d8   :  { %v2136_v52 = vpack.c.bf16 %v2110_v17, %v2109_v37 }
 0x3d9   :  { %v2108_v63 = vsel %vm2044_vm12, %v1944_v8, %v2076_v20 }
 0x3da   :  { %v2135_v50 = vpack.c.bf16 %v2108_v63, %v2107_v6 }
 0x3dc   :  { %3127 = vmatprep.mubr.bf16.mxu1 %v2135_v50 }
 0x3dd   :  { %3128 = vmatmul.mubr.bf16.gmra.mxu1 %v2136_v52 }
 0x3e6   :  { %v3085_v14 = vpop.f32.mrf.mxu0 }
 0x3e7   :  { %v1965_v48 = vadd.f32 %v3085_v14, %v4228_v58 }
 0x3e8   :  { %v1956_v21 = vpop.f32.mrf.mxu0 }
 0x3e9   :  { %v1957_v32 = vadd.f32 %v4228_v58, %v1956_v21  ;;  %v2081_v31 = vmul.f32 0.01, %v1965_v48  ;;  %vm2049_vm15 = vcmp.gt.f32.partialorder %v1965_v48, 0.0 }
 0x3ea   :  { %v3086_v39 = vpop.f32.mrf.mxu0 }
 0x3eb   :  { %v1968_v13 = vadd.f32 %v3086_v39, %v4228_v58  ;;  %v2079_v42 = vmul.f32 0.01, %v1957_v32  ;;  %vm2047_vm14 = vcmp.gt.f32.partialorder %v1957_v32, 0.0  ;;  %v2113_v17 = vsel %vm2049_vm15, %v1965_v48, %v2081_v31 }
 0x3ec   :  { %v1959_v55 = vpop.f32.mrf.mxu0 }
 0x3ed   :  { %vm2050_vm13 = vcmp.gt.f32.partialorder %v1968_v13, 0.0  ;;  %v2082_v22 = vmul.f32 0.01, %v1968_v13  ;;  %v1960_v24 = vadd.f32 %v4228_v58, %v1959_v55  ;;  %v2111_v8 = vsel %vm2047_vm14, %v1957_v32, %v2079_v42 }
 0x3ef   :  { %vm2048_vm0 = vcmp.gt.f32.partialorder %v1960_v24, 0.0  ;;  %v2080_v49 = vmul.f32 0.01, %v1960_v24  ;;  %v2114_v44 = vsel %vm2050_vm13, %v1968_v13, %v2082_v22 }
 0x3f0   :  { %v2138_v6 = vpack.c.bf16 %v2114_v44, %v2113_v17 }
 0x3f1   :  { %v2112_v62 = vsel %vm2048_vm0, %v1960_v24, %v2080_v49 }
 0x3f2   :  { %v2137_v20 = vpack.c.bf16 %v2112_v62, %v2111_v8 }
 0x3f4   :  { %3131 = vmatprep.mubr.bf16.mxu1 %v2137_v20 }
 0x3f5   :  { %3132 = vmatmul.mubr.bf16.gmra.mxu1 %v2138_v6 }
 0x3fe   :  { %v3089_v63 = vpop.f32.mrf.mxu0 }
 0x3ff   :  { %v1981_v52 = vadd.f32 %v3089_v63, %v4228_v58 }
 0x400   :  { %v1972_v50 = vpop.f32.mrf.mxu0 }
 0x401   :  { %v1973_v37 = vadd.f32 %v4228_v58, %v1972_v50  ;;  %v2085_v42 = vmul.f32 0.01, %v1981_v52  ;;  %vm2053_vm3 = vcmp.gt.f32.partialorder %v1981_v52, 0.0 }
 0x402   :  { %v3090_v14 = vpop.f32.mrf.mxu0 }
 0x403   :  { %v1984_v21 = vadd.f32 %v3090_v14, %v4228_v58  ;;  %v2083_v55 = vmul.f32 0.01, %v1973_v37  ;;  %vm2051_vm2 = vcmp.gt.f32.partialorder %v1973_v37, 0.0  ;;  %v2117_v44 = vsel %vm2053_vm3, %v1981_v52, %v2085_v42 }
 0x404   :  { %v1975_v39 = vpop.f32.mrf.mxu0 }
 0x405   :  { %vm2054_vm1 = vcmp.gt.f32.partialorder %v1984_v21, 0.0  ;;  %v2086_v13 = vmul.f32 0.01, %v1984_v21  ;;  %v1976_v32 = vadd.f32 %v4228_v58, %v1975_v39  ;;  %v2115_v24 = vsel %vm2051_vm2, %v1973_v37, %v2083_v55 }
 0x407   :  { %vm2052_vm4 = vcmp.gt.f32.partialorder %v1976_v32, 0.0  ;;  %v2084_v48 = vmul.f32 0.01, %v1976_v32  ;;  %v2118_v22 = vsel %vm2054_vm1, %v1984_v21, %v2086_v13 }
 0x408   :  { %v2140_v8 = vpack.c.bf16 %v2118_v22, %v2117_v44 }
 0x409   :  { %v2116_v31 = vsel %vm2052_vm4, %v1976_v32, %v2084_v48 }
 0x40a   :  { %v2139_v49 = vpack.c.bf16 %v2116_v31, %v2115_v24 }
 0x40c   :  { %3135 = vmatprep.mubr.bf16.mxu1 %v2139_v49 }
 0x40d   :  { %3136 = vmatmul.mubr.bf16.gmra.mxu1 %v2140_v8 }
 0x416   :  { %v3093_v62 = vpop.f32.mrf.mxu0 }
 0x417   :  { %v1997_v6 = vadd.f32 %v3093_v62, %v4228_v58 }
 0x418   :  { %v1988_v20 = vpop.f32.mrf.mxu0 }
 0x419   :  { %v1989_v17 = vadd.f32 %v4228_v58, %v1988_v20  ;;  %v2089_v55 = vmul.f32 0.01, %v1997_v6  ;;  %vm2057_vm7 = vcmp.gt.f32.partialorder %v1997_v6, 0.0 }
 0x41a   :  { %v3094_v63 = vpop.f32.mrf.mxu0 }
 0x41b   :  { %v2000_v50 = vadd.f32 %v3094_v63, %v4228_v58  ;;  %v2087_v39 = vmul.f32 0.01, %v1989_v17  ;;  %vm2055_vm6 = vcmp.gt.f32.partialorder %v1989_v17, 0.0  ;;  %v2121_v22 = vsel %vm2057_vm7, %v1997_v6, %v2089_v55 }
 0x41c   :  { %v1991_v14 = vpop.f32.mrf.mxu0 }
 0x41d   :  { %vm2058_vm5 = vcmp.gt.f32.partialorder %v2000_v50, 0.0  ;;  %v2090_v21 = vmul.f32 0.01, %v2000_v50  ;;  %v1992_v37 = vadd.f32 %v4228_v58, %v1991_v14  ;;  %v2119_v32 = vsel %vm2055_vm6, %v1989_v17, %v2087_v39 }
 0x41f   :  { %vm2056_vm8 = vcmp.gt.f32.partialorder %v1992_v37, 0.0  ;;  %v2088_v52 = vmul.f32 0.01, %v1992_v37  ;;  %v2122_v13 = vsel %vm2058_vm5, %v2000_v50, %v2090_v21 }
 0x420   :  { %v2142_v24 = vpack.c.bf16 %v2122_v13, %v2121_v22 }
 0x421   :  { %v2120_v42 = vsel %vm2056_vm8, %v1992_v37, %v2088_v52 }
 0x422   :  { %v2141_v48 = vpack.c.bf16 %v2120_v42, %v2119_v32 }
 0x424   :  { %3139 = vmatprep.mubr.bf16.mxu1 %v2141_v48 }
 0x425   :  { %3140 = vmatmul.mubr.bf16.gmra.mxu1 %v2142_v24 }
 0x42e   :  { %v3097_v31 = vpop.f32.mrf.mxu0 }
 0x42f   :  { %v2013_v8 = vadd.f32 %v3097_v31, %v4228_v58 }
 0x430   :  { %v2004_v49 = vpop.f32.mrf.mxu0 }
 0x431   :  { %v2005_v44 = vadd.f32 %v4228_v58, %v2004_v49  ;;  %v2093_v39 = vmul.f32 0.01, %v2013_v8  ;;  %vm2061_vm11 = vcmp.gt.f32.partialorder %v2013_v8, 0.0 }
 0x432   :  { %v3098_v62 = vpop.f32.mrf.mxu0 }
 0x433   :  { %v2016_v20 = vadd.f32 %v3098_v62, %v4228_v58  ;;  %v2091_v14 = vmul.f32 0.01, %v2005_v44  ;;  %vm2059_vm10 = vcmp.gt.f32.partialorder %v2005_v44, 0.0  ;;  %v2125_v13 = vsel %vm2061_vm11, %v2013_v8, %v2093_v39 }
 0x434   :  { %v2007_v63 = vpop.f32.mrf.mxu0 }
 0x435   :  { %vm2062_vm9 = vcmp.gt.f32.partialorder %v2016_v20, 0.0  ;;  %v2094_v50 = vmul.f32 0.01, %v2016_v20  ;;  %v2008_v17 = vadd.f32 %v4228_v58, %v2007_v63  ;;  %v2123_v37 = vsel %vm2059_vm10, %v2005_v44, %v2091_v14 }
 0x437   :  { %vm2060_vm12 = vcmp.gt.f32.partialorder %v2008_v17, 0.0  ;;  %v2092_v6 = vmul.f32 0.01, %v2008_v17  ;;  %v2126_v21 = vsel %vm2062_vm9, %v2016_v20, %v2094_v50 }
 0x438   :  { %v2144_v32 = vpack.c.bf16 %v2126_v21, %v2125_v13 }
 0x439   :  { %v2124_v55 = vsel %vm2060_vm12, %v2008_v17, %v2092_v6 }
 0x43a   :  { %v2143_v52 = vpack.c.bf16 %v2124_v55, %v2123_v37  ;;  %v4265_v55 = vld [vmem:[%s4487_s2 + $0x6] ss:$0 sm:$0xff] }
 0x43c   :  { %3143 = vmatprep.mubr.bf16.mxu1 %v2143_v52  ;;  %v4275_v52 = vld [vmem:[%s4487_s2 + $0x7] ss:$0 sm:$0xff] }
 0x43d   :  { %3144 = vmatmul.mubr.bf16.gmra.mxu1 %v2144_v32  ;;  %v2366_v32 = vmul.f32 %v4265_v55, %v3854_v60 }
 0x444   :  { %v3101_v42 = vpop.f32.mrf.mxu0 }
 0x445   :  { %v2029_v24 = vadd.f32 %v3101_v42, %v4228_v58 }
 0x446   :  { %v2020_v48 = vpop.f32.mrf.mxu0 }
 0x447   :  { %v2021_v22 = vadd.f32 %v4228_v58, %v2020_v48  ;;  %v2097_v14 = vmul.f32 0.01, %v2029_v24  ;;  %vm2065_vm15 = vcmp.gt.f32.partialorder %v2029_v24, 0.0 }
 0x448   :  { %v3102_v31 = vpop.f32.mrf.mxu0 }
 0x449   :  { %v2032_v49 = vadd.f32 %v3102_v31, %v4228_v58  ;;  %v2095_v63 = vmul.f32 0.01, %v2021_v22  ;;  %vm2063_vm14 = vcmp.gt.f32.partialorder %v2021_v22, 0.0  ;;  %v2129_v21 = vsel %vm2065_vm15, %v2029_v24, %v2097_v14 }
 0x44a   :  { %v2023_v62 = vpop.f32.mrf.mxu0  ;;  %v2364_v24 = vmul.f32 %v4265_v55, %v3876_v29  ;;  %v2365_v29 = vmul.f32 %v4265_v55, %v3905_v36 }
 0x44b   :  { %vm2066_vm13 = vcmp.gt.f32.partialorder %v2032_v49, 0.0  ;;  %v2098_v20 = vmul.f32 0.01, %v2032_v49  ;;  %v2024_v44 = vadd.f32 %v4228_v58, %v2023_v62  ;;  %v2127_v17 = vsel %vm2063_vm14, %v2021_v22, %v2095_v63  ;;  %v4270_v58 = vld [vmem:[%s4487_s2 + $0x5] ss:$0 sm:$0xff] }
 0x44c   :  { %v2434_v22 = vmul.f32 %v4275_v52, %v3860_v26  ;;  %v2432_v62 = vmul.f32 %v4275_v52, %v3864_v38  ;;  %v2435_v26 = vmul.f32 %v4275_v52, %v3878_v41  ;;  %v2433_v38 = vmul.f32 %v4275_v52, %v3920_v43 }
 0x44d   :  { %vm2064_vm0 = vcmp.gt.f32.partialorder %v2024_v44, 0.0  ;;  %v2096_v8 = vmul.f32 0.01, %v2024_v44  ;;  %v2130_v50 = vsel %vm2066_vm13, %v2032_v49, %v2098_v20  ;;  %v2367_v20 = vmul.f32 %v4265_v55, %v3869_v15 }
 0x44e   :  { %v2146_v37 = vpack.c.bf16 %v2130_v50, %v2129_v21 }
 0x44f   :  { %v2128_v39 = vsel %vm2064_vm0, %v2024_v44, %v2096_v8 }
 0x450   :  { %v2145_v6 = vpack.c.bf16 %v2128_v39, %v2127_v17 }
 0x452   :  { %3147 = vmatprep.mubr.bf16.mxu1 %v2145_v6 }
 0x453   :  { %3148 = vmatmul.mubr.bf16.gmra.mxu1 %v2146_v37 }
 0x46c   :  { %v3121_v13 = vpop.f32.mrf.mxu0 }
 0x46d   :  { %v2242_v42 = vadd.f32 %v3121_v13, %v4270_v58  ;;  %v2370_v13 = vmul.f32 %v4265_v55, %v3933_v23 }
 0x46e   :  { %v2233_v48 = vpop.f32.mrf.mxu0 }
 0x46f   :  { %v2398_v31 = vadd.f32 %v2366_v32, %v2242_v42  ;;  %v2234_v49 = vadd.f32 %v4270_v58, %v2233_v48  ;;  %v2438_v42 = vmul.f32 %v4275_v52, %v3903_v2  ;;  %v2368_v48 = vmul.f32 %v4265_v55, %v3942_v40 }
 0x470   :  { %v3122_v63 = vpop.f32.mrf.mxu0  ;;  %v2369_v2 = vmul.f32 %v4265_v55, %v3912_v59  ;;  %v2439_v40 = vmul.f32 %v4275_v52, %v3967_v7 }
 0x471   :  { %v2466_v60 = vadd.f32 %v2434_v22, %v2398_v31  ;;  %v2396_v44 = vadd.f32 %v2364_v24, %v2234_v49  ;;  %v2245_v14 = vadd.f32 %v3122_v63, %v4270_v58  ;;  %v2436_v31 = vmul.f32 %v4275_v52, %v3947_v10 }
 0x472   :  { %v2236_v8 = vpop.f32.mrf.mxu0  ;;  %v2437_v10 = vmul.f32 %v4275_v52, %v3930_v18 }
 0x473   :  { %v2464_v50 = vadd.f32 %v2432_v62, %v2396_v44  ;;  %v2399_v17 = vadd.f32 %v2367_v20, %v2245_v14  ;;  %v2237_v39 = vadd.f32 %v4270_v58, %v2236_v8  ;;  %v2371_v62 = vmul.f32 %v4265_v55, %v3962_v1 }
 0x475   :  { %v2467_v6 = vadd.f32 %v2435_v26, %v2399_v17  ;;  %v2397_v15 = vadd.f32 %v2365_v29, %v2237_v39  ;;  %v2374_v17 = vmul.f32 %v4265_v55, %v3977_v12 }
 0x477   :  { %v2788_v21 = vpack.c.bf16 %v2467_v6, %v2466_v60  ;;  %v2465_v37 = vadd.f32 %v2433_v38, %v2397_v15  ;;  %v2442_v38 = vmul.f32 %v4275_v52, %v3986_v3  ;;  %v2372_v6 = vmul.f32 %v4265_v55, %v3992_v45 }
 0x478   :  { %v2443_v3 = vmul.f32 %v4275_v52, %v3998_v47  ;;  %v2373_v45 = vmul.f32 %v4265_v55, %v4011_v28 }
 0x479   :  { %2860 = vst [vmem:[%s4488_s3 + $0x8] sm:$0xff] %v2788_v21   ;;  %v2783_v41 = vpack.c.bf16 %v2465_v37, %v2464_v50  ;;  %v2440_v37 = vmul.f32 %v4275_v52, %v3984_v9  ;;  %v2441_v9 = vmul.f32 %v4275_v52, %v4009_v4 }
 0x47b   :  { %2784 = vst [vmem:[%s4488_s3] sm:$0xff] %v2783_v41  }
 0x483   :  { %v3125_v36 = vpop.f32.mrf.mxu1 }
 0x484   :  { %v2258_v32 = vadd.f32 %v3125_v36, %v4270_v58  ;;  %v2375_v36 = vmul.f32 %v4265_v55, %v3990_v0 }
 0x485   :  { %v2249_v43 = vpop.f32.mrf.mxu1 }
 0x486   :  { %v2402_v22 = vadd.f32 %v2370_v13, %v2258_v32  ;;  %v2250_v24 = vadd.f32 %v4270_v58, %v2249_v43 }
 0x487   :  { %v3126_v49 = vpop.f32.mrf.mxu1 }
 0x488   :  { %v2470_v23 = vadd.f32 %v2438_v42, %v2402_v22  ;;  %v2400_v63 = vadd.f32 %v2368_v48, %v2250_v24  ;;  %v2261_v20 = vadd.f32 %v3126_v49, %v4270_v58 }
 0x489   :  { %v2252_v60 = vpop.f32.mrf.mxu1 }
 0x48a   :  { %v2468_v44 = vadd.f32 %v2436_v31, %v2400_v63  ;;  %v2403_v14 = vadd.f32 %v2371_v62, %v2261_v20  ;;  %v2253_v26 = vadd.f32 %v4270_v58, %v2252_v60  ;;  %v2378_v62 = vmul.f32 %v4265_v55, %v4026_v5 }
 0x48b   :  { %v2446_v63 = vmul.f32 %v4275_v52, %v4034_v46  ;;  %v2376_v20 = vmul.f32 %v4265_v55, %v4041_v27  ;;  %v2447_v46 = vmul.f32 %v4275_v52, %v4052_v51  ;;  %v2377_v27 = vmul.f32 %v4265_v55, %v4063_v16 }
 0x48c   :  { %v2471_v8 = vadd.f32 %v2439_v40, %v2403_v14  ;;  %v2401_v1 = vadd.f32 %v2369_v2, %v2253_v26  ;;  %v2444_v40 = vmul.f32 %v4275_v52, %v4032_v34  ;;  %v2379_v14 = vmul.f32 %v4265_v55, %v4039_v11 }
 0x48d   :  { %v2445_v34 = vmul.f32 %v4275_v52, %v4060_v56 }
 0x48e   :  { %v2798_v29 = vpack.c.bf16 %v2471_v8, %v2470_v23  ;;  %v2469_v50 = vadd.f32 %v2437_v10, %v2401_v1 }
 0x490   :  { %2862 = vst [vmem:[%s4488_s3 + $0x18] sm:$0xff] %v2798_v29   ;;  %v2793_v59 = vpack.c.bf16 %v2469_v50, %v2468_v44 }
 0x492   :  { %2861 = vst [vmem:[%s4488_s3 + $0x10] sm:$0xff] %v2793_v59  }
 0x49d   :  { %v3129_v7 = vpop.f32.mrf.mxu1 }
 0x49e   :  { %v2274_v39 = vadd.f32 %v3129_v7, %v4270_v58 }
 0x49f   :  { %v2265_v18 = vpop.f32.mrf.mxu1 }
 0x4a0   :  { %v2406_v15 = vadd.f32 %v2374_v17, %v2274_v39  ;;  %v2266_v21 = vadd.f32 %v4270_v58, %v2265_v18  ;;  %v2382_v39 = vmul.f32 %v4265_v55, %v4071_v30 }
 0x4a1   :  { %v3130_v41 = vpop.f32.mrf.mxu1 }
 0x4a2   :  { %v2474_v12 = vadd.f32 %v2442_v38, %v2406_v15  ;;  %v2404_v13 = vadd.f32 %v2372_v6, %v2266_v21  ;;  %v2277_v32 = vadd.f32 %v3130_v41, %v4270_v58  ;;  %v2450_v38 = vmul.f32 %v4275_v52, %v4079_v57 }
 0x4a3   :  { %v2268_v43 = vpop.f32.mrf.mxu1  ;;  %v2380_v6 = vmul.f32 %v4265_v55, %v4089_v35  ;;  %v2451_v57 = vmul.f32 %v4275_v52, %v4097_v19  ;;  %v2381_v35 = vmul.f32 %v4265_v55, %v4108_v33 }
 0x4a4   :  { %v2472_v42 = vadd.f32 %v2440_v37, %v2404_v13  ;;  %v2407_v48 = vadd.f32 %v2375_v36, %v2277_v32  ;;  %v2269_v22 = vadd.f32 %v4270_v58, %v2268_v43  ;;  %v2448_v37 = vmul.f32 %v4275_v52, %v4077_v61 }
 0x4a5   :  { %v2383_v36 = vmul.f32 %v4265_v55, %v4084_v53  ;;  %v2449_v61 = vmul.f32 %v4275_v52, %v4105_v25 }
 0x4a6   :  { %v2475_v24 = vadd.f32 %v2443_v3, %v2407_v48  ;;  %v2405_v0 = vadd.f32 %v2373_v45, %v2269_v22 }
 0x4a8   :  { %v2808_v31 = vpack.c.bf16 %v2475_v24, %v2474_v12  ;;  %v2473_v49 = vadd.f32 %v2441_v9, %v2405_v0  ;;  %v4535_v9 = vld [vmem:[#allocation2_spill] sm:$0xff] }
 0x4a9   :  { %v2386_v24 = vmul.f32 %v4265_v55, %v4535_v9  ;;  %v4550_v9 = vld [vmem:[#allocation16_spill] sm:$0xff] }
 0x4aa   :  { %2864 = vst [vmem:[%s4488_s3 + $0x28] sm:$0xff] %v2808_v31   ;;  %v2803_v47 = vpack.c.bf16 %v2473_v49, %v2472_v42  ;;  %v4536_v31 = vld [vmem:[#allocation4_spill] sm:$0xff] }
 0x4ab   :  { %v2454_v49 = vmul.f32 %v4275_v52, %v4536_v31 }
 0x4ac   :  { %2863 = vst [vmem:[%s4488_s3 + $0x20] sm:$0xff] %v2803_v47   ;;  %v4537_v47 = vld [vmem:[#allocation6_spill] sm:$0xff] }
 0x4b5   :  { %v3133_v28 = vpop.f32.mrf.mxu1 }
 0x4b6   :  { %v2290_v23 = vadd.f32 %v3133_v28, %v4270_v58  ;;  %v2384_v28 = vmul.f32 %v4265_v55, %v4537_v47 }
 0x4b7   :  { %v2281_v4 = vpop.f32.mrf.mxu1 }
 0x4b8   :  { %v2410_v2 = vadd.f32 %v2378_v62, %v2290_v23  ;;  %v2282_v60 = vadd.f32 %v4270_v58, %v2281_v4  ;;  %v4538_v4 = vld [vmem:[#allocation3_spill] sm:$0xff] }
 0x4b9   :  { %v3134_v44 = vpop.f32.mrf.mxu1 }
 0x4ba   :  { %v2478_v5 = vadd.f32 %v2446_v63, %v2410_v2  ;;  %v2408_v26 = vadd.f32 %v2376_v20, %v2282_v60  ;;  %v2293_v10 = vadd.f32 %v3134_v44, %v4270_v58  ;;  %v2452_v63 = vmul.f32 %v4275_v52, %v4538_v4  ;;  %v4539_v2 = vld [vmem:[#allocation5_spill] sm:$0xff] }
 0x4bb   :  { %v2284_v8 = vpop.f32.mrf.mxu1  ;;  %v2387_v60 = vmul.f32 %v4265_v55, %v4539_v2  ;;  %v4552_v2 = vld [vmem:[#allocation22_spill] sm:$0xff] }
 0x4bc   :  { %v2476_v1 = vadd.f32 %v2444_v40, %v2408_v26  ;;  %v2411_v29 = vadd.f32 %v2379_v14, %v2293_v10  ;;  %v2285_v50 = vadd.f32 %v4270_v58, %v2284_v8 }
 0x4be   :  { %v2479_v59 = vadd.f32 %v2447_v46, %v2411_v29  ;;  %v2409_v11 = vadd.f32 %v2377_v27, %v2285_v50  ;;  %v4541_v46 = vld [vmem:[#allocation9_spill] sm:$0xff]  ;;  %v4542_v50 = vld [vmem:[#allocation8_spill] sm:$0xff] }
 0x4bf   :  { %v2385_v8 = vmul.f32 %v4265_v55, %v4541_v46 }
 0x4c0   :  { %v2818_v7 = vpack.c.bf16 %v2479_v59, %v2478_v5  ;;  %v2477_v17 = vadd.f32 %v2445_v34, %v2409_v11  ;;  %v4540_v5 = vld [vmem:[#allocation7_spill] sm:$0xff]  ;;  %v2453_v34 = vmul.f32 %v4275_v52, %v4542_v50 }
 0x4c1   :  { %v2455_v26 = vmul.f32 %v4275_v52, %v4540_v5 }
 0x4c2   :  { %2866 = vst [vmem:[%s4488_s3 + $0x38] sm:$0xff] %v2818_v7   ;;  %v2813_v51 = vpack.c.bf16 %v2477_v17, %v2476_v1 }
 0x4c4   :  { %2865 = vst [vmem:[%s4488_s3 + $0x30] sm:$0xff] %v2813_v51  }
 0x4cd   :  { %v3137_v16 = vpop.f32.mrf.mxu1 }
 0x4ce   :  { %v2306_v18 = vadd.f32 %v3137_v16, %v4270_v58 }
 0x4cf   :  { %v2297_v56 = vpop.f32.mrf.mxu1 }
 0x4d0   :  { %v2414_v15 = vadd.f32 %v2382_v39, %v2306_v18  ;;  %v2298_v21 = vadd.f32 %v4270_v58, %v2297_v56  ;;  %v4543_v39 = vld [vmem:[#allocation10_spill] sm:$0xff] }
 0x4d1   :  { %v3138_v41 = vpop.f32.mrf.mxu1  ;;  %v2390_v18 = vmul.f32 %v4265_v55, %v4543_v39 }
 0x4d2   :  { %v2482_v30 = vadd.f32 %v2450_v38, %v2414_v15  ;;  %v2412_v12 = vadd.f32 %v2380_v6, %v2298_v21  ;;  %v2309_v13 = vadd.f32 %v3138_v41, %v4270_v58  ;;  %v4544_v6 = vld [vmem:[#allocation12_spill] sm:$0xff]  ;;  %v4545_v21 = vld [vmem:[#allocation14_spill] sm:$0xff] }
 0x4d3   :  { %v2300_v32 = vpop.f32.mrf.mxu1  ;;  %v2458_v15 = vmul.f32 %v4275_v52, %v4544_v6 }
 0x4d4   :  { %v2480_v3 = vadd.f32 %v2448_v37, %v2412_v12  ;;  %v2415_v43 = vadd.f32 %v2383_v36, %v2309_v13  ;;  %v2301_v45 = vadd.f32 %v4270_v58, %v2300_v32  ;;  %v2388_v37 = vmul.f32 %v4265_v55, %v4545_v21 }
 0x4d6   :  { %v2483_v42 = vadd.f32 %v2451_v57, %v2415_v43  ;;  %v2413_v53 = vadd.f32 %v2381_v35, %v2301_v45  ;;  %v4547_v57 = vld [vmem:[#allocation13_spill] sm:$0xff]  ;;  %v4548_v45 = vld [vmem:[#allocation15_spill] sm:$0xff] }
 0x4d7   :  { %v2391_v32 = vmul.f32 %v4265_v55, %v4547_v57 }
 0x4d8   :  { %v2828_v48 = vpack.c.bf16 %v2483_v42, %v2482_v30  ;;  %v2481_v22 = vadd.f32 %v2449_v61, %v2413_v53  ;;  %v4546_v30 = vld [vmem:[#allocation11_spill] sm:$0xff]  ;;  %v2459_v61 = vmul.f32 %v4275_v52, %v4548_v45  ;;  %v4549_v53 = vld [vmem:[#allocation17_spill] sm:$0xff] }
 0x4d9   :  { %v2456_v12 = vmul.f32 %v4275_v52, %v4546_v30 }
 0x4da   :  { %2868 = vst [vmem:[%s4488_s3 + $0x48] sm:$0xff] %v2828_v48   ;;  %v2823_v19 = vpack.c.bf16 %v2481_v22, %v2480_v3  ;;  %v2389_v48 = vmul.f32 %v4265_v55, %v4549_v53 }
 0x4dc   :  { %2867 = vst [vmem:[%s4488_s3 + $0x40] sm:$0xff] %v2823_v19  }
 0x4e5   :  { %v3141_v33 = vpop.f32.mrf.mxu1 }
 0x4e6   :  { %v2322_v0 = vadd.f32 %v3141_v33, %v4270_v58 }
 0x4e7   :  { %v2313_v25 = vpop.f32.mrf.mxu1 }
 0x4e8   :  { %v2418_v62 = vadd.f32 %v2386_v24, %v2322_v0  ;;  %v2314_v23 = vadd.f32 %v4270_v58, %v2313_v25  ;;  %v2457_v24 = vmul.f32 %v4275_v52, %v4550_v9 }
 0x4e9   :  { %v3142_v20 = vpop.f32.mrf.mxu1 }
 0x4ea   :  { %v2486_v40 = vadd.f32 %v2454_v49, %v2418_v62  ;;  %v2416_v44 = vadd.f32 %v2384_v28, %v2314_v23  ;;  %v2325_v14 = vadd.f32 %v3142_v20, %v4270_v58  ;;  %v2394_v62 = vmul.f32 %v4265_v55, %v4188_v54 }
 0x4eb   :  { %v2316_v10 = vpop.f32.mrf.mxu1 }
 0x4ec   :  { %v2484_v27 = vadd.f32 %v2452_v63, %v2416_v44  ;;  %v2419_v1 = vadd.f32 %v2387_v60, %v2325_v14  ;;  %v2317_v29 = vadd.f32 %v4270_v58, %v2316_v10  ;;  %v4551_v63 = vld [vmem:[#allocation18_spill] sm:$0xff]  ;;  %v2462_v60 = vmul.f32 %v4275_v52, %v4552_v2  ;;  %v4553_v14 = vld [vmem:[#allocation20_spill] sm:$0xff]  ;;  %v4554_v10 = vld [vmem:[#allocation21_spill] sm:$0xff] }
 0x4ed   :  { %v2392_v20 = vmul.f32 %v4265_v55, %v4551_v63  ;;  %v2460_v5 = vmul.f32 %v4275_v52, %v4553_v14  ;;  %v2395_v46 = vmul.f32 %v4265_v55, %v4554_v10 }
 0x4ee   :  { %v2487_v59 = vadd.f32 %v2455_v26, %v2419_v1  ;;  %v2417_v11 = vadd.f32 %v2385_v8, %v2317_v29  ;;  %v4555_v1 = vld [vmem:[#allocation23_spill] sm:$0xff] }
 0x4ef   :  { %v2393_v29 = vmul.f32 %v4265_v55, %v4555_v1 }
 0x4f0   :  { %v2838_v7 = vpack.c.bf16 %v2487_v59, %v2486_v40  ;;  %v2485_v17 = vadd.f32 %v2453_v34, %v2417_v11  ;;  %v4556_v34 = vld [vmem:[#allocation24_spill] sm:$0xff] }
 0x4f1   :  { %v2463_v59 = vmul.f32 %v4275_v52, %v4556_v34 }
 0x4f2   :  { %2870 = vst [vmem:[%s4488_s3 + $0x58] sm:$0xff] %v2838_v7   ;;  %v2833_v51 = vpack.c.bf16 %v2485_v17, %v2484_v27 }
 0x4f4   :  { %2869 = vst [vmem:[%s4488_s3 + $0x50] sm:$0xff] %v2833_v51   ;;  %v4557_v51 = vld [vmem:[#allocation19_spill] sm:$0xff] }
 0x4fd   :  { %v3145_v16 = vpop.f32.mrf.mxu1 }
 0x4fe   :  { %v2338_v56 = vadd.f32 %v3145_v16, %v4270_v58  ;;  %v2461_v16 = vmul.f32 %v4275_v52, %v4557_v51 }
 0x4ff   :  { %v2329_v38 = vpop.f32.mrf.mxu1 }
 0x500   :  { %v2422_v41 = vadd.f32 %v2390_v18, %v2338_v56  ;;  %v2330_v36 = vadd.f32 %v4270_v58, %v2329_v38 }
 0x501   :  { %v3146_v13 = vpop.f32.mrf.mxu1 }
 0x502   :  { %v2490_v35 = vadd.f32 %v2458_v15, %v2422_v41  ;;  %v2420_v3 = vadd.f32 %v2388_v37, %v2330_v36  ;;  %v2341_v43 = vadd.f32 %v3146_v13, %v4270_v58 }
 0x503   :  { %v2332_v42 = vpop.f32.mrf.mxu1 }
 0x504   :  { %v2488_v22 = vadd.f32 %v2456_v12, %v2420_v3  ;;  %v2423_v19 = vadd.f32 %v2391_v32, %v2341_v43  ;;  %v2333_v33 = vadd.f32 %v4270_v58, %v2332_v42 }
 0x506   :  { %v2491_v0 = vadd.f32 %v2459_v61, %v2423_v19  ;;  %v2421_v25 = vadd.f32 %v2389_v48, %v2333_v33 }
 0x508   :  { %v2848_v31 = vpack.c.bf16 %v2491_v0, %v2490_v35  ;;  %v2489_v49 = vadd.f32 %v2457_v24, %v2421_v25 }
 0x50a   :  { %2872 = vst [vmem:[%s4488_s3 + $0x68] sm:$0xff] %v2848_v31   ;;  %v2843_v47 = vpack.c.bf16 %v2489_v49, %v2488_v22 }
 0x50c   :  { %2871 = vst [vmem:[%s4488_s3 + $0x60] sm:$0xff] %v2843_v47  }
 0x513   :  { %v3149_v28 = vpop.f32.mrf.mxu1 }
 0x514   :  { %v2354_v23 = vadd.f32 %v3149_v28, %v4270_v58 }
 0x515   :  { %v2345_v4 = vpop.f32.mrf.mxu1 }
 0x516   :  { %v2426_v40 = vadd.f32 %v2394_v62, %v2354_v23  ;;  %v2346_v44 = vadd.f32 %v4270_v58, %v2345_v4 }
 0x517   :  { %v3150_v26 = vpop.f32.mrf.mxu1 }
 0x518   :  { %v2494_v54 = vadd.f32 %v2462_v60, %v2426_v40  ;;  %v2424_v8 = vadd.f32 %v2392_v20, %v2346_v44  ;;  %v2357_v27 = vadd.f32 %v3150_v26, %v4270_v58 }
 0x519   :  { %v2348_v50 = vpop.f32.mrf.mxu1 }
 0x51a   :  { %v2492_v11 = vadd.f32 %v2460_v5, %v2424_v8  ;;  %v2427_v7 = vadd.f32 %v2395_v46, %v2357_v27  ;;  %v2349_v17 = vadd.f32 %v4270_v58, %v2348_v50 }
 0x51c   :  { %v2495_v39 = vadd.f32 %v2463_v59, %v2427_v7  ;;  %v2425_v18 = vadd.f32 %v2393_v29, %v2349_v17 }
 0x51e   :  { %v2858_v56 = vpack.c.bf16 %v2495_v39, %v2494_v54  ;;  %v2493_v38 = vadd.f32 %v2461_v16, %v2425_v18 }
 0x520   :  { %2874 = vst [vmem:[%s4488_s3 + $0x78] sm:$0xff] %v2858_v56   ;;  %v2853_v55 = vpack.c.bf16 %v2493_v38, %v2492_v11 }
 0x522   :  { %2873 = vst [vmem:[%s4488_s3 + $0x70] sm:$0xff] %v2853_v55  }

</bundles_post_ra>
